<compile_context>
chip_gen: v5e
topology: v5e:2x2
jax: 0.10.0
libtpu: 0.0.40
codegen_flags: <defaults>
</compile_context>

<pallas_src>
import functools

import jax
import jax.numpy as jnp
from jax.experimental import pallas as pl
from jax.experimental.pallas import tpu as pltpu


def _round_up(x, m):
    return ((x + m - 1) // m) * m


def _feature_embedding_kernel(ids_ref, tf_ref, embT_ref, wa1_ref, ba1_ref,
                              wa2_ref, ba2_ref, wf1_ref, bf1_ref, o_ref,
                              *, seq_len):
    # ids_ref / tf_ref : (S_pad, tile_b)  int32 / f32   batch on lanes
    # embT_ref         : (E_pad, V_pad)   bf16          embedding table, transposed
    # wa1_ref          : (A_pad, E_pad)   bf16          attentionfc1.weight (PyTorch layout)
    # ba1_ref          : (A_pad, 1)       f32
    # wa2_ref          : (E_pad, A_pad)   bf16          attentionfc2.weight
    # ba2_ref          : (E_pad, 1)       f32
    # wf1_ref          : (H_pad, E_pad)   bf16          featurefc1.weight, pre-scaled by 1/S
    # bf1_ref          : (H_pad, 1)       f32
    # o_ref            : (H_pad, tile_b)  f32           x_hidden^T for this batch tile
    v_pad = embT_ref.shape[1]
    tile_b = ids_ref.shape[1]

    ids = ids_ref[...]
    tf = tf_ref[...]
    embT = embT_ref[...]
    wa1 = wa1_ref[...]
    ba1 = ba1_ref[...]
    wa2 = wa2_ref[...]
    ba2 = ba2_ref[...]

    # vocab iota on sublanes, shared by all sequence steps (hoisted out of the loop)
    vocab_iota = jax.lax.broadcasted_iota(jnp.int32, (v_pad, tile_b), 0)

    # TODO(synk): for large vocabularies the resident one-hot/table path stops scaling;
    # switch to scalar-prefetched ids (SMEM) + pltpu.make_async_copy row-gather from HBM.
    parts = []
    for s in range(seq_len):
        ids_s = ids[s:s + 1, :]                 # (1, tile_b) -> sublane broadcast
        tf_s = tf[s:s + 1, :]
        # tfidf-scaled one-hot (vocab on sublanes, batch on lanes): exact selection,
        # tfidf/table rounded to bf16 for the MXU, f32 accumulation.
        oh = jnp.where(vocab_iota == ids_s, tf_s, 0.0).astype(jnp.bfloat16)
        # (tfidf * embedding)^T for this sequence step: (E_pad, tile_b)
        weT = jnp.dot(embT, oh, preferred_element_type=jnp.float32)
        # attention MLP: relu(fc1) -> sigmoid(fc2), weights already (out, in)
        aT = jnp.maximum(
            jnp.dot(wa1, weT.astype(jnp.bfloat16),
                    preferred_element_type=jnp.float32) + ba1, 0.0)
        zT = jnp.dot(wa2, aT.astype(jnp.bfloat16),
                     preferred_element_type=jnp.float32) + ba2
        attT = pl.reciprocal(1.0 + jnp.exp(-zT), approx=True)   # sigmoid on the EUP path
        parts.append(attT * weT)                                # (E_pad, tile_b)

    # pairwise (tree) reduction over the sequence; the 1/S factor is folded into wf1.
    while len(parts) > 1:
        nxt = [parts[i] + parts[i + 1] for i in range(0, len(parts) - 1, 2)]
        if len(parts) % 2:
            nxt.append(parts[-1])
        parts = nxt
    pooledT = parts[0]                                          # (E_pad, tile_b)

    hT = jnp.dot(wf1_ref[...], pooledT.astype(jnp.bfloat16),
                 preferred_element_type=jnp.float32) + bf1_ref[...]
    o_ref[...] = jnp.maximum(hT, 0.0)


def feature_embedding_forward(bow, tfidf, emb_weight, wa1, ba1, wa2, ba2, wf1, bf1,
                              *, tile_b=None, interpret=False):
    """Forward pass of FeatureEmbedding.

    bow:   (B, S) int token ids            tfidf: (B, S) float weights
    emb_weight: (V, E)                     (nn.Embedding)
    wa1: (A, E), ba1: (A,)                 (attentionfc1, PyTorch (out, in))
    wa2: (E, A), ba2: (E,)                 (attentionfc2)
    wf1: (H, E), bf1: (H,)                 (featurefc1)
    Returns x_hidden: (B, H) float32.
    """
    B, S = bow.shape
    V, E = emb_weight.shape
    A = wa1.shape[0]
    H = wf1.shape[0]

    V_pad = _round_up(V, 128)
    E_pad = _round_up(E, 128)
    A_pad = _round_up(A, 128)
    H_pad = _round_up(H, 128)
    S_pad = _round_up(S, 8)

    # ---- generation-aware VMEM budget ----
    try:
        vmem_cap = int(pltpu.get_tpu_info().vmem_capacity_bytes)
    except Exception:
        vmem_cap = 64 * 1024 * 1024                 # conservative (v7x per-core VMEM)
    # ~32 MiB on v7x (64 MiB VMEM), ~64 MiB on v5e/v6e (128 MiB VMEM)
    vmem_limit = max(min(vmem_cap // 2, 96 * 1024 * 1024), 16 * 1024 * 1024)

    # resident operands are double-buffered by the default pipeline -> count 2x
    resident = 2 * (2 * (E_pad * V_pad + 2 * A_pad * E_pad + H_pad * E_pad)
                    + 4 * (A_pad + E_pad + H_pad))
    # live f32 intermediates + double-buffered ids/tfidf/output blocks, per batch column
    per_col = 4 * (V_pad + (S + 4) * E_pad + A_pad + 3 * H_pad) + 32 * S_pad
    budget = max(vmem_limit - resident - 2 * 1024 * 1024, 1024 * 1024)

    tb = 512 if tile_b is None else int(tile_b)
    if B >= 256:
        tb = min(tb, _round_up((B + 1) // 2, 128))  # keep >=2 grid steps (v7x: 2 cores)
    tb = min(tb, max(128, (budget // per_col) // 128 * 128))
    tb = max(128, (tb // 128) * 128)                # lane-dense blocks & output stores
    tb = min(tb, _round_up(B, 128))
    B_pad = _round_up(B, tb)
    G = B_pad // tb

    # ---- host-side layout: batch on lanes, sequence on sublanes (lane-dense DMA) ----
    ids_p = jnp.zeros((B_pad, S_pad), jnp.int32).at[:B, :S].set(bow.astype(jnp.int32))
    tf_p = jnp.zeros((B_pad, S_pad), jnp.float32).at[:B, :S].set(tfidf.astype(jnp.float32))
    ids_sb = ids_p.reshape(G, tb, S_pad).transpose(0, 2, 1).reshape(G * S_pad, tb)
    tf_sb = tf_p.reshape(G, tb, S_pad).transpose(0, 2, 1).reshape(G * S_pad, tb)

    def pad2(x, r, c, dtype):
        out = jnp.zeros((r, c), dtype)
        return out.at[:x.shape[0], :x.shape[1]].set(x.astype(dtype))

    embT_p = pad2(jnp.asarray(emb_weight).T, E_pad, V_pad, jnp.bfloat16)
    wa1_p = pad2(wa1, A_pad, E_pad, jnp.bfloat16)
    wa2_p = pad2(wa2, E_pad, A_pad, jnp.bfloat16)
    wf1_p = pad2(wf1 / float(S), H_pad, E_pad, jnp.bfloat16)    # fold mean's 1/S
    ba1_p = pad2(ba1.reshape(-1, 1), A_pad, 1, jnp.float32)
    ba2_p = pad2(ba2.reshape(-1, 1), E_pad, 1, jnp.float32)
    bf1_p = pad2(bf1.reshape(-1, 1), H_pad, 1, jnp.float32)

    kernel = functools.partial(_feature_embedding_kernel, seq_len=S)

    out_t = pl.pallas_call(
        kernel,
        out_shape=jax.ShapeDtypeStruct((H_pad, B_pad), jnp.float32),
        grid=(G,),
        in_specs=[
            pl.BlockSpec((S_pad, tb), lambda i: (i, 0)),     # ids   (lane-dense per tile)
            pl.BlockSpec((S_pad, tb), lambda i: (i, 0)),     # tfidf (lane-dense per tile)
            pl.BlockSpec((E_pad, V_pad), lambda i: (0, 0)),  # embedding^T (resident)
            pl.BlockSpec((A_pad, E_pad), lambda i: (0, 0)),  # attentionfc1.weight
            pl.BlockSpec((A_pad, 1), lambda i: (0, 0)),
            pl.BlockSpec((E_pad, A_pad), lambda i: (0, 0)),  # attentionfc2.weight
            pl.BlockSpec((E_pad, 1), lambda i: (0, 0)),
            pl.BlockSpec((H_pad, E_pad), lambda i: (0, 0)),  # featurefc1.weight / S
            pl.BlockSpec((H_pad, 1), lambda i: (0, 0)),
        ],
        out_specs=pl.BlockSpec((H_pad, tb), lambda i: (0, i)),
        compiler_params=pltpu.CompilerParams(
            dimension_semantics=("parallel",),
            vmem_limit_bytes=int(vmem_limit),
        ),
        interpret=interpret,
    )(ids_sb, tf_sb, embT_p, wa1_p, ba1_p, wa2_p, ba2_p, wf1_p, bf1_p)

    return out_t[:H, :B].T


if __name__ == "__main__":
    # Small shapes consistent with FeatureEmbedding(input_size, embedding_size,
    # attention_layer_size, hidden_layer_size, embedding_weight_matrix)
    batch = 4
    seq_len = 8
    input_size = 64            # vocab
    embedding_size = 32
    attention_layer_size = 16
    hidden_layer_size = 32

    key = jax.random.PRNGKey(0)
    keys = jax.random.split(key, 9)

    bow = jax.random.randint(keys[0], (batch, seq_len), 0, input_size, dtype=jnp.int32)
    tfidf = jax.random.uniform(keys[1], (batch, seq_len), dtype=jnp.float32)

    emb_w = jax.random.normal(keys[2], (input_size, embedding_size), jnp.float32) * 0.1
    wa1 = jax.random.normal(keys[3], (attention_layer_size, embedding_size), jnp.float32) * 0.1
    ba1 = jax.random.normal(keys[4], (attention_layer_size,), jnp.float32) * 0.1
    wa2 = jax.random.normal(keys[5], (embedding_size, attention_layer_size), jnp.float32) * 0.1
    ba2 = jax.random.normal(keys[6], (embedding_size,), jnp.float32) * 0.1
    wf1 = jax.random.normal(keys[7], (hidden_layer_size, embedding_size), jnp.float32) * 0.1
    bf1 = jax.random.normal(keys[8], (hidden_layer_size,), jnp.float32) * 0.1

    out = feature_embedding_forward(bow, tfidf, emb_w, wa1, ba1, wa2, ba2, wf1, bf1)
    out = jax.block_until_ready(out)

    # Pure-JAX f32 reference matching the PyTorch forward.
    we = emb_w[bow] * tfidf[..., None]                               # (B, S, E)
    a_ref = jnp.maximum(jnp.einsum('bse,ae->bsa', we, wa1) + ba1, 0.0)
    att_ref = jax.nn.sigmoid(jnp.einsum('bsa,ea->bse', a_ref, wa2) + ba2)
    pooled_ref = (att_ref * we).mean(axis=1)                         # (B, E)
    ref = jnp.maximum(pooled_ref @ wf1.T + bf1, 0.0)                 # (B, H)

    assert out.shape == (batch, hidden_layer_size)
    max_diff = float(jnp.max(jnp.abs(out - ref)))
    assert jnp.allclose(out, ref, atol=3e-2, rtol=3e-2), f"mismatch vs reference: {max_diff}"

    print("KERNEL_OK")
</pallas_src>

<mosaic_0001>
module attributes {stable_mosaic.version = 11 : i64} {
  func.func @_feature_embedding_kernel(%arg0: i32, %arg1: memref<8x128xi32, #tpu.memory_space<vmem>>, %arg2: memref<8x128xf32, #tpu.memory_space<vmem>>, %arg3: memref<128x128xbf16, #tpu.memory_space<vmem>>, %arg4: memref<128x128xbf16, #tpu.memory_space<vmem>>, %arg5: memref<128x1xf32, #tpu.memory_space<vmem>>, %arg6: memref<128x128xbf16, #tpu.memory_space<vmem>>, %arg7: memref<128x1xf32, #tpu.memory_space<vmem>>, %arg8: memref<128x128xbf16, #tpu.memory_space<vmem>>, %arg9: memref<128x1xf32, #tpu.memory_space<vmem>>, %arg10: memref<128x128xf32, #tpu.memory_space<vmem>>) attributes {dimension_semantics = [#tpu.dimension_semantics<parallel>], iteration_bounds = array<i64: 1>, scalar_prefetch = 0 : i64, scratch_operands = 0 : i64, tpu.core_type = #tpu.core_type<tc>, window_params = [{transform_indices = @transform_0, window_bounds = array<i64: 8, 128>}, {transform_indices = @transform_1, window_bounds = array<i64: 8, 128>}, {pipeline_mode = #tpu.pipeline_mode<synchronous>, transform_indices = @transform_2, window_bounds = array<i64: 128, 128>}, {pipeline_mode = #tpu.pipeline_mode<synchronous>, transform_indices = @transform_3, window_bounds = array<i64: 128, 128>}, {pipeline_mode = #tpu.pipeline_mode<synchronous>, transform_indices = @transform_4, window_bounds = array<i64: 128, 1>}, {pipeline_mode = #tpu.pipeline_mode<synchronous>, transform_indices = @transform_5, window_bounds = array<i64: 128, 128>}, {pipeline_mode = #tpu.pipeline_mode<synchronous>, transform_indices = @transform_6, window_bounds = array<i64: 128, 1>}, {pipeline_mode = #tpu.pipeline_mode<synchronous>, transform_indices = @transform_7, window_bounds = array<i64: 128, 128>}, {pipeline_mode = #tpu.pipeline_mode<synchronous>, transform_indices = @transform_8, window_bounds = array<i64: 128, 1>}, {transform_indices = @transform_9, window_bounds = array<i64: 128, 128>}]} {
    %c0 = arith.constant 0 : index
    %c0_0 = arith.constant 0 : index
    %0 = vector.load %arg1[%c0, %c0_0] : memref<8x128xi32, #tpu.memory_space<vmem>>, vector<8x128xi32>
    %c0_1 = arith.constant 0 : index
    %c0_2 = arith.constant 0 : index
    %1 = vector.load %arg2[%c0_1, %c0_2] : memref<8x128xf32, #tpu.memory_space<vmem>>, vector<8x128xf32>
    %c0_3 = arith.constant 0 : index
    %c0_4 = arith.constant 0 : index
    %2 = vector.load %arg3[%c0_3, %c0_4] : memref<128x128xbf16, #tpu.memory_space<vmem>>, vector<128x128xbf16>
    %c0_5 = arith.constant 0 : index
    %c0_6 = arith.constant 0 : index
    %3 = vector.load %arg4[%c0_5, %c0_6] : memref<128x128xbf16, #tpu.memory_space<vmem>>, vector<128x128xbf16>
    %c0_7 = arith.constant 0 : index
    %c0_8 = arith.constant 0 : index
    %4 = vector.load %arg5[%c0_7, %c0_8] : memref<128x1xf32, #tpu.memory_space<vmem>>, vector<128x1xf32>
    %c0_9 = arith.constant 0 : index
    %c0_10 = arith.constant 0 : index
    %5 = vector.load %arg6[%c0_9, %c0_10] : memref<128x128xbf16, #tpu.memory_space<vmem>>, vector<128x128xbf16>
    %c0_11 = arith.constant 0 : index
    %c0_12 = arith.constant 0 : index
    %6 = vector.load %arg7[%c0_11, %c0_12] : memref<128x1xf32, #tpu.memory_space<vmem>>, vector<128x1xf32>
    %7 = tpu.iota {dimensions = array<i32: 0>} : vector<128x128xi32>
    %8 = vector.extract_strided_slice %0 {offsets = [0, 0], sizes = [1, 128], strides = [1, 1]} : vector<8x128xi32> to vector<1x128xi32>
    %9 = vector.extract_strided_slice %1 {offsets = [0, 0], sizes = [1, 128], strides = [1, 1]} : vector<8x128xf32> to vector<1x128xf32>
    %10 = vector.broadcast %8 : vector<1x128xi32> to vector<128x128xi32>
    %11 = arith.cmpi eq, %7, %10 : vector<128x128xi32>
    %cst = arith.constant 0.000000e+00 : f32
    %12 = vector.shape_cast %9 : vector<1x128xf32> to vector<1x128xf32>
    %13 = vector.broadcast %12 : vector<1x128xf32> to vector<128x128xf32>
    %14 = vector.broadcast %cst : f32 to vector<128x128xf32>
    %15 = arith.select %11, %13, %14 : vector<128x128xi1>, vector<128x128xf32>
    %16 = arith.truncf %15 : vector<128x128xf32> to vector<128x128xbf16>
    %cst_13 = arith.constant dense<0.000000e+00> : vector<128x128xf32>
    %17 = tpu.matmul %2, %16, %cst_13 {dimension_numbers = #tpu.dot_dimension_numbers<[1], [0], [0], [1], [0, 0, 1, 1], [], []>} : vector<128x128xbf16>, vector<128x128xbf16>, vector<128x128xf32> -> vector<128x128xf32>
    %18 = arith.truncf %17 : vector<128x128xf32> to vector<128x128xbf16>
    %cst_14 = arith.constant dense<0.000000e+00> : vector<128x128xf32>
    %19 = tpu.matmul %3, %18, %cst_14 {dimension_numbers = #tpu.dot_dimension_numbers<[1], [0], [0], [1], [0, 0, 1, 1], [], []>} : vector<128x128xbf16>, vector<128x128xbf16>, vector<128x128xf32> -> vector<128x128xf32>
    %20 = vector.broadcast %4 : vector<128x1xf32> to vector<128x128xf32>
    %21 = arith.addf %19, %20 : vector<128x128xf32>
    %cst_15 = arith.constant 0.000000e+00 : f32
    %22 = vector.broadcast %cst_15 : f32 to vector<128x128xf32>
    %23 = arith.maximumf %21, %22 : vector<128x128xf32>
    %24 = arith.truncf %23 : vector<128x128xf32> to vector<128x128xbf16>
    %cst_16 = arith.constant dense<0.000000e+00> : vector<128x128xf32>
    %25 = tpu.matmul %5, %24, %cst_16 {dimension_numbers = #tpu.dot_dimension_numbers<[1], [0], [0], [1], [0, 0, 1, 1], [], []>} : vector<128x128xbf16>, vector<128x128xbf16>, vector<128x128xf32> -> vector<128x128xf32>
    %26 = vector.broadcast %6 : vector<128x1xf32> to vector<128x128xf32>
    %27 = arith.addf %25, %26 : vector<128x128xf32>
    %cst_17 = arith.constant 0.000000e+00 : f32
    %28 = vector.broadcast %cst_17 : f32 to vector<128x128xf32>
    %29 = arith.subf %28, %27 : vector<128x128xf32>
    %30 = math.exp %29 : vector<128x128xf32>
    %cst_18 = arith.constant 1.000000e+00 : f32
    %31 = vector.broadcast %cst_18 : f32 to vector<128x128xf32>
    %32 = arith.addf %31, %30 : vector<128x128xf32>
    %33 = tpu.reciprocal %32 {approx = true} : vector<128x128xf32> -> vector<128x128xf32>
    %34 = arith.mulf %33, %17 : vector<128x128xf32>
    %35 = vector.extract_strided_slice %0 {offsets = [1, 0], sizes = [1, 128], strides = [1, 1]} : vector<8x128xi32> to vector<1x128xi32>
    %36 = vector.extract_strided_slice %1 {offsets = [1, 0], sizes = [1, 128], strides = [1, 1]} : vector<8x128xf32> to vector<1x128xf32>
    %37 = vector.broadcast %35 : vector<1x128xi32> to vector<128x128xi32>
    %38 = arith.cmpi eq, %7, %37 : vector<128x128xi32>
    %cst_19 = arith.constant 0.000000e+00 : f32
    %39 = vector.shape_cast %36 : vector<1x128xf32> to vector<1x128xf32>
    %40 = vector.broadcast %39 : vector<1x128xf32> to vector<128x128xf32>
    %41 = vector.broadcast %cst_19 : f32 to vector<128x128xf32>
    %42 = arith.select %38, %40, %41 : vector<128x128xi1>, vector<128x128xf32>
    %43 = arith.truncf %42 : vector<128x128xf32> to vector<128x128xbf16>
    %cst_20 = arith.constant dense<0.000000e+00> : vector<128x128xf32>
    %44 = tpu.matmul %2, %43, %cst_20 {dimension_numbers = #tpu.dot_dimension_numbers<[1], [0], [0], [1], [0, 0, 1, 1], [], []>} : vector<128x128xbf16>, vector<128x128xbf16>, vector<128x128xf32> -> vector<128x128xf32>
    %45 = arith.truncf %44 : vector<128x128xf32> to vector<128x128xbf16>
    %cst_21 = arith.constant dense<0.000000e+00> : vector<128x128xf32>
    %46 = tpu.matmul %3, %45, %cst_21 {dimension_numbers = #tpu.dot_dimension_numbers<[1], [0], [0], [1], [0, 0, 1, 1], [], []>} : vector<128x128xbf16>, vector<128x128xbf16>, vector<128x128xf32> -> vector<128x128xf32>
    %47 = vector.broadcast %4 : vector<128x1xf32> to vector<128x128xf32>
    %48 = arith.addf %46, %47 : vector<128x128xf32>
    %cst_22 = arith.constant 0.000000e+00 : f32
    %49 = vector.broadcast %cst_22 : f32 to vector<128x128xf32>
    %50 = arith.maximumf %48, %49 : vector<128x128xf32>
    %51 = arith.truncf %50 : vector<128x128xf32> to vector<128x128xbf16>
    %cst_23 = arith.constant dense<0.000000e+00> : vector<128x128xf32>
    %52 = tpu.matmul %5, %51, %cst_23 {dimension_numbers = #tpu.dot_dimension_numbers<[1], [0], [0], [1], [0, 0, 1, 1], [], []>} : vector<128x128xbf16>, vector<128x128xbf16>, vector<128x128xf32> -> vector<128x128xf32>
    %53 = vector.broadcast %6 : vector<128x1xf32> to vector<128x128xf32>
    %54 = arith.addf %52, %53 : vector<128x128xf32>
    %cst_24 = arith.constant 0.000000e+00 : f32
    %55 = vector.broadcast %cst_24 : f32 to vector<128x128xf32>
    %56 = arith.subf %55, %54 : vector<128x128xf32>
    %57 = math.exp %56 : vector<128x128xf32>
    %cst_25 = arith.constant 1.000000e+00 : f32
    %58 = vector.broadcast %cst_25 : f32 to vector<128x128xf32>
    %59 = arith.addf %58, %57 : vector<128x128xf32>
    %60 = tpu.reciprocal %59 {approx = true} : vector<128x128xf32> -> vector<128x128xf32>
    %61 = arith.mulf %60, %44 : vector<128x128xf32>
    %62 = vector.extract_strided_slice %0 {offsets = [2, 0], sizes = [1, 128], strides = [1, 1]} : vector<8x128xi32> to vector<1x128xi32>
    %63 = vector.extract_strided_slice %1 {offsets = [2, 0], sizes = [1, 128], strides = [1, 1]} : vector<8x128xf32> to vector<1x128xf32>
    %64 = vector.broadcast %62 : vector<1x128xi32> to vector<128x128xi32>
    %65 = arith.cmpi eq, %7, %64 : vector<128x128xi32>
    %cst_26 = arith.constant 0.000000e+00 : f32
    %66 = vector.shape_cast %63 : vector<1x128xf32> to vector<1x128xf32>
    %67 = vector.broadcast %66 : vector<1x128xf32> to vector<128x128xf32>
    %68 = vector.broadcast %cst_26 : f32 to vector<128x128xf32>
    %69 = arith.select %65, %67, %68 : vector<128x128xi1>, vector<128x128xf32>
    %70 = arith.truncf %69 : vector<128x128xf32> to vector<128x128xbf16>
    %cst_27 = arith.constant dense<0.000000e+00> : vector<128x128xf32>
    %71 = tpu.matmul %2, %70, %cst_27 {dimension_numbers = #tpu.dot_dimension_numbers<[1], [0], [0], [1], [0, 0, 1, 1], [], []>} : vector<128x128xbf16>, vector<128x128xbf16>, vector<128x128xf32> -> vector<128x128xf32>
    %72 = arith.truncf %71 : vector<128x128xf32> to vector<128x128xbf16>
    %cst_28 = arith.constant dense<0.000000e+00> : vector<128x128xf32>
    %73 = tpu.matmul %3, %72, %cst_28 {dimension_numbers = #tpu.dot_dimension_numbers<[1], [0], [0], [1], [0, 0, 1, 1], [], []>} : vector<128x128xbf16>, vector<128x128xbf16>, vector<128x128xf32> -> vector<128x128xf32>
    %74 = vector.broadcast %4 : vector<128x1xf32> to vector<128x128xf32>
    %75 = arith.addf %73, %74 : vector<128x128xf32>
    %cst_29 = arith.constant 0.000000e+00 : f32
    %76 = vector.broadcast %cst_29 : f32 to vector<128x128xf32>
    %77 = arith.maximumf %75, %76 : vector<128x128xf32>
    %78 = arith.truncf %77 : vector<128x128xf32> to vector<128x128xbf16>
    %cst_30 = arith.constant dense<0.000000e+00> : vector<128x128xf32>
    %79 = tpu.matmul %5, %78, %cst_30 {dimension_numbers = #tpu.dot_dimension_numbers<[1], [0], [0], [1], [0, 0, 1, 1], [], []>} : vector<128x128xbf16>, vector<128x128xbf16>, vector<128x128xf32> -> vector<128x128xf32>
    %80 = vector.broadcast %6 : vector<128x1xf32> to vector<128x128xf32>
    %81 = arith.addf %79, %80 : vector<128x128xf32>
    %cst_31 = arith.constant 0.000000e+00 : f32
    %82 = vector.broadcast %cst_31 : f32 to vector<128x128xf32>
    %83 = arith.subf %82, %81 : vector<128x128xf32>
    %84 = math.exp %83 : vector<128x128xf32>
    %cst_32 = arith.constant 1.000000e+00 : f32
    %85 = vector.broadcast %cst_32 : f32 to vector<128x128xf32>
    %86 = arith.addf %85, %84 : vector<128x128xf32>
    %87 = tpu.reciprocal %86 {approx = true} : vector<128x128xf32> -> vector<128x128xf32>
    %88 = arith.mulf %87, %71 : vector<128x128xf32>
    %89 = vector.extract_strided_slice %0 {offsets = [3, 0], sizes = [1, 128], strides = [1, 1]} : vector<8x128xi32> to vector<1x128xi32>
    %90 = vector.extract_strided_slice %1 {offsets = [3, 0], sizes = [1, 128], strides = [1, 1]} : vector<8x128xf32> to vector<1x128xf32>
    %91 = vector.broadcast %89 : vector<1x128xi32> to vector<128x128xi32>
    %92 = arith.cmpi eq, %7, %91 : vector<128x128xi32>
    %cst_33 = arith.constant 0.000000e+00 : f32
    %93 = vector.shape_cast %90 : vector<1x128xf32> to vector<1x128xf32>
    %94 = vector.broadcast %93 : vector<1x128xf32> to vector<128x128xf32>
    %95 = vector.broadcast %cst_33 : f32 to vector<128x128xf32>
    %96 = arith.select %92, %94, %95 : vector<128x128xi1>, vector<128x128xf32>
    %97 = arith.truncf %96 : vector<128x128xf32> to vector<128x128xbf16>
    %cst_34 = arith.constant dense<0.000000e+00> : vector<128x128xf32>
    %98 = tpu.matmul %2, %97, %cst_34 {dimension_numbers = #tpu.dot_dimension_numbers<[1], [0], [0], [1], [0, 0, 1, 1], [], []>} : vector<128x128xbf16>, vector<128x128xbf16>, vector<128x128xf32> -> vector<128x128xf32>
    %99 = arith.truncf %98 : vector<128x128xf32> to vector<128x128xbf16>
    %cst_35 = arith.constant dense<0.000000e+00> : vector<128x128xf32>
    %100 = tpu.matmul %3, %99, %cst_35 {dimension_numbers = #tpu.dot_dimension_numbers<[1], [0], [0], [1], [0, 0, 1, 1], [], []>} : vector<128x128xbf16>, vector<128x128xbf16>, vector<128x128xf32> -> vector<128x128xf32>
    %101 = vector.broadcast %4 : vector<128x1xf32> to vector<128x128xf32>
    %102 = arith.addf %100, %101 : vector<128x128xf32>
    %cst_36 = arith.constant 0.000000e+00 : f32
    %103 = vector.broadcast %cst_36 : f32 to vector<128x128xf32>
    %104 = arith.maximumf %102, %103 : vector<128x128xf32>
    %105 = arith.truncf %104 : vector<128x128xf32> to vector<128x128xbf16>
    %cst_37 = arith.constant dense<0.000000e+00> : vector<128x128xf32>
    %106 = tpu.matmul %5, %105, %cst_37 {dimension_numbers = #tpu.dot_dimension_numbers<[1], [0], [0], [1], [0, 0, 1, 1], [], []>} : vector<128x128xbf16>, vector<128x128xbf16>, vector<128x128xf32> -> vector<128x128xf32>
    %107 = vector.broadcast %6 : vector<128x1xf32> to vector<128x128xf32>
    %108 = arith.addf %106, %107 : vector<128x128xf32>
    %cst_38 = arith.constant 0.000000e+00 : f32
    %109 = vector.broadcast %cst_38 : f32 to vector<128x128xf32>
    %110 = arith.subf %109, %108 : vector<128x128xf32>
    %111 = math.exp %110 : vector<128x128xf32>
    %cst_39 = arith.constant 1.000000e+00 : f32
    %112 = vector.broadcast %cst_39 : f32 to vector<128x128xf32>
    %113 = arith.addf %112, %111 : vector<128x128xf32>
    %114 = tpu.reciprocal %113 {approx = true} : vector<128x128xf32> -> vector<128x128xf32>
    %115 = arith.mulf %114, %98 : vector<128x128xf32>
    %116 = vector.extract_strided_slice %0 {offsets = [4, 0], sizes = [1, 128], strides = [1, 1]} : vector<8x128xi32> to vector<1x128xi32>
    %117 = vector.extract_strided_slice %1 {offsets = [4, 0], sizes = [1, 128], strides = [1, 1]} : vector<8x128xf32> to vector<1x128xf32>
    %118 = vector.broadcast %116 : vector<1x128xi32> to vector<128x128xi32>
    %119 = arith.cmpi eq, %7, %118 : vector<128x128xi32>
    %cst_40 = arith.constant 0.000000e+00 : f32
    %120 = vector.shape_cast %117 : vector<1x128xf32> to vector<1x128xf32>
    %121 = vector.broadcast %120 : vector<1x128xf32> to vector<128x128xf32>
    %122 = vector.broadcast %cst_40 : f32 to vector<128x128xf32>
    %123 = arith.select %119, %121, %122 : vector<128x128xi1>, vector<128x128xf32>
    %124 = arith.truncf %123 : vector<128x128xf32> to vector<128x128xbf16>
    %cst_41 = arith.constant dense<0.000000e+00> : vector<128x128xf32>
    %125 = tpu.matmul %2, %124, %cst_41 {dimension_numbers = #tpu.dot_dimension_numbers<[1], [0], [0], [1], [0, 0, 1, 1], [], []>} : vector<128x128xbf16>, vector<128x128xbf16>, vector<128x128xf32> -> vector<128x128xf32>
    %126 = arith.truncf %125 : vector<128x128xf32> to vector<128x128xbf16>
    %cst_42 = arith.constant dense<0.000000e+00> : vector<128x128xf32>
    %127 = tpu.matmul %3, %126, %cst_42 {dimension_numbers = #tpu.dot_dimension_numbers<[1], [0], [0], [1], [0, 0, 1, 1], [], []>} : vector<128x128xbf16>, vector<128x128xbf16>, vector<128x128xf32> -> vector<128x128xf32>
    %128 = vector.broadcast %4 : vector<128x1xf32> to vector<128x128xf32>
    %129 = arith.addf %127, %128 : vector<128x128xf32>
    %cst_43 = arith.constant 0.000000e+00 : f32
    %130 = vector.broadcast %cst_43 : f32 to vector<128x128xf32>
    %131 = arith.maximumf %129, %130 : vector<128x128xf32>
    %132 = arith.truncf %131 : vector<128x128xf32> to vector<128x128xbf16>
    %cst_44 = arith.constant dense<0.000000e+00> : vector<128x128xf32>
    %133 = tpu.matmul %5, %132, %cst_44 {dimension_numbers = #tpu.dot_dimension_numbers<[1], [0], [0], [1], [0, 0, 1, 1], [], []>} : vector<128x128xbf16>, vector<128x128xbf16>, vector<128x128xf32> -> vector<128x128xf32>
    %134 = vector.broadcast %6 : vector<128x1xf32> to vector<128x128xf32>
    %135 = arith.addf %133, %134 : vector<128x128xf32>
    %cst_45 = arith.constant 0.000000e+00 : f32
    %136 = vector.broadcast %cst_45 : f32 to vector<128x128xf32>
    %137 = arith.subf %136, %135 : vector<128x128xf32>
    %138 = math.exp %137 : vector<128x128xf32>
    %cst_46 = arith.constant 1.000000e+00 : f32
    %139 = vector.broadcast %cst_46 : f32 to vector<128x128xf32>
    %140 = arith.addf %139, %138 : vector<128x128xf32>
    %141 = tpu.reciprocal %140 {approx = true} : vector<128x128xf32> -> vector<128x128xf32>
    %142 = arith.mulf %141, %125 : vector<128x128xf32>
    %143 = vector.extract_strided_slice %0 {offsets = [5, 0], sizes = [1, 128], strides = [1, 1]} : vector<8x128xi32> to vector<1x128xi32>
    %144 = vector.extract_strided_slice %1 {offsets = [5, 0], sizes = [1, 128], strides = [1, 1]} : vector<8x128xf32> to vector<1x128xf32>
    %145 = vector.broadcast %143 : vector<1x128xi32> to vector<128x128xi32>
    %146 = arith.cmpi eq, %7, %145 : vector<128x128xi32>
    %cst_47 = arith.constant 0.000000e+00 : f32
    %147 = vector.shape_cast %144 : vector<1x128xf32> to vector<1x128xf32>
    %148 = vector.broadcast %147 : vector<1x128xf32> to vector<128x128xf32>
    %149 = vector.broadcast %cst_47 : f32 to vector<128x128xf32>
    %150 = arith.select %146, %148, %149 : vector<128x128xi1>, vector<128x128xf32>
    %151 = arith.truncf %150 : vector<128x128xf32> to vector<128x128xbf16>
    %cst_48 = arith.constant dense<0.000000e+00> : vector<128x128xf32>
    %152 = tpu.matmul %2, %151, %cst_48 {dimension_numbers = #tpu.dot_dimension_numbers<[1], [0], [0], [1], [0, 0, 1, 1], [], []>} : vector<128x128xbf16>, vector<128x128xbf16>, vector<128x128xf32> -> vector<128x128xf32>
    %153 = arith.truncf %152 : vector<128x128xf32> to vector<128x128xbf16>
    %cst_49 = arith.constant dense<0.000000e+00> : vector<128x128xf32>
    %154 = tpu.matmul %3, %153, %cst_49 {dimension_numbers = #tpu.dot_dimension_numbers<[1], [0], [0], [1], [0, 0, 1, 1], [], []>} : vector<128x128xbf16>, vector<128x128xbf16>, vector<128x128xf32> -> vector<128x128xf32>
    %155 = vector.broadcast %4 : vector<128x1xf32> to vector<128x128xf32>
    %156 = arith.addf %154, %155 : vector<128x128xf32>
    %cst_50 = arith.constant 0.000000e+00 : f32
    %157 = vector.broadcast %cst_50 : f32 to vector<128x128xf32>
    %158 = arith.maximumf %156, %157 : vector<128x128xf32>
    %159 = arith.truncf %158 : vector<128x128xf32> to vector<128x128xbf16>
    %cst_51 = arith.constant dense<0.000000e+00> : vector<128x128xf32>
    %160 = tpu.matmul %5, %159, %cst_51 {dimension_numbers = #tpu.dot_dimension_numbers<[1], [0], [0], [1], [0, 0, 1, 1], [], []>} : vector<128x128xbf16>, vector<128x128xbf16>, vector<128x128xf32> -> vector<128x128xf32>
    %161 = vector.broadcast %6 : vector<128x1xf32> to vector<128x128xf32>
    %162 = arith.addf %160, %161 : vector<128x128xf32>
    %cst_52 = arith.constant 0.000000e+00 : f32
    %163 = vector.broadcast %cst_52 : f32 to vector<128x128xf32>
    %164 = arith.subf %163, %162 : vector<128x128xf32>
    %165 = math.exp %164 : vector<128x128xf32>
    %cst_53 = arith.constant 1.000000e+00 : f32
    %166 = vector.broadcast %cst_53 : f32 to vector<128x128xf32>
    %167 = arith.addf %166, %165 : vector<128x128xf32>
    %168 = tpu.reciprocal %167 {approx = true} : vector<128x128xf32> -> vector<128x128xf32>
    %169 = arith.mulf %168, %152 : vector<128x128xf32>
    %170 = vector.extract_strided_slice %0 {offsets = [6, 0], sizes = [1, 128], strides = [1, 1]} : vector<8x128xi32> to vector<1x128xi32>
    %171 = vector.extract_strided_slice %1 {offsets = [6, 0], sizes = [1, 128], strides = [1, 1]} : vector<8x128xf32> to vector<1x128xf32>
    %172 = vector.broadcast %170 : vector<1x128xi32> to vector<128x128xi32>
    %173 = arith.cmpi eq, %7, %172 : vector<128x128xi32>
    %cst_54 = arith.constant 0.000000e+00 : f32
    %174 = vector.shape_cast %171 : vector<1x128xf32> to vector<1x128xf32>
    %175 = vector.broadcast %174 : vector<1x128xf32> to vector<128x128xf32>
    %176 = vector.broadcast %cst_54 : f32 to vector<128x128xf32>
    %177 = arith.select %173, %175, %176 : vector<128x128xi1>, vector<128x128xf32>
    %178 = arith.truncf %177 : vector<128x128xf32> to vector<128x128xbf16>
    %cst_55 = arith.constant dense<0.000000e+00> : vector<128x128xf32>
    %179 = tpu.matmul %2, %178, %cst_55 {dimension_numbers = #tpu.dot_dimension_numbers<[1], [0], [0], [1], [0, 0, 1, 1], [], []>} : vector<128x128xbf16>, vector<128x128xbf16>, vector<128x128xf32> -> vector<128x128xf32>
    %180 = arith.truncf %179 : vector<128x128xf32> to vector<128x128xbf16>
    %cst_56 = arith.constant dense<0.000000e+00> : vector<128x128xf32>
    %181 = tpu.matmul %3, %180, %cst_56 {dimension_numbers = #tpu.dot_dimension_numbers<[1], [0], [0], [1], [0, 0, 1, 1], [], []>} : vector<128x128xbf16>, vector<128x128xbf16>, vector<128x128xf32> -> vector<128x128xf32>
    %182 = vector.broadcast %4 : vector<128x1xf32> to vector<128x128xf32>
    %183 = arith.addf %181, %182 : vector<128x128xf32>
    %cst_57 = arith.constant 0.000000e+00 : f32
    %184 = vector.broadcast %cst_57 : f32 to vector<128x128xf32>
    %185 = arith.maximumf %183, %184 : vector<128x128xf32>
    %186 = arith.truncf %185 : vector<128x128xf32> to vector<128x128xbf16>
    %cst_58 = arith.constant dense<0.000000e+00> : vector<128x128xf32>
    %187 = tpu.matmul %5, %186, %cst_58 {dimension_numbers = #tpu.dot_dimension_numbers<[1], [0], [0], [1], [0, 0, 1, 1], [], []>} : vector<128x128xbf16>, vector<128x128xbf16>, vector<128x128xf32> -> vector<128x128xf32>
    %188 = vector.broadcast %6 : vector<128x1xf32> to vector<128x128xf32>
    %189 = arith.addf %187, %188 : vector<128x128xf32>
    %cst_59 = arith.constant 0.000000e+00 : f32
    %190 = vector.broadcast %cst_59 : f32 to vector<128x128xf32>
    %191 = arith.subf %190, %189 : vector<128x128xf32>
    %192 = math.exp %191 : vector<128x128xf32>
    %cst_60 = arith.constant 1.000000e+00 : f32
    %193 = vector.broadcast %cst_60 : f32 to vector<128x128xf32>
    %194 = arith.addf %193, %192 : vector<128x128xf32>
    %195 = tpu.reciprocal %194 {approx = true} : vector<128x128xf32> -> vector<128x128xf32>
    %196 = arith.mulf %195, %179 : vector<128x128xf32>
    %197 = vector.extract_strided_slice %0 {offsets = [7, 0], sizes = [1, 128], strides = [1, 1]} : vector<8x128xi32> to vector<1x128xi32>
    %198 = vector.extract_strided_slice %1 {offsets = [7, 0], sizes = [1, 128], strides = [1, 1]} : vector<8x128xf32> to vector<1x128xf32>
    %199 = vector.broadcast %197 : vector<1x128xi32> to vector<128x128xi32>
    %200 = arith.cmpi eq, %7, %199 : vector<128x128xi32>
    %cst_61 = arith.constant 0.000000e+00 : f32
    %201 = vector.shape_cast %198 : vector<1x128xf32> to vector<1x128xf32>
    %202 = vector.broadcast %201 : vector<1x128xf32> to vector<128x128xf32>
    %203 = vector.broadcast %cst_61 : f32 to vector<128x128xf32>
    %204 = arith.select %200, %202, %203 : vector<128x128xi1>, vector<128x128xf32>
    %205 = arith.truncf %204 : vector<128x128xf32> to vector<128x128xbf16>
    %cst_62 = arith.constant dense<0.000000e+00> : vector<128x128xf32>
    %206 = tpu.matmul %2, %205, %cst_62 {dimension_numbers = #tpu.dot_dimension_numbers<[1], [0], [0], [1], [0, 0, 1, 1], [], []>} : vector<128x128xbf16>, vector<128x128xbf16>, vector<128x128xf32> -> vector<128x128xf32>
    %207 = arith.truncf %206 : vector<128x128xf32> to vector<128x128xbf16>
    %cst_63 = arith.constant dense<0.000000e+00> : vector<128x128xf32>
    %208 = tpu.matmul %3, %207, %cst_63 {dimension_numbers = #tpu.dot_dimension_numbers<[1], [0], [0], [1], [0, 0, 1, 1], [], []>} : vector<128x128xbf16>, vector<128x128xbf16>, vector<128x128xf32> -> vector<128x128xf32>
    %209 = vector.broadcast %4 : vector<128x1xf32> to vector<128x128xf32>
    %210 = arith.addf %208, %209 : vector<128x128xf32>
    %cst_64 = arith.constant 0.000000e+00 : f32
    %211 = vector.broadcast %cst_64 : f32 to vector<128x128xf32>
    %212 = arith.maximumf %210, %211 : vector<128x128xf32>
    %213 = arith.truncf %212 : vector<128x128xf32> to vector<128x128xbf16>
    %cst_65 = arith.constant dense<0.000000e+00> : vector<128x128xf32>
    %214 = tpu.matmul %5, %213, %cst_65 {dimension_numbers = #tpu.dot_dimension_numbers<[1], [0], [0], [1], [0, 0, 1, 1], [], []>} : vector<128x128xbf16>, vector<128x128xbf16>, vector<128x128xf32> -> vector<128x128xf32>
    %215 = vector.broadcast %6 : vector<128x1xf32> to vector<128x128xf32>
    %216 = arith.addf %214, %215 : vector<128x128xf32>
    %cst_66 = arith.constant 0.000000e+00 : f32
    %217 = vector.broadcast %cst_66 : f32 to vector<128x128xf32>
    %218 = arith.subf %217, %216 : vector<128x128xf32>
    %219 = math.exp %218 : vector<128x128xf32>
    %cst_67 = arith.constant 1.000000e+00 : f32
    %220 = vector.broadcast %cst_67 : f32 to vector<128x128xf32>
    %221 = arith.addf %220, %219 : vector<128x128xf32>
    %222 = tpu.reciprocal %221 {approx = true} : vector<128x128xf32> -> vector<128x128xf32>
    %223 = arith.mulf %222, %206 : vector<128x128xf32>
    %224 = arith.addf %34, %61 : vector<128x128xf32>
    %225 = arith.addf %88, %115 : vector<128x128xf32>
    %226 = arith.addf %142, %169 : vector<128x128xf32>
    %227 = arith.addf %196, %223 : vector<128x128xf32>
    %228 = arith.addf %224, %225 : vector<128x128xf32>
    %229 = arith.addf %226, %227 : vector<128x128xf32>
    %230 = arith.addf %228, %229 : vector<128x128xf32>
    %c0_68 = arith.constant 0 : index
    %c0_69 = arith.constant 0 : index
    %231 = vector.load %arg8[%c0_68, %c0_69] : memref<128x128xbf16, #tpu.memory_space<vmem>>, vector<128x128xbf16>
    %232 = arith.truncf %230 : vector<128x128xf32> to vector<128x128xbf16>
    %cst_70 = arith.constant dense<0.000000e+00> : vector<128x128xf32>
    %233 = tpu.matmul %231, %232, %cst_70 {dimension_numbers = #tpu.dot_dimension_numbers<[1], [0], [0], [1], [0, 0, 1, 1], [], []>} : vector<128x128xbf16>, vector<128x128xbf16>, vector<128x128xf32> -> vector<128x128xf32>
    %c0_71 = arith.constant 0 : index
    %c0_72 = arith.constant 0 : index
    %234 = vector.load %arg9[%c0_71, %c0_72] : memref<128x1xf32, #tpu.memory_space<vmem>>, vector<128x1xf32>
    %235 = vector.broadcast %234 : vector<128x1xf32> to vector<128x128xf32>
    %236 = arith.addf %233, %235 : vector<128x128xf32>
    %cst_73 = arith.constant 0.000000e+00 : f32
    %237 = vector.broadcast %cst_73 : f32 to vector<128x128xf32>
    %238 = arith.maximumf %236, %237 : vector<128x128xf32>
    %c0_74 = arith.constant 0 : index
    %c0_75 = arith.constant 0 : index
    %239 = vector.load %arg10[%c0_74, %c0_75] : memref<128x128xf32, #tpu.memory_space<vmem>>, vector<128x128xf32>
    tpu.vector_store %arg10[%c0_74, %c0_75], %238 {strides = array<i32>} : memref<128x128xf32, #tpu.memory_space<vmem>>, vector<128x128xf32>,
    return
  }
  func.func @transform_0(%arg0: i32) -> (i32, i32) {
    %c0_i32 = arith.constant 0 : i32
    %c0_i32_0 = arith.constant 0 : i32
    return %arg0, %c0_i32 : i32, i32
  }
  func.func @transform_1(%arg0: i32) -> (i32, i32) {
    %c0_i32 = arith.constant 0 : i32
    %c0_i32_0 = arith.constant 0 : i32
    return %arg0, %c0_i32 : i32, i32
  }
  func.func @transform_2(%arg0: i32) -> (i32, i32) {
    %c0_i32 = arith.constant 0 : i32
    %c0_i32_0 = arith.constant 0 : i32
    %c0_i32_1 = arith.constant 0 : i32
    return %c0_i32, %c0_i32_0 : i32, i32
  }
  func.func @transform_3(%arg0: i32) -> (i32, i32) {
    %c0_i32 = arith.constant 0 : i32
    %c0_i32_0 = arith.constant 0 : i32
    %c0_i32_1 = arith.constant 0 : i32
    return %c0_i32, %c0_i32_0 : i32, i32
  }
  func.func @transform_4(%arg0: i32) -> (i32, i32) {
    %c0_i32 = arith.constant 0 : i32
    %c0_i32_0 = arith.constant 0 : i32
    %c0_i32_1 = arith.constant 0 : i32
    return %c0_i32, %c0_i32_0 : i32, i32
  }
  func.func @transform_5(%arg0: i32) -> (i32, i32) {
    %c0_i32 = arith.constant 0 : i32
    %c0_i32_0 = arith.constant 0 : i32
    %c0_i32_1 = arith.constant 0 : i32
    return %c0_i32, %c0_i32_0 : i32, i32
  }
  func.func @transform_6(%arg0: i32) -> (i32, i32) {
    %c0_i32 = arith.constant 0 : i32
    %c0_i32_0 = arith.constant 0 : i32
    %c0_i32_1 = arith.constant 0 : i32
    return %c0_i32, %c0_i32_0 : i32, i32
  }
  func.func @transform_7(%arg0: i32) -> (i32, i32) {
    %c0_i32 = arith.constant 0 : i32
    %c0_i32_0 = arith.constant 0 : i32
    %c0_i32_1 = arith.constant 0 : i32
    return %c0_i32, %c0_i32_0 : i32, i32
  }
  func.func @transform_8(%arg0: i32) -> (i32, i32) {
    %c0_i32 = arith.constant 0 : i32
    %c0_i32_0 = arith.constant 0 : i32
    %c0_i32_1 = arith.constant 0 : i32
    return %c0_i32, %c0_i32_0 : i32, i32
  }
  func.func @transform_9(%arg0: i32) -> (i32, i32) {
    %c0_i32 = arith.constant 0 : i32
    %c0_i32_0 = arith.constant 0 : i32
    return %c0_i32, %arg0 : i32, i32
  }
}

</mosaic_0001>

<bundles_post_ra>
// kernel: tpu_custom_call.1
= control target key start
LH: loop header
LB: loop body
LE: loop exit
PB: predicated region body
PF: predicated region fallthrough
CT: control target
= control target key end

     0   :  { %v115_v2 = vlaneseq  ;;  %s6769_s0 = inlined_call_operand.vmem [shape: s32[8,128], index: 0, kind: input, shape index: {}]   ;;  %s6770_s1 = inlined_call_operand.vmem [shape: f32[8,128], index: 1, kind: input, shape index: {}]   ;;  %s6771_s2 = inlined_call_operand.vmem [shape: bf16[128,128], index: 2, kind: input, shape index: {}]   ;;  %s6772_s3 = inlined_call_operand.vmem [shape: bf16[128,128], index: 3, kind: input, shape index: {}]   ;;  %s6773_s4 = inlined_call_operand.vmem [shape: f32[128,1], index: 4, kind: input, shape index: {}]   ;;  %s6774_s5 = inlined_call_operand.vmem [shape: bf16[128,128], index: 5, kind: input, shape index: {}]   ;;  %s6775_s6 = inlined_call_operand.vmem [shape: f32[128,1], index: 6, kind: input, shape index: {}]   ;;  %s6776_s7 = inlined_call_operand.vmem [shape: bf16[128,128], index: 7, kind: input, shape index: {}]   ;;  %s6777_s8 = inlined_call_operand.vmem [shape: f32[128,1], index: 8, kind: input, shape index: {}]   ;;  %s6778_s9 = inlined_call_operand.hbm [shape: f32[128,128], index: 9, kind: output, shape index: {}]  }
   0x1   :  { %v4407_v0 = vld [vmem:[%s6769_s0] sm:$0xff] }
   0x2   :  { %v4412_v1 = vld [vmem:[%s6770_s1] sm:$0xff] }
   0x3   :  { %14 = vsyncpa [#allocation3], 0  ;;  %v149_v3 = vperm.slane %v4412_v1, 0  ;;  %v4415_v4 = vshrl.u32 %v115_v2, 7  ;;  %v4418_v5 = vperm.slane %v4407_v0, 0  ;;  %v4516_v22 = vperm.slane %v4407_v0, 1 }
   0x4   :  { %v770_v23 = vperm.slane %v4412_v1, 1  ;;  %v4542_v26 = vld [vmem:[%s6771_s2 + $0x30] sm:$0xff]  ;;  %v4551_v27 = vld [vmem:[%s6771_s2 + $0x20] sm:$0xff]  ;;  %v4594_v30 = vld [vmem:[%s6771_s2 + $0x38] sm:$0xff]  ;;  %s3339_s20 = sshll.u32 %s6778_s9, 4  ;;  %s4352_s21 = smov 128   ;;  %s3340_s20 = int_to_ptr.hbm [resolvable:$true] %s3339_s20 }
   0x5   :  { %6986 = vst [vmem:[#allocation5_spill] sm:$0xff] %v4415_v4  ;;  %v4420_v6 = vpack.c.bf16 %v149_v3, %v149_v3  ;;  %v4423_v7 = vadd.s32 112, %v4415_v4  ;;  %v4426_v8 = vadd.s32 120, %v4415_v4  ;;  %v4429_v9 = vadd.s32 96, %v4415_v4  ;;  %v4562_v28 = vld [vmem:[%s6771_s2 + $0x10] sm:$0xff]  ;;  %v4570_v29 = vld [vmem:[%s6771_s2] sm:$0xff] }
   0x6   :  { %v4432_v10 = vadd.s32 104, %v4415_v4  ;;  %v4435_v11 = vadd.s32 80, %v4415_v4  ;;  %v4438_v12 = vadd.s32 88, %v4415_v4  ;;  %v4457_v13 = vadd.s32 64, %v4415_v4  ;;  %6995 = vst [vmem:[#allocation12_spill] sm:$0xff] %v4542_v26  ;;  %v4603_v31 = vld [vmem:[%s6771_s2 + $0x28] sm:$0xff] }
   0x7   :  { %vm147_vm0 = vcmp.eq.s32.totalorder %v4423_v7, %v4418_v5  ;;  %vm148_vm1 = vcmp.eq.s32.totalorder %v4426_v8, %v4418_v5  ;;  %vm145_vm2 = vcmp.eq.s32.totalorder %v4429_v9, %v4418_v5  ;;  %v4460_v14 = vadd.s32 72, %v4415_v4  ;;  %6996 = vst [vmem:[#allocation13_spill] sm:$0xff] %v4594_v30  ;;  %v4608_v32 = vld [vmem:[%s6771_s2 + $0x18] sm:$0xff]  ;;  %v4613_v33 = vld [vmem:[%s6771_s2 + $0x8] sm:$0xff]  ;;  %v4692_v61 = vld [vmem:[%s6772_s3] sm:$0xff]  ;;  %s4353_s22 = smov 8  }
   0x8   :  { %vm146_vm3 = vcmp.eq.s32.totalorder %v4432_v10, %v4418_v5  ;;  %vm3383_vm4 = vmpackc.low %vm148_vm1, %vm147_vm0  ;;  %vm143_vm6 = vcmp.eq.s32.totalorder %v4435_v11, %v4418_v5  ;;  %vm144_vm7 = vcmp.eq.s32.totalorder %v4438_v12, %v4418_v5  ;;  %vm141_vm9 = vcmp.eq.s32.totalorder %v4457_v13, %v4418_v5  ;;  %6997 = vst [vmem:[#allocation14_spill] sm:$0xff] %v4603_v31  ;;  %v4702_v2 = vld [vmem:[%s6772_s3 + $0x8] sm:$0xff]  ;;  %v4722_v24 = vld [vmem:[%s6772_s3 + $0x18] sm:$0xff] }
   0x9   :  { %3705 = vmatpush.bf16.msk.msra.mxu3 %vm3383_vm4, %v4420_v6  ;;  %3704 = vmatpush.bf16.msk.msra.mxu2 %vm3383_vm4, %v4420_v6  ;;  %vm3386_vm5 = vmpackc.low %vm146_vm3, %vm145_vm2  ;;  %vm142_vm10 = vcmp.eq.s32.totalorder %v4460_v14, %v4418_v5  ;;  %v4471_v15 = vadd.s32 48, %v4415_v4  ;;  %v4474_v16 = vadd.s32 56, %v4415_v4  ;;  %v4485_v17 = vadd.s32 32, %v4415_v4 }
   0xa   :  { %3703 = vmatpush.bf16.msk.msra.mxu1 %vm3383_vm4, %v4420_v6  ;;  %3385 = vmatpush.bf16.msk.msra.mxu0 %vm3383_vm4, %v4420_v6  ;;  %vm3389_vm8 = vmpackc.low %vm144_vm7, %vm143_vm6  ;;  %v4488_v18 = vadd.s32 40, %v4415_v4  ;;  %v4499_v19 = vadd.s32 16, %v4415_v4  ;;  %v4502_v20 = vadd.s32 24, %v4415_v4  ;;  %v4513_v21 = vadd.s32 8, %v4415_v4 }
   0xb   :  { %6987 = vst [vmem:[#allocation6_spill] sm:$0xff] %v4474_v16  ;;  %vm3392_vm11 = vmpackc.low %vm142_vm10, %vm141_vm9  ;;  %vm139_vm12 = vcmp.eq.s32.totalorder %v4471_v15, %v4418_v5  ;;  %vm140_vm13 = vcmp.eq.s32.totalorder %v4474_v16, %v4418_v5  ;;  %vm137_vm15 = vcmp.eq.s32.totalorder %v4485_v17, %v4418_v5  ;;  %vm768_vm7 = vcmp.eq.s32.totalorder %v4423_v7, %v4516_v22 }
   0xc   :  { %6988 = vst [vmem:[#allocation7_spill] sm:$0xff] %v4485_v17  ;;  %vm3395_vm14 = vmpackc.low %vm140_vm13, %vm139_vm12  ;;  %vm138_vm0 = vcmp.eq.s32.totalorder %v4488_v18, %v4418_v5  ;;  %vm135_vm2 = vcmp.eq.s32.totalorder %v4499_v19, %v4418_v5  ;;  %vm136_vm3 = vcmp.eq.s32.totalorder %v4502_v20, %v4418_v5  ;;  %vm134_vm6 = vcmp.eq.s32.totalorder %v4513_v21, %v4418_v5 }
   0xd   :  { %3708 = vmatpush.bf16.msk.msra.mxu3 %vm3386_vm5, %v4420_v6  ;;  %3707 = vmatpush.bf16.msk.msra.mxu2 %vm3386_vm5, %v4420_v6  ;;  %6989 = vst [vmem:[#allocation8_spill] sm:$0xff] %v4488_v18  ;;  %vm3398_vm1 = vmpackc.low %vm138_vm0, %vm137_vm15  ;;  %v3472_v25 = vpack.c.bf16 %v770_v23, %v770_v23  ;;  %vm767_vm12 = vcmp.eq.s32.totalorder %v4432_v10, %v4516_v22 }
   0xe   :  { %3706 = vmatpush.bf16.msk.msra.mxu1 %vm3386_vm5, %v4420_v6  ;;  %3388 = vmatpush.bf16.msk.msra.mxu0 %vm3386_vm5, %v4420_v6  ;;  %6990 = vst [vmem:[#allocation9_spill] sm:$0xff] %v4499_v19  ;;  %vm3401_vm4 = vmpackc.low %vm136_vm3, %vm135_vm2  ;;  %vm133_vm5 = vcmp.eq.s32.totalorder %v4415_v4, %v4418_v5  ;;  %vm765_vm15 = vcmp.eq.s32.totalorder %v4438_v12, %v4516_v22 }
   0xf   :  { %6991 = vst [vmem:[#allocation10_spill] sm:$0xff] %v4502_v20  ;;  %vm4533_vm9 = vmpackc.low %vm134_vm6, %vm133_vm5  ;;  %vm763_vm2 = vcmp.eq.s32.totalorder %v4460_v14, %v4516_v22  ;;  %vm761_vm5 = vcmp.eq.s32.totalorder %v4474_v16, %v4516_v22 }
  0x10   :  { %6992 = vst [vmem:[#allocation11_spill] sm:$0xff] %v4513_v21 }
  0x11   :  { %3711 = vmatpush.bf16.msk.msra.mxu3 %vm3389_vm8, %v4420_v6  ;;  %3710 = vmatpush.bf16.msk.msra.mxu2 %vm3389_vm8, %v4420_v6 }
  0x12   :  { %3709 = vmatpush.bf16.msk.msra.mxu1 %vm3389_vm8, %v4420_v6  ;;  %3391 = vmatpush.bf16.msk.msra.mxu0 %vm3389_vm8, %v4420_v6  ;;  %vm769_vm8 = vcmp.eq.s32.totalorder %v4426_v8, %v4516_v22 }
  0x13   :  { %vm3471_vm10 = vmpackc.low %vm769_vm8, %vm768_vm7  ;;  %vm758_vm7 = vcmp.eq.s32.totalorder %v4485_v17, %v4516_v22  ;;  %vm759_vm8 = vcmp.eq.s32.totalorder %v4488_v18, %v4516_v22 }
  0x15   :  { %3714 = vmatpush.bf16.msk.msra.mxu3 %vm3392_vm11, %v4420_v6  ;;  %3713 = vmatpush.bf16.msk.msra.mxu2 %vm3392_vm11, %v4420_v6 }
  0x16   :  { %3712 = vmatpush.bf16.msk.msra.mxu1 %vm3392_vm11, %v4420_v6  ;;  %3394 = vmatpush.bf16.msk.msra.mxu0 %vm3392_vm11, %v4420_v6  ;;  %vm766_vm11 = vcmp.eq.s32.totalorder %v4429_v9, %v4516_v22 }
  0x17   :  { %vm3474_vm13 = vmpackc.low %vm767_vm12, %vm766_vm11  ;;  %vm757_vm11 = vcmp.eq.s32.totalorder %v4502_v20, %v4516_v22 }
  0x19   :  { %3717 = vmatpush.bf16.msk.msra.mxu3 %vm3395_vm14, %v4420_v6  ;;  %3716 = vmatpush.bf16.msk.msra.mxu2 %vm3395_vm14, %v4420_v6 }
  0x1a   :  { %3715 = vmatpush.bf16.msk.msra.mxu1 %vm3395_vm14, %v4420_v6  ;;  %3397 = vmatpush.bf16.msk.msra.mxu0 %vm3395_vm14, %v4420_v6  ;;  %vm764_vm14 = vcmp.eq.s32.totalorder %v4435_v11, %v4516_v22 }
  0x1b   :  { %vm3477_vm0 = vmpackc.low %vm765_vm15, %vm764_vm14  ;;  %vm755_vm14 = vcmp.eq.s32.totalorder %v4513_v21, %v4516_v22 }
  0x1d   :  { %3720 = vmatpush.bf16.msk.msra.mxu3 %vm3398_vm1, %v4420_v6  ;;  %3719 = vmatpush.bf16.msk.msra.mxu2 %vm3398_vm1, %v4420_v6 }
  0x1e   :  { %3718 = vmatpush.bf16.msk.msra.mxu1 %vm3398_vm1, %v4420_v6  ;;  %3400 = vmatpush.bf16.msk.msra.mxu0 %vm3398_vm1, %v4420_v6  ;;  %vm762_vm1 = vcmp.eq.s32.totalorder %v4457_v13, %v4516_v22 }
  0x1f   :  { %vm3480_vm3 = vmpackc.low %vm763_vm2, %vm762_vm1 }
  0x21   :  { %3723 = vmatpush.bf16.msk.msra.mxu3 %vm3401_vm4, %v4420_v6  ;;  %3722 = vmatpush.bf16.msk.msra.mxu2 %vm3401_vm4, %v4420_v6 }
  0x22   :  { %3721 = vmatpush.bf16.msk.msra.mxu1 %vm3401_vm4, %v4420_v6  ;;  %3403 = vmatpush.bf16.msk.msra.mxu0 %vm3401_vm4, %v4420_v6  ;;  %vm760_vm4 = vcmp.eq.s32.totalorder %v4471_v15, %v4516_v22 }
  0x23   :  { %vm3483_vm6 = vmpackc.low %vm761_vm5, %vm760_vm4 }
  0x25   :  { %3726 = vmatpush.bf16.msk.msra.mxu3 %vm4533_vm9, %v4420_v6  ;;  %3725 = vmatpush.bf16.msk.msra.mxu2 %vm4533_vm9, %v4420_v6 }
  0x26   :  { %3724 = vmatpush.bf16.msk.msra.mxu1 %vm4533_vm9, %v4420_v6  ;;  %3406 = vmatpush.bf16.msk.msra.mxu0 %vm4533_vm9, %v4420_v6  ;;  %vm3486_vm9 = vmpackc.low %vm759_vm8, %vm758_vm7  ;;  %v4712_v6 = vld [vmem:[%s6772_s3 + $0x10] sm:$0xff] }
  0x28   :  { %260 = vmatmul.bf16.vlgmr.msra.gmra.mxu3 %v4542_v26  ;;  %250 = vmatmul.bf16.vlgmr.msra.gmra.mxu2 %v4551_v27 }
  0x29   :  { %3473 = vmatpush.bf16.msk.msrb.mxu3 %vm3471_vm10, %v3472_v25  ;;  %240 = vmatmul.bf16.vlgmr.msra.gmra.mxu1 %v4562_v28  ;;  %vm756_vm10 = vcmp.eq.s32.totalorder %v4499_v19, %v4516_v22 }
  0x2a   :  { %230 = vmatmul.bf16.vlgmr.msra.gmra.mxu0 %v4570_v29  ;;  %vm3489_vm12 = vmpackc.low %vm757_vm11, %vm756_vm10 }
  0x2d   :  { %3476 = vmatpush.bf16.msk.msrb.mxu3 %vm3474_vm13, %v3472_v25  ;;  %vm754_vm13 = vcmp.eq.s32.totalorder %v4415_v4, %v4516_v22 }
  0x2e   :  { %vm3492_vm15 = vmpackc.low %vm755_vm14, %vm754_vm13 }
  0x31   :  { %3479 = vmatpush.bf16.msk.msrb.mxu3 %vm3477_vm0, %v3472_v25 }
  0x35   :  { %3482 = vmatpush.bf16.msk.msrb.mxu3 %vm3480_vm3, %v3472_v25 }
  0x38   :  { %265 = vmatmul.bf16.gmra.mxu3 %v4594_v30  ;;  %255 = vmatmul.bf16.gmra.mxu2 %v4603_v31 }
  0x39   :  { %3485 = vmatpush.bf16.msk.msrb.mxu3 %vm3483_vm6, %v3472_v25  ;;  %245 = vmatmul.bf16.gmra.mxu1 %v4608_v32 }
  0x3a   :  { %235 = vmatmul.bf16.gmra.mxu0 %v4613_v33 }
  0x3d   :  { %3488 = vmatpush.bf16.msk.msrb.mxu3 %vm3486_vm9, %v3472_v25 }
  0x41   :  { %3491 = vmatpush.bf16.msk.msrb.mxu3 %vm3489_vm12, %v3472_v25 }
  0x45   :  { %3494 = vmatpush.bf16.msk.msrb.mxu3 %vm3492_vm15, %v3472_v25 }
  0x48   :  { %803 = vmatmul.bf16.vlgmr.msrb.gmra.mxu3 %v4570_v29 }
  0x58   :  { %808 = vmatmul.bf16.gmra.mxu3 %v4613_v33 }
  0x68   :  { %813 = vmatmul.bf16.gmra.mxu3 %v4562_v28 }
  0x78   :  { %818 = vmatmul.bf16.gmra.mxu3 %v4608_v32 }
  0x88   :  { %823 = vmatmul.bf16.gmra.mxu3 %v4551_v27 }
  0x98   :  { %828 = vmatmul.bf16.gmra.mxu3 %v4603_v31 }
  0xa6   :  { %v4638_v36 = vpop.f32.mrf.mxu1 }
  0xa7   :  { %7000 = vst [vmem:[#allocation17_spill] sm:$0xff] %v4638_v36  ;;  %v4645_v39 = vpop.f32.mrf.mxu0 }
  0xa8   :  { %833 = vmatmul.bf16.gmra.mxu3 %v4542_v26  ;;  %7003 = vst [vmem:[#allocation20_spill] sm:$0xff] %v4645_v39 }
  0xab   :  { %v4634_v34 = vpop.f32.mrf.mxu3  ;;  %v4636_v35 = vpop.f32.mrf.mxu2 }
  0xac   :  { %6998 = vst [vmem:[#allocation15_spill] sm:$0xff] %v4634_v34 }
  0xad   :  { %6999 = vst [vmem:[#allocation16_spill] sm:$0xff] %v4636_v35 }
  0xae   :  { %v4649_v41 = vpop.f32.mrf.mxu1 }
  0xaf   :  { %7005 = vst [vmem:[#allocation22_spill] sm:$0xff] %v4649_v41  ;;  %v4655_v44 = vpop.f32.mrf.mxu0  ;;  %v273_v56 = vpack.c.bf16 %v4649_v41, %v4638_v36 }
  0xb0   :  { %7008 = vst [vmem:[#allocation25_spill] sm:$0xff] %v4655_v44  ;;  %v271_v60 = vpack.c.bf16 %v4655_v44, %v4645_v39 }
  0xb3   :  { %v4640_v37 = vpop.f32.mrf.mxu3  ;;  %v4642_v38 = vpop.f32.mrf.mxu2 }
  0xb4   :  { %7001 = vst [vmem:[#allocation18_spill] sm:$0xff] %v4640_v37  ;;  %v277_v48 = vpack.c.bf16 %v4640_v37, %v4634_v34  ;;  %v275_v52 = vpack.c.bf16 %v4642_v38, %v4636_v35  ;;  %v74_v37 = vld [vmem:[%s6773_s4 + $0x38] sm:$0xff] }
  0xb5   :  { %7002 = vst [vmem:[#allocation19_spill] sm:$0xff] %v4642_v38 }
  0xb6   :  { %v4659_v46 = vpop.f32.mrf.mxu1 }
  0xb7   :  { %7009 = vst [vmem:[#allocation26_spill] sm:$0xff] %v4659_v46  ;;  %v4669_v51 = vpop.f32.mrf.mxu0 }
  0xb8   :  { %838 = vmatmul.bf16.gmra.mxu3 %v4594_v30  ;;  %7012 = vst [vmem:[#allocation29_spill] sm:$0xff] %v4669_v51 }
  0xbb   :  { %v4647_v40 = vpop.f32.mrf.mxu3  ;;  %v4651_v42 = vpop.f32.mrf.mxu2 }
  0xbc   :  { %7004 = vst [vmem:[#allocation21_spill] sm:$0xff] %v4647_v40 }
  0xbd   :  { %7006 = vst [vmem:[#allocation23_spill] sm:$0xff] %v4651_v42 }
  0xbe   :  { %v4673_v53 = vpop.f32.mrf.mxu1 }
  0xbf   :  { %7013 = vst [vmem:[#allocation30_spill] sm:$0xff] %v4673_v53  ;;  %v274_v54 = vpack.c.bf16 %v4673_v53, %v4659_v46  ;;  %v4681_v57 = vpop.f32.mrf.mxu0 }
  0xc0   :  { %7015 = vst [vmem:[#allocation32_spill] sm:$0xff] %v4681_v57  ;;  %v272_v58 = vpack.c.bf16 %v4681_v57, %v4669_v51  ;;  %v3123_v57 = vld [vmem:[%s6777_s8 + $0x78] sm:$0xff] }
  0xc3   :  { %v4653_v43 = vpop.f32.mrf.mxu3  ;;  %v4661_v47 = vpop.f32.mrf.mxu2 }
  0xc4   :  { %7007 = vst [vmem:[#allocation24_spill] sm:$0xff] %v4653_v43  ;;  %v278_v45 = vpack.c.bf16 %v4653_v43, %v4647_v40  ;;  %v276_v49 = vpack.c.bf16 %v4661_v47, %v4651_v42  ;;  %v80_v40 = vld [vmem:[%s6773_s4 + $0x68] sm:$0xff] }
  0xc5   :  { %7010 = vst [vmem:[#allocation27_spill] sm:$0xff] %v4661_v47  ;;  %v4767_v47 = vld [vmem:[%s6772_s3 + $0x30] sm:$0xff]  ;;  %v76_v42 = vld [vmem:[%s6773_s4 + $0x48] sm:$0xff] }
  0xc6   :  { %407 = vmatpush.bf16.msrb.mxu1 %v278_v45 }
  0xca   :  { %408 = vmatpush.bf16.msrb.mxu1 %v277_v48  ;;  %v4732_v48 = vld [vmem:[%s6772_s3 + $0x20] sm:$0xff] }
  0xcb   :  { %v4667_v50 = vpop.f32.mrf.mxu3 }
  0xcc   :  { %7011 = vst [vmem:[#allocation28_spill] sm:$0xff] %v4667_v50 }
  0xce   :  { %409 = vmatpush.bf16.msrb.mxu1 %v276_v49 }
  0xd2   :  { %410 = vmatpush.bf16.msrb.mxu1 %v275_v52  ;;  %v81_v52 = vld [vmem:[%s6773_s4 + $0x70] sm:$0xff] }
  0xd3   :  { %v4677_v55 = vpop.f32.mrf.mxu3 }
  0xd4   :  { %7014 = vst [vmem:[#allocation31_spill] sm:$0xff] %v4677_v55 }
  0xd6   :  { %411 = vmatpush.bf16.msrb.mxu1 %v274_v54  ;;  %v4350_v54 = vmov 0  }
  0xd7   :  { %3731 = vset.pattern.permute.xlu0 %v4350_v54  ;;  %3732 = vset.pattern.permute.xlu1 %v4350_v54 }
  0xd8   :  { %351 = vperm.xlu0 %3731, %v81_v52   ;;  %3733 = vset.pattern.permute.xlu2 %v4350_v54  ;;  %v75_v52 = vld [vmem:[%s6773_s4 + $0x40] sm:$0xff] }
  0xda   :  { %412 = vmatpush.bf16.msrb.mxu1 %v273_v56 }
  0xdb   :  { %v4685_v59 = vpop.f32.mrf.mxu3 }
  0xdc   :  { %7016 = vst [vmem:[#allocation33_spill] sm:$0xff] %v4685_v59 }
  0xde   :  { %413 = vmatpush.bf16.msrb.mxu1 %v272_v58  ;;  %v82_v58 = vld [vmem:[%s6773_s4 + $0x78] sm:$0xff] }
  0xe0   :  { %356 = vperm.xlu0 %3731, %v82_v58   ;;  %v79_v58 = vld [vmem:[%s6773_s4 + $0x60] sm:$0xff] }
  0xe1   :  { %341 = vperm.xlu1 %3732, %v79_v58   ;;  %v69_v58 = vld [vmem:[%s6773_s4 + $0x10] sm:$0xff] }
  0xe2   :  { %414 = vmatpush.bf16.msrb.mxu1 %v271_v60  ;;  %v4748_v60 = vld [vmem:[%s6772_s3 + $0x28] sm:$0xff] }
  0xe3   :  { %v4694_v62 = vpop.f32.mrf.mxu3 }
  0xe4   :  { %7017 = vst [vmem:[#allocation34_spill] sm:$0xff] %v4694_v62 }
  0xe5   :  { %415 = vmatmul.bf16.vlgmr.msrb.gmra.mxu1 %v4692_v61 }
  0xe8   :  { %321 = vperm.xlu0 %3731, %v75_v52  }
  0xe9   :  { %346 = vperm.xlu1 %3732, %v80_v40   ;;  %v68_v40 = vld [vmem:[%s6773_s4 + $0x8] sm:$0xff] }
  0xeb   :  { %v4697_v63 = vpop.f32.mrf.mxu3 }
  0xec   :  { %7018 = vst [vmem:[#allocation35_spill] sm:$0xff] %v4697_v63 }
  0xf0   :  { %316 = vperm.xlu0 %3731, %v74_v37   ;;  %v77_v37 = vld [vmem:[%s6773_s4 + $0x50] sm:$0xff] }
  0xf1   :  { %331 = vperm.xlu2 %3733, %v77_v37   ;;  %326 = vperm.xlu1 %3732, %v76_v42   ;;  %v71_v42 = vld [vmem:[%s6773_s4 + $0x20] sm:$0xff] }
  0xf3   :  { %v4704_v3 = vpop.f32.mrf.mxu3 }
  0xf4   :  { %7019 = vst [vmem:[#allocation36_spill] sm:$0xff] %v4704_v3 }
  0xf5   :  { %420 = vmatmul.bf16.gmra.mxu1 %v4702_v2 }
  0xf8   :  { %291 = vperm.xlu0 %3731, %v69_v58   ;;  %v72_v58 = vld [vmem:[%s6773_s4 + $0x28] sm:$0xff] }
  0xf9   :  { %301 = vperm.xlu1 %3732, %v71_v42   ;;  %v67_v42 = vld [vmem:[%s6773_s4] sm:$0xff] }
  0xfb   :  { %v4707_v5 = vpop.f32.mrf.mxu3 }
  0xfc   :  { %7020 = vst [vmem:[#allocation37_spill] sm:$0xff] %v4707_v5 }
 0x100   :  { %286 = vperm.xlu0 %3731, %v68_v40   ;;  %v845_v40 = vpack.c.bf16 %v4694_v62, %v4685_v59 }
 0x103   :  { %v4714_v22 = vpop.f32.mrf.mxu3 }
 0x104   :  { %7021 = vst [vmem:[#allocation38_spill] sm:$0xff] %v4714_v22  ;;  %v847_v37 = vpack.c.bf16 %v4714_v22, %v4707_v5  ;;  %v3117_v22 = vld [vmem:[%s6777_s8 + $0x48] sm:$0xff] }
 0x105   :  { %425 = vmatmul.bf16.gmra.mxu1 %v4712_v6 }
 0x10b   :  { %v4717_v23 = vpop.f32.mrf.mxu3 }
 0x10c   :  { %7022 = vst [vmem:[#allocation39_spill] sm:$0xff] %v4717_v23 }
 0x113   :  { %v4724_v25 = vpop.f32.mrf.mxu3 }
 0x114   :  { %7023 = vst [vmem:[#allocation40_spill] sm:$0xff] %v4724_v25 }
 0x115   :  { %430 = vmatmul.bf16.gmra.mxu1 %v4722_v24 }
 0x11b   :  { %v4727_v45 = vpop.f32.mrf.mxu3 }
 0x11c   :  { %7024 = vst [vmem:[#allocation41_spill] sm:$0xff] %v4727_v45 }
 0x123   :  { %v4734_v49 = vpop.f32.mrf.mxu3 }
 0x124   :  { %7025 = vst [vmem:[#allocation42_spill] sm:$0xff] %v4734_v49  ;;  %v849_v34 = vpack.c.bf16 %v4734_v49, %v4727_v45  ;;  %v109_v49 = vld [vmem:[%s6775_s6 + $0x50] sm:$0xff]  ;;  %v3111_v45 = vld [vmem:[%s6777_s8 + $0x18] sm:$0xff] }
 0x125   :  { %435 = vmatmul.bf16.gmra.mxu1 %v4732_v48 }
 0x12b   :  { %v4740_v56 = vpop.f32.mrf.mxu3 }
 0x12c   :  { %7026 = vst [vmem:[#allocation43_spill] sm:$0xff] %v4740_v56 }
 0x133   :  { %v4750_v43 = vpop.f32.mrf.mxu3 }
 0x134   :  { %7027 = vst [vmem:[#allocation44_spill] sm:$0xff] %v4750_v43 }
 0x135   :  { %440 = vmatmul.bf16.gmra.mxu1 %v4748_v60 }
 0x13b   :  { %v4756_v54 = vpop.f32.mrf.mxu3 }
 0x13c   :  { %7028 = vst [vmem:[#allocation45_spill] sm:$0xff] %v4756_v54 }
 0x143   :  { %v4769_v38 = vpop.f32.mrf.mxu3 }
 0x144   :  { %7029 = vst [vmem:[#allocation46_spill] sm:$0xff] %v4769_v38  ;;  %v851_v52 = vpack.c.bf16 %v4769_v38, %v4756_v54  ;;  %v850_v38 = vpack.c.bf16 %v4750_v43, %v4740_v56  ;;  %v78_v54 = vld [vmem:[%s6773_s4 + $0x58] sm:$0xff] }
 0x145   :  { %445 = vmatmul.bf16.gmra.mxu1 %v4767_v47  ;;  %336 = vperm.xlu2 %3733, %v78_v54   ;;  %v846_v54 = vpack.c.bf16 %v4704_v3, %v4697_v63  ;;  %v114_v43 = vld [vmem:[%s6775_s6 + $0x78] sm:$0xff] }
 0x146   :  { %852 = vmatpush.bf16.msrb.mxu0 %v851_v52  ;;  %v4801_v52 = vld [vmem:[%s6772_s3 + $0x38] sm:$0xff] }
 0x147   :  { %v102_v56 = vld [vmem:[%s6775_s6 + $0x18] sm:$0xff] }
 0x14a   :  { %853 = vmatpush.bf16.msrb.mxu0 %v850_v38  ;;  %v848_v38 = vpack.c.bf16 %v4724_v25, %v4717_v23  ;;  %v108_v25 = vld [vmem:[%s6775_s6 + $0x48] sm:$0xff]  ;;  %v3114_v23 = vld [vmem:[%s6777_s8 + $0x30] sm:$0xff] }
 0x14b   :  { %v4945_v35 = vpop.permute.xlu2 %331 }
 0x14e   :  { %854 = vmatpush.bf16.msrb.mxu0 %v849_v34  ;;  %v73_v34 = vld [vmem:[%s6773_s4 + $0x30] sm:$0xff] }
 0x14f   :  { %311 = vperm.xlu2 %3733, %v73_v34  }
 0x152   :  { %855 = vmatpush.bf16.msrb.mxu0 %v848_v38  ;;  %v70_v38 = vld [vmem:[%s6773_s4 + $0x18] sm:$0xff] }
 0x153   :  { %296 = vperm.xlu1 %3732, %v70_v38   ;;  %v111_v38 = vld [vmem:[%s6775_s6 + $0x60] sm:$0xff] }
 0x154   :  { %542 = vperm.xlu0 %3731, %v111_v38  }
 0x155   :  { %450 = vmatmul.bf16.gmra.mxu1 %v4801_v52 }
 0x156   :  { %856 = vmatpush.bf16.msrb.mxu0 %v847_v37  ;;  %v844_v37 = vpack.c.bf16 %v4677_v55, %v4667_v50 }
 0x157   :  { %306 = vperm.xlu2 %3733, %v72_v58   ;;  %v113_v58 = vld [vmem:[%s6775_s6 + $0x70] sm:$0xff] }
 0x15a   :  { %857 = vmatpush.bf16.msrb.mxu0 %v846_v54 }
 0x15b   :  { %552 = vperm.xlu1 %3732, %v113_v58   ;;  %v107_v58 = vld [vmem:[%s6775_s6 + $0x40] sm:$0xff] }
 0x15e   :  { %858 = vmatpush.bf16.msrb.mxu0 %v845_v40 }
 0x15f   :  { %281 = vperm.xlu2 %3733, %v67_v42   ;;  %v110_v42 = vld [vmem:[%s6775_s6 + $0x58] sm:$0xff] }
 0x160   :  { %537 = vperm.xlu0 %3731, %v110_v42  }
 0x162   :  { %v4824_v34 = vpop.f32.mrf.mxu1  ;;  %859 = vmatpush.bf16.msrb.mxu0 %v844_v37 }
 0x165   :  { %860 = vmatmul.bf16.vlgmr.msrb.gmra.mxu0 %v4692_v61  ;;  %v112_v61 = vld [vmem:[%s6775_s6 + $0x68] sm:$0xff] }
 0x166   :  { %547 = vperm.xlu1 %3732, %v112_v61   ;;  %v106_v61 = vld [vmem:[%s6775_s6 + $0x38] sm:$0xff] }
 0x167   :  { %557 = vperm.xlu2 %3733, %v114_v43   ;;  %v100_v43 = vld [vmem:[%s6775_s6 + $0x8] sm:$0xff] }
 0x16a   :  { %v4830_v54 = vpop.f32.mrf.mxu1 }
 0x16e   :  { %522 = vperm.xlu1 %3732, %v107_v58   ;;  %v104_v58 = vld [vmem:[%s6775_s6 + $0x28] sm:$0xff] }
 0x16f   :  { %532 = vperm.xlu2 %3733, %v109_v49  }
 0x172   :  { %v4835_v40 = vpop.f32.mrf.mxu1 }
 0x175   :  { %865 = vmatmul.bf16.gmra.mxu0 %v4702_v2  ;;  %v105_v2 = vld [vmem:[%s6775_s6 + $0x30] sm:$0xff] }
 0x176   :  { %512 = vperm.xlu0 %3731, %v105_v2   ;;  %517 = vperm.xlu1 %3732, %v106_v61   ;;  %v99_v61 = vld [vmem:[%s6775_s6] sm:$0xff] }
 0x177   :  { %527 = vperm.xlu2 %3733, %v108_v25   ;;  %v3113_v25 = vld [vmem:[%s6777_s8 + $0x28] sm:$0xff] }
 0x17a   :  { %v4844_v37 = vpop.f32.mrf.mxu1 }
 0x17e   :  { %507 = vperm.xlu0 %3731, %v104_v58  }
 0x182   :  { %v4852_v38 = vpop.f32.mrf.mxu1 }
 0x185   :  { %870 = vmatmul.bf16.gmra.mxu0 %v4712_v6  ;;  %v101_v6 = vld [vmem:[%s6775_s6 + $0x10] sm:$0xff] }
 0x186   :  { %492 = vperm.xlu1 %3732, %v101_v6   ;;  %482 = vperm.xlu0 %3731, %v99_v61   ;;  %v3109_v6 = vld [vmem:[%s6777_s8 + $0x8] sm:$0xff]  ;;  %v3112_v61 = vld [vmem:[%s6777_s8 + $0x20] sm:$0xff] }
 0x18a   :  { %v4861_v42 = vpop.f32.mrf.mxu1 }
 0x18e   :  { %487 = vperm.xlu1 %3732, %v100_v43   ;;  %3131 = vperm.xlu0 %3731, %v3109_v6   ;;  %v103_v43 = vld [vmem:[%s6775_s6 + $0x20] sm:$0xff] }
 0x18f   :  { %502 = vperm.xlu2 %3733, %v103_v43   ;;  %v3118_v43 = vld [vmem:[%s6777_s8 + $0x50] sm:$0xff] }
 0x192   :  { %v4872_v2 = vpop.f32.mrf.mxu1 }
 0x195   :  { %875 = vmatmul.bf16.gmra.mxu0 %v4722_v24  ;;  %v3110_v24 = vld [vmem:[%s6777_s8 + $0x10] sm:$0xff] }
 0x196   :  { %3136 = vperm.xlu1 %3732, %v3110_v24   ;;  %3146 = vperm.xlu0 %3731, %v3112_v61   ;;  %v3115_v24 = vld [vmem:[%s6777_s8 + $0x38] sm:$0xff] }
 0x197   :  { %497 = vperm.xlu2 %3733, %v102_v56   ;;  %v3119_v56 = vld [vmem:[%s6777_s8 + $0x58] sm:$0xff] }
 0x19a   :  { %v4884_v58 = vpop.f32.mrf.mxu1 }
 0x19e   :  { %3151 = vperm.xlu1 %3732, %v3113_v25   ;;  %3161 = vperm.xlu0 %3731, %v3115_v24   ;;  %v3108_v25 = vld [vmem:[%s6777_s8] sm:$0xff] }
 0x19f   :  { %3126 = vperm.xlu2 %3733, %v3108_v25   ;;  %v4954_v53 = vpop.permute.xlu2 %336 }
 0x1a0   :  { %7033 = vst [vmem:[#allocation50_spill] sm:$0xff] %v4954_v53 }
 0x1a2   :  { %v4895_v49 = vpop.f32.mrf.mxu1 }
 0x1a5   :  { %880 = vmatmul.bf16.gmra.mxu0 %v4732_v48  ;;  %v3116_v48 = vld [vmem:[%s6777_s8 + $0x40] sm:$0xff] }
 0x1a6   :  { %3166 = vperm.xlu1 %3732, %v3116_v48   ;;  %3176 = vperm.xlu0 %3731, %v3118_v43   ;;  %v3121_v48 = vld [vmem:[%s6777_s8 + $0x68] sm:$0xff]  ;;  %v4937_v43 = vpop.permute.xlu0 %351 }
 0x1a7   :  { %3141 = vperm.xlu2 %3733, %v3111_v45   ;;  %7030 = vst [vmem:[#allocation47_spill] sm:$0xff] %v4937_v43 }
 0x1aa   :  { %v4907_v6 = vpop.f32.mrf.mxu1 }
 0x1ae   :  { %3181 = vperm.xlu1 %3732, %v3119_v56   ;;  %3191 = vperm.xlu0 %3731, %v3121_v48   ;;  %v4939_v56 = vpop.permute.xlu1 %341  ;;  %v4947_v45 = vpop.permute.xlu0 %356 }
 0x1af   :  { %3156 = vperm.xlu2 %3733, %v3114_v23   ;;  %7031 = vst [vmem:[#allocation48_spill] sm:$0xff] %v4947_v45 }
 0x1b2   :  { %v441_v61 = vpop.f32.mrf.mxu1 }
 0x1b5   :  { %885 = vmatmul.bf16.gmra.mxu0 %v4748_v60  ;;  %v3122_v60 = vld [vmem:[%s6777_s8 + $0x70] sm:$0xff] }
 0x1b6   :  { %3196 = vperm.xlu1 %3732, %v3122_v60   ;;  %v4952_v60 = vpop.permute.xlu1 %346  ;;  %v4956_v5 = vpop.permute.xlu0 %321 }
 0x1b7   :  { %7032 = vst [vmem:[#allocation49_spill] sm:$0xff] %v4952_v60  ;;  %3171 = vperm.xlu2 %3733, %v3117_v22   ;;  %v437_v39 = vadd.f32 %v4895_v49, %v4956_v5 }
 0x1ba   :  { %v443_v24 = vpop.f32.mrf.mxu1 }
 0x1be   :  { %v4962_v23 = vpop.permute.xlu1 %326  ;;  %v4971_v59 = vpop.permute.xlu0 %316 }
 0x1bf   :  { %v439_v30 = vadd.f32 %v4907_v6, %v4962_v23 }
 0x1c2   :  { %v446_v25 = vpop.f32.mrf.mxu1 }
 0x1c3   :  { %v447_v41 = vadd.f32 %v446_v25, %v4939_v56 }
 0x1c5   :  { %890 = vmatmul.bf16.gmra.mxu0 %v4767_v47  ;;  %v3120_v47 = vld [vmem:[%s6777_s8 + $0x60] sm:$0xff]  ;;  %v468_v51 = vmax.f32 %v447_v41, 0.0 }
 0x1c6   :  { %3186 = vperm.xlu2 %3733, %v3120_v47   ;;  %v4973_v47 = vpop.permute.xlu2 %311  ;;  %v4977_v44 = vpop.permute.xlu1 %301 }
 0x1c7   :  { %v432_v41 = vadd.f32 %v4872_v2, %v4973_v47 }
 0x1c9   :  { %v462_v49 = vmax.f32 %v432_v41, 0.0 }
 0x1ca   :  { %v448_v48 = vpop.f32.mrf.mxu1 }
 0x1cb   :  { %v449_v22 = vadd.f32 %v448_v48, %v4952_v60  ;;  %v444_v48 = vadd.f32 %v443_v24, %v4954_v53  ;;  %v4991_v24 = vpop.permute.xlu0 %291 }
 0x1cd   :  { %v469_v25 = vmax.f32 %v449_v22, 0.0  ;;  %v467_v50 = vmax.f32 %v444_v48, 0.0 }
 0x1ce   :  { %3201 = vperm.xlu2 %3733, %v3123_v57  }
 0x1d2   :  { %v451_v46 = vpop.f32.mrf.mxu1 }
 0x1d3   :  { %v452_v3 = vadd.f32 %v451_v46, %v4937_v43 }
 0x1d5   :  { %895 = vmatmul.bf16.gmra.mxu0 %v4801_v52  ;;  %v470_v36 = vmax.f32 %v452_v3, 0.0  ;;  %v442_v52 = vadd.f32 %v441_v61, %v4945_v35 }
 0x1d7   :  { %v466_v3 = vmax.f32 %v442_v52, 0.0  ;;  %v427_v52 = vadd.f32 %v4852_v38, %v4977_v44 }
 0x1d9   :  { %v477_v57 = vpack.c.bf16 %v467_v50, %v466_v3  ;;  %v5005_v3 = vpop.permute.xlu0 %286 }
 0x1da   :  { %v453_v63 = vpop.f32.mrf.mxu1 }
 0x1db   :  { %v454_v62 = vadd.f32 %v453_v63, %v4947_v45  ;;  %v478_v63 = vpack.c.bf16 %v469_v25, %v468_v51  ;;  %v4989_v51 = vpop.permute.xlu2 %306  ;;  %v422_v25 = vadd.f32 %v4835_v40, %v4991_v24 }
 0x1dc   :  { %v429_v2 = vadd.f32 %v4861_v42, %v4989_v51 }
 0x1dd   :  { %v471_v46 = vmax.f32 %v454_v62, 0.0  ;;  %v464_v62 = vmax.f32 %v437_v39, 0.0 }
 0x1de   :  { %v461_v50 = vmax.f32 %v429_v2, 0.0 }
 0x1df   :  { %v479_v55 = vpack.c.bf16 %v471_v46, %v470_v36  ;;  %v434_v36 = vadd.f32 %v4884_v58, %v4971_v59  ;;  %v4999_v58 = vpop.permute.xlu1 %296 }
 0x1e0   :  { %v424_v48 = vadd.f32 %v4844_v37, %v4999_v58 }
 0x1e1   :  { %608 = vmatpush.bf16.msrb.mxu2 %v479_v55  ;;  %v465_v55 = vmax.f32 %v439_v30, 0.0  ;;  %v463_v22 = vmax.f32 %v434_v36, 0.0  ;;  %v460_v30 = vmax.f32 %v427_v52, 0.0 }
 0x1e2   :  { %v4983_v61 = vpop.f32.mrf.mxu0  ;;  %v459_v41 = vmax.f32 %v424_v48, 0.0  ;;  %v5048_v48 = vld [vmem:[%s6774_s5 + $0x18] sm:$0xff] }
 0x1e3   :  { %v476_v6 = vpack.c.bf16 %v465_v55, %v464_v62  ;;  %v475_v39 = vpack.c.bf16 %v463_v22, %v462_v49  ;;  %v5007_v38 = vpop.permute.xlu2 %281  ;;  %v474_v42 = vpack.c.bf16 %v461_v50, %v460_v30  ;;  %v419_v62 = vadd.f32 %v4830_v54, %v5005_v3  ;;  %v5030_v54 = vld [vmem:[%s6774_s5 + $0x8] sm:$0xff]  ;;  %v5040_v30 = vld [vmem:[%s6774_s5 + $0x10] sm:$0xff] }
 0x1e5   :  { %609 = vmatpush.bf16.msrb.mxu2 %v478_v63  ;;  %v458_v63 = vmax.f32 %v422_v25, 0.0  ;;  %v457_v37 = vmax.f32 %v419_v62, 0.0  ;;  %v1087_v62 = vperm.slane %v4412_v1, 2  ;;  %v5070_v1 = vld [vmem:[%s6774_s5 + $0x28] sm:$0xff] }
 0x1e7   :  { %v473_v40 = vpack.c.bf16 %v459_v41, %v458_v63  ;;  %v5054_v41 = vld [vmem:[%s6774_s5 + $0x20] sm:$0xff] }
 0x1e9   :  { %610 = vmatpush.bf16.msrb.mxu2 %v477_v57  ;;  %v417_v57 = vadd.f32 %v4824_v34, %v5007_v38 }
 0x1ea   :  { %v4997_v46 = vpop.f32.mrf.mxu0 }
 0x1eb   :  { %v456_v55 = vmax.f32 %v417_v57, 0.0  ;;  %v1070_v57 = vperm.slane %v4407_v0, 2 }
 0x1ed   :  { %611 = vmatpush.bf16.msrb.mxu2 %v476_v6  ;;  %v472_v22 = vpack.c.bf16 %v457_v37, %v456_v55  ;;  %v5020_v6 = vld [vmem:[%s6774_s5] sm:$0xff]  ;;  %vm1085_vm0 = vcmp.eq.s32.totalorder %v4423_v7, %v1070_v57  ;;  %vm1086_vm1 = vcmp.eq.s32.totalorder %v4426_v8, %v1070_v57  ;;  %vm1083_vm3 = vcmp.eq.s32.totalorder %v4429_v9, %v1070_v57 }
 0x1ee   :  { %vm3495_vm2 = vmpackc.low %vm1086_vm1, %vm1085_vm0  ;;  %vm1084_vm4 = vcmp.eq.s32.totalorder %v4432_v10, %v1070_v57  ;;  %vm1081_vm6 = vcmp.eq.s32.totalorder %v4435_v11, %v1070_v57  ;;  %vm1082_vm7 = vcmp.eq.s32.totalorder %v4438_v12, %v1070_v57  ;;  %vm1079_vm9 = vcmp.eq.s32.totalorder %v4457_v13, %v1070_v57 }
 0x1ef   :  { %vm3498_vm5 = vmpackc.low %vm1084_vm4, %vm1083_vm3  ;;  %vm1080_vm10 = vcmp.eq.s32.totalorder %v4460_v14, %v1070_v57  ;;  %vm1077_vm12 = vcmp.eq.s32.totalorder %v4471_v15, %v1070_v57  ;;  %vm1078_vm13 = vcmp.eq.s32.totalorder %v4474_v16, %v1070_v57  ;;  %vm1075_vm15 = vcmp.eq.s32.totalorder %v4485_v17, %v1070_v57 }
 0x1f0   :  { %vm3501_vm8 = vmpackc.low %vm1082_vm7, %vm1081_vm6  ;;  %vm1076_vm0 = vcmp.eq.s32.totalorder %v4488_v18, %v1070_v57  ;;  %vm1074_vm3 = vcmp.eq.s32.totalorder %v4502_v20, %v1070_v57  ;;  %vm1072_vm6 = vcmp.eq.s32.totalorder %v4513_v21, %v1070_v57  ;;  %v5087_v18 = vld [vmem:[%s6774_s5 + $0x30] sm:$0xff] }
 0x1f1   :  { %612 = vmatpush.bf16.msrb.mxu2 %v475_v39  ;;  %vm3504_vm11 = vmpackc.low %vm1080_vm10, %vm1079_vm9 }
 0x1f2   :  { %v5009_v36 = vpop.f32.mrf.mxu0  ;;  %vm3507_vm14 = vmpackc.low %vm1078_vm13, %vm1077_vm12 }
 0x1f3   :  { %vm3510_vm1 = vmpackc.low %vm1076_vm0, %vm1075_vm15 }
 0x1f5   :  { %613 = vmatpush.bf16.msrb.mxu2 %v474_v42 }
 0x1f9   :  { %614 = vmatpush.bf16.msrb.mxu2 %v473_v40  ;;  %v3496_v40 = vpack.c.bf16 %v1087_v62, %v1087_v62 }
 0x1fa   :  { %v5015_v49 = vpop.f32.mrf.mxu0 }
 0x1fd   :  { %615 = vmatpush.bf16.msrb.mxu2 %v472_v22 }
 0x200   :  { %616 = vmatmul.bf16.vlgmr.msrb.gmra.mxu2 %v5020_v6 }
 0x201   :  { %3497 = vmatpush.bf16.msk.msra.mxu2 %vm3495_vm2, %v3496_v40  ;;  %vm1073_vm2 = vcmp.eq.s32.totalorder %v4499_v19, %v1070_v57 }
 0x202   :  { %v5023_v34 = vpop.f32.mrf.mxu0  ;;  %vm3513_vm4 = vmpackc.low %vm1074_vm3, %vm1073_vm2 }
 0x205   :  { %3500 = vmatpush.bf16.msk.msra.mxu2 %vm3498_vm5, %v3496_v40  ;;  %vm1071_vm5 = vcmp.eq.s32.totalorder %v4415_v4, %v1070_v57 }
 0x206   :  { %vm3516_vm7 = vmpackc.low %vm1072_vm6, %vm1071_vm5 }
 0x209   :  { %3503 = vmatpush.bf16.msk.msra.mxu2 %vm3501_vm8, %v3496_v40 }
 0x20a   :  { %v5025_v52 = vpop.f32.mrf.mxu0 }
 0x20d   :  { %3506 = vmatpush.bf16.msk.msra.mxu2 %vm3504_vm11, %v3496_v40 }
 0x210   :  { %621 = vmatmul.bf16.gmra.mxu2 %v5030_v54 }
 0x211   :  { %3509 = vmatpush.bf16.msk.msra.mxu2 %vm3507_vm14, %v3496_v40 }
 0x212   :  { %v5033_v2 = vpop.f32.mrf.mxu0 }
 0x215   :  { %3512 = vmatpush.bf16.msk.msra.mxu2 %vm3510_vm1, %v3496_v40 }
 0x219   :  { %3515 = vmatpush.bf16.msk.msra.mxu2 %vm3513_vm4, %v3496_v40 }
 0x21a   :  { %v5035_v39 = vpop.f32.mrf.mxu0 }
 0x21d   :  { %3518 = vmatpush.bf16.msk.msra.mxu2 %vm3516_vm7, %v3496_v40  ;;  %v864_v40 = vadd.f32 %v4997_v46, %v5005_v3 }
 0x220   :  { %626 = vmatmul.bf16.gmra.mxu2 %v5040_v30 }
 0x222   :  { %v5043_v50 = vpop.f32.mrf.mxu0 }
 0x22a   :  { %v883_v25 = vpop.f32.mrf.mxu0 }
 0x230   :  { %631 = vmatmul.bf16.gmra.mxu2 %v5048_v48 }
 0x232   :  { %v886_v42 = vpop.f32.mrf.mxu0 }
 0x23a   :  { %v888_v63 = vpop.f32.mrf.mxu0 }
 0x240   :  { %636 = vmatmul.bf16.gmra.mxu2 %v5054_v41 }
 0x242   :  { %v891_v55 = vpop.f32.mrf.mxu0 }
 0x243   :  { %v892_v20 = vadd.f32 %v891_v55, %v4939_v56  ;;  %v882_v55 = vadd.f32 %v5043_v50, %v4956_v5  ;;  %v5105_v50 = vld [vmem:[%s6774_s5 + $0x38] sm:$0xff] }
 0x245   :  { %v913_v57 = vmax.f32 %v892_v20, 0.0  ;;  %v874_v20 = vadd.f32 %v5025_v52, %v4989_v51  ;;  %v867_v52 = vadd.f32 %v5009_v36, %v4991_v24 }
 0x24a   :  { %v893_v0 = vpop.f32.mrf.mxu0 }
 0x24b   :  { %v894_v26 = vadd.f32 %v893_v0, %v4952_v60 }
 0x24d   :  { %v914_v0 = vmax.f32 %v894_v26, 0.0 }
 0x24f   :  { %v923_v4 = vpack.c.bf16 %v914_v0, %v913_v57 }
 0x250   :  { %641 = vmatmul.bf16.gmra.mxu2 %v5070_v1 }
 0x252   :  { %v896_v37 = vpop.f32.mrf.mxu0 }
 0x253   :  { %v897_v22 = vadd.f32 %v896_v37, %v4937_v43  ;;  %v889_v43 = vadd.f32 %v888_v63, %v4954_v53  ;;  %v877_v63 = vadd.f32 %v5033_v2, %v4973_v47  ;;  %v906_v2 = vmax.f32 %v874_v20, 0.0 }
 0x255   :  { %v915_v19 = vmax.f32 %v897_v22, 0.0  ;;  %v912_v21 = vmax.f32 %v889_v43, 0.0 }
 0x25a   :  { %v898_v62 = vpop.f32.mrf.mxu0 }
 0x25b   :  { %v899_v31 = vadd.f32 %v898_v62, %v4947_v45  ;;  %v887_v62 = vadd.f32 %v886_v42, %v4945_v35  ;;  %v884_v45 = vadd.f32 %v883_v25, %v4962_v23  ;;  %v909_v42 = vmax.f32 %v882_v55, 0.0 }
 0x25d   :  { %v916_v37 = vmax.f32 %v899_v31, 0.0  ;;  %v911_v22 = vmax.f32 %v887_v62, 0.0  ;;  %v879_v31 = vadd.f32 %v5035_v39, %v4971_v59  ;;  %v910_v26 = vmax.f32 %v884_v45, 0.0 }
 0x25e   :  { %v907_v45 = vmax.f32 %v877_v63, 0.0  ;;  %v903_v62 = vmax.f32 %v867_v52, 0.0  ;;  %v5162_v63 = vpop.permute.xlu1 %552  ;;  %v7046_v52 = vld [vmem:[#allocation11_spill] sm:$0xff] }
 0x25f   :  { %v924_v60 = vpack.c.bf16 %v916_v37, %v915_v19  ;;  %v922_v19 = vpack.c.bf16 %v912_v21, %v911_v22  ;;  %v908_v43 = vmax.f32 %v879_v31, 0.0  ;;  %v869_v21 = vadd.f32 %v5015_v49, %v4999_v58  ;;  %7034 = vst [vmem:[#allocation51_spill] sm:$0xff] %v5162_v63 }
 0x260   :  { %646 = vmatmul.bf16.gmra.mxu2 %v5087_v18  ;;  %v902_v49 = vmax.f32 %v864_v40, 0.0  ;;  %v7048_v40 = vld [vmem:[#allocation12_spill] sm:$0xff] }
 0x261   :  { %925 = vmatpush.bf16.msra.mxu1 %v924_v60  ;;  %v921_v60 = vpack.c.bf16 %v910_v26, %v909_v42  ;;  %v920_v39 = vpack.c.bf16 %v908_v43, %v907_v45  ;;  %v904_v37 = vmax.f32 %v869_v21, 0.0  ;;  %v7037_v42 = vld [vmem:[#allocation14_spill] sm:$0xff]  ;;  %v7041_v45 = vld [vmem:[#allocation9_spill] sm:$0xff] }
 0x262   :  { %v7042_v21 = vld [vmem:[#allocation10_spill] sm:$0xff] }
 0x263   :  { %v918_v57 = vpack.c.bf16 %v904_v37, %v903_v62  ;;  %v5196_v37 = vpop.permute.xlu2 %557 }
 0x264   :  { %7049 = vst [vmem:[#allocation12_spill] sm:$0xff] %v5196_v37 }
 0x265   :  { %926 = vmatpush.bf16.msra.mxu1 %v923_v4  ;;  %v872_v4 = vadd.f32 %v5023_v34, %v4977_v44  ;;  %v862_v34 = vadd.f32 %v4983_v61, %v5007_v38 }
 0x266   :  { %v5176_v20 = vpop.permute.xlu1 %547 }
 0x267   :  { %v905_v25 = vmax.f32 %v872_v4, 0.0  ;;  %v901_v55 = vmax.f32 %v862_v34, 0.0  ;;  %7038 = vst [vmem:[#allocation14_spill] sm:$0xff] %v5176_v20  ;;  %v7040_v4 = vld [vmem:[#allocation8_spill] sm:$0xff] }
 0x269   :  { %927 = vmatpush.bf16.msra.mxu1 %v922_v19  ;;  %v919_v0 = vpack.c.bf16 %v906_v2, %v905_v25  ;;  %v917_v22 = vpack.c.bf16 %v902_v49, %v901_v55 }
 0x26b   :  { %v5204_v49 = vpop.permute.xlu2 %532 }
 0x26c   :  { %7052 = vst [vmem:[#allocation60_spill] sm:$0xff] %v5204_v49 }
 0x26d   :  { %928 = vmatpush.bf16.msra.mxu1 %v921_v60 }
 0x270   :  { %651 = vmatmul.bf16.gmra.mxu2 %v5105_v50 }
 0x271   :  { %929 = vmatpush.bf16.msra.mxu1 %v920_v39  ;;  %v7045_v39 = vld [vmem:[#allocation5_spill] sm:$0xff] }
 0x275   :  { %930 = vmatpush.bf16.msra.mxu1 %v919_v0 }
 0x279   :  { %931 = vmatpush.bf16.msra.mxu1 %v918_v57 }
 0x27d   :  { %932 = vmatpush.bf16.msra.mxu1 %v917_v22  ;;  %v7055_v22 = vld [vmem:[#allocation13_spill] sm:$0xff] }
 0x280   :  { %933 = vmatmul.bf16.vlgmr.msra.gmra.mxu1 %v5020_v6  ;;  %1120 = vmatmul.bf16.vlgmr.msra.gmra.mxu2 %v4570_v29 }
 0x283   :  { %v5120_v36 = vpop.f32.mrf.mxu2 }
 0x28b   :  { %v5122_v46 = vpop.f32.mrf.mxu2 }
 0x290   :  { %938 = vmatmul.bf16.gmra.mxu1 %v5030_v54  ;;  %1125 = vmatmul.bf16.gmra.mxu2 %v4613_v33  ;;  %v5145_v33 = vld [vmem:[%s6769_s0] sm:$0xff] }
 0x293   :  { %v5126_v61 = vpop.f32.mrf.mxu2 }
 0x29b   :  { %v5128_v31 = vpop.f32.mrf.mxu2 }
 0x2a0   :  { %943 = vmatmul.bf16.gmra.mxu1 %v5040_v30  ;;  %1130 = vmatmul.bf16.gmra.mxu2 %v4562_v28  ;;  %v1387_v30 = vperm.slane %v5145_v33, 3  ;;  %v5151_v28 = vld [vmem:[%s6770_s1] sm:$0xff] }
 0x2a2   :  { %vm1402_vm8 = vcmp.eq.s32.totalorder %v4423_v7, %v1387_v30  ;;  %vm1403_vm9 = vcmp.eq.s32.totalorder %v4426_v8, %v1387_v30  ;;  %vm1400_vm11 = vcmp.eq.s32.totalorder %v4429_v9, %v1387_v30  ;;  %vm1401_vm12 = vcmp.eq.s32.totalorder %v4432_v10, %v1387_v30 }
 0x2a3   :  { %v5132_v26 = vpop.f32.mrf.mxu2  ;;  %vm3519_vm10 = vmpackc.low %vm1403_vm9, %vm1402_vm8  ;;  %vm1398_vm14 = vcmp.eq.s32.totalorder %v4435_v11, %v1387_v30  ;;  %vm1399_vm15 = vcmp.eq.s32.totalorder %v4438_v12, %v1387_v30  ;;  %vm1396_vm1 = vcmp.eq.s32.totalorder %v4457_v13, %v1387_v30  ;;  %vm1397_vm2 = vcmp.eq.s32.totalorder %v4460_v14, %v1387_v30 }
 0x2a4   :  { %vm3522_vm13 = vmpackc.low %vm1401_vm12, %vm1400_vm11  ;;  %vm1394_vm4 = vcmp.eq.s32.totalorder %v4471_v15, %v1387_v30  ;;  %vm1395_vm5 = vcmp.eq.s32.totalorder %v4474_v16, %v1387_v30  ;;  %vm1392_vm7 = vcmp.eq.s32.totalorder %v4485_v17, %v1387_v30  ;;  %vm1393_vm8 = vcmp.eq.s32.totalorder %v7040_v4, %v1387_v30 }
 0x2a5   :  { %vm3525_vm0 = vmpackc.low %vm1399_vm15, %vm1398_vm14  ;;  %vm1391_vm11 = vcmp.eq.s32.totalorder %v7042_v21, %v1387_v30  ;;  %vm1389_vm14 = vcmp.eq.s32.totalorder %v7046_v52, %v1387_v30 }
 0x2a6   :  { %vm3528_vm3 = vmpackc.low %vm1397_vm2, %vm1396_vm1 }
 0x2a7   :  { %vm3531_vm6 = vmpackc.low %vm1395_vm5, %vm1394_vm4 }
 0x2a8   :  { %vm3534_vm9 = vmpackc.low %vm1393_vm8, %vm1392_vm7 }
 0x2ab   :  { %v5134_v6 = vpop.f32.mrf.mxu2 }
 0x2b0   :  { %948 = vmatmul.bf16.gmra.mxu1 %v5048_v48  ;;  %1135 = vmatmul.bf16.gmra.mxu2 %v4608_v32  ;;  %v1404_v48 = vperm.slane %v5151_v28, 3 }
 0x2b2   :  { %v3520_v32 = vpack.c.bf16 %v1404_v48, %v1404_v48 }
 0x2b3   :  { %v5138_v29 = vpop.f32.mrf.mxu2 }
 0x2b4   :  { %3521 = vmatpush.bf16.msk.msrb.mxu1 %vm3519_vm10, %v3520_v32  ;;  %vm1390_vm10 = vcmp.eq.s32.totalorder %v7041_v45, %v1387_v30 }
 0x2b5   :  { %vm3537_vm12 = vmpackc.low %vm1391_vm11, %vm1390_vm10 }
 0x2b8   :  { %3524 = vmatpush.bf16.msk.msrb.mxu1 %vm3522_vm13, %v3520_v32  ;;  %vm1388_vm13 = vcmp.eq.s32.totalorder %v7045_v39, %v1387_v30 }
 0x2b9   :  { %vm3540_vm15 = vmpackc.low %vm1389_vm14, %vm1388_vm13 }
 0x2bb   :  { %v5140_v54 = vpop.f32.mrf.mxu2 }
 0x2bc   :  { %3527 = vmatpush.bf16.msk.msrb.mxu1 %vm3525_vm0, %v3520_v32 }
 0x2c0   :  { %953 = vmatmul.bf16.gmra.mxu1 %v5054_v41  ;;  %1140 = vmatmul.bf16.gmra.mxu2 %v4551_v27  ;;  %v5166_v41 = vpop.permute.xlu0 %542 }
 0x2c1   :  { %7035 = vst [vmem:[#allocation52_spill] sm:$0xff] %v5166_v41  ;;  %3530 = vmatpush.bf16.msk.msrb.mxu1 %vm3528_vm3, %v3520_v32 }
 0x2c3   :  { %v5158_v19 = vpop.f32.mrf.mxu2 }
 0x2c5   :  { %3533 = vmatpush.bf16.msk.msrb.mxu1 %vm3531_vm6, %v3520_v32 }
 0x2c8   :  { %v5178_v43 = vpop.permute.xlu0 %537 }
 0x2c9   :  { %7039 = vst [vmem:[#allocation54_spill] sm:$0xff] %v5178_v43  ;;  %3536 = vmatpush.bf16.msk.msrb.mxu1 %vm3534_vm9, %v3520_v32 }
 0x2cb   :  { %v5168_v27 = vpop.f32.mrf.mxu2 }
 0x2cc   :  { %7036 = vst [vmem:[#allocation53_spill] sm:$0xff] %v5168_v27 }
 0x2cd   :  { %3539 = vmatpush.bf16.msk.msrb.mxu1 %vm3537_vm12, %v3520_v32 }
 0x2d0   :  { %958 = vmatmul.bf16.gmra.mxu1 %v5070_v1  ;;  %1145 = vmatmul.bf16.gmra.mxu2 %v7037_v42  ;;  %v5186_v1 = vpop.permute.xlu1 %522  ;;  %v5192_v25 = vpop.permute.xlu0 %512 }
 0x2d1   :  { %7043 = vst [vmem:[#allocation55_spill] sm:$0xff] %v5186_v1  ;;  %3542 = vmatpush.bf16.msk.msrb.mxu1 %vm3540_vm15, %v3520_v32  ;;  %v5218_v32 = vpop.permute.xlu2 %527 }
 0x2d2   :  { %7047 = vst [vmem:[#allocation57_spill] sm:$0xff] %v5192_v25 }
 0x2d3   :  { %v5180_v60 = vpop.f32.mrf.mxu2  ;;  %7057 = vst [vmem:[#allocation63_spill] sm:$0xff] %v5218_v32 }
 0x2d8   :  { %v5200_v34 = vpop.permute.xlu1 %517  ;;  %v5202_v62 = vpop.permute.xlu0 %507 }
 0x2d9   :  { %7050 = vst [vmem:[#allocation58_spill] sm:$0xff] %v5200_v34  ;;  %v5227_v43 = vpop.permute.xlu2 %502  ;;  %v630_v16 = vadd.f32 %v5134_v6, %v5202_v62 }
 0x2da   :  { %7051 = vst [vmem:[#allocation59_spill] sm:$0xff] %v5202_v62 }
 0x2db   :  { %v5188_v2 = vpop.f32.mrf.mxu2  ;;  %7060 = vst [vmem:[#allocation66_spill] sm:$0xff] %v5227_v43 }
 0x2dc   :  { %7044 = vst [vmem:[#allocation56_spill] sm:$0xff] %v5188_v2 }
 0x2e0   :  { %963 = vmatmul.bf16.gmra.mxu1 %v5087_v18  ;;  %1150 = vmatmul.bf16.gmra.mxu2 %v7048_v40  ;;  %v5208_v55 = vpop.permute.xlu1 %492  ;;  %v5212_v18 = vpop.permute.xlu0 %482 }
 0x2e1   :  { %7054 = vst [vmem:[#allocation62_spill] sm:$0xff] %v5208_v55  ;;  %v618_v30 = vadd.f32 %v5120_v36, %v5212_v18  ;;  %v5240_v52 = vpop.permute.xlu2 %497 }
 0x2e2   :  { %7056 = vst [vmem:[#allocation13_spill] sm:$0xff] %v5212_v18 }
 0x2e3   :  { %v5198_v0 = vpop.f32.mrf.mxu2  ;;  %v657_v42 = vsub.f32 0.0, %v618_v30  ;;  %v5232_v30 = vld [vmem:[%s6771_s2] sm:$0xff]  ;;  %7063 = vst [vmem:[#allocation69_spill] sm:$0xff] %v5240_v52 }
 0x2e4   :  { %7061 = vst [vmem:[#allocation67_spill] sm:$0xff] %v5232_v30 }
 0x2e5   :  { %v673_v37 = vmul.f32 1.442695, %v657_v42 }
 0x2e7   :  { %3734 = vpow2.f32 %v673_v37 }
 0x2e8   :  { %v5220_v40 = vpop.permute.xlu1 %487 }
 0x2e9   :  { %7058 = vst [vmem:[#allocation64_spill] sm:$0xff] %v5220_v40 }
 0x2eb   :  { %v5206_v57 = vpop.f32.mrf.mxu2 }
 0x2ec   :  { %7053 = vst [vmem:[#allocation61_spill] sm:$0xff] %v5206_v57  ;;  %v620_v57 = vadd.f32 %v5122_v46, %v5220_v40  ;;  %v623_v46 = vadd.f32 %v5126_v61, %v5208_v55 }
 0x2ed   :  { %v3735_v37 = vpop.eup %3734 }
 0x2ee   :  { %v705_v32 = vadd.f32 1.0, %v3735_v37 }
 0x2f0   :  { %968 = vmatmul.bf16.gmra.mxu1 %v5105_v50  ;;  %1155 = vmatmul.bf16.gmra.mxu2 %v7055_v22  ;;  %v658_v22 = vsub.f32 0.0, %v620_v57 }
 0x2f2   :  { %v675_v42 = vmul.f32 1.442695, %v658_v22  ;;  %v625_v22 = vadd.f32 %v5128_v31, %v5240_v52 }
 0x2f3   :  { %v5216_v48 = vpop.f32.mrf.mxu2 }
 0x2fb   :  { %v5224_v20 = vpop.f32.mrf.mxu2 }
 0x2fc   :  { %7059 = vst [vmem:[#allocation65_spill] sm:$0xff] %v5224_v20 }
 0x2fd   :  { %v934_v50 = vpop.f32.mrf.mxu1 }
 0x2fe   :  { %v935_v2 = vadd.f32 %v934_v50, %v5212_v18  ;;  %v659_v50 = vsub.f32 0.0, %v623_v46  ;;  %v660_v46 = vsub.f32 0.0, %v625_v22 }
 0x300   :  { %v974_v36 = vsub.f32 0.0, %v935_v2  ;;  %1437 = vmatmul.bf16.vlgmr.msrb.gmra.mxu1 %v5232_v30  ;;  %v677_v30 = vmul.f32 1.442695, %v659_v50  ;;  %v5250_v50 = vld [vmem:[%s6771_s2 + $0x8] sm:$0xff] }
 0x301   :  { %7065 = vst [vmem:[#allocation71_spill] sm:$0xff] %v5250_v50 }
 0x302   :  { %v990_v20 = vmul.f32 1.442695, %v974_v36 }
 0x303   :  { %v5237_v27 = vpop.f32.mrf.mxu2 }
 0x304   :  { %7062 = vst [vmem:[#allocation68_spill] sm:$0xff] %v5237_v27  ;;  %3736 = vpow2.f32 %v990_v20 }
 0x305   :  { %v936_v57 = vpop.f32.mrf.mxu1  ;;  %3738 = vpow2.f32 %v675_v42 }
 0x306   :  { %v937_v2 = vadd.f32 %v936_v57, %v5220_v40  ;;  %3740 = vrcp.f32 %v705_v32  ;;  %v628_v32 = vadd.f32 %v5132_v26, %v5227_v43 }
 0x308   :  { %v975_v18 = vsub.f32 0.0, %v937_v2  ;;  %v661_v45 = vsub.f32 0.0, %v628_v32  ;;  %v7071_v32 = vld [vmem:[#allocation25_spill] sm:$0xff] }
 0x30a   :  { %v3737_v39 = vpop.eup %3736  ;;  %v992_v61 = vmul.f32 1.442695, %v975_v18  ;;  %v679_v18 = vmul.f32 1.442695, %v660_v46  ;;  %v681_v17 = vmul.f32 1.442695, %v661_v45 }
 0x30b   :  { %v1022_v36 = vadd.f32 1.0, %v3737_v39  ;;  %v5244_v21 = vpop.f32.mrf.mxu2  ;;  %v3739_v20 = vpop.eup %3738 }
 0x30c   :  { %7064 = vst [vmem:[#allocation70_spill] sm:$0xff] %v5244_v21  ;;  %3742 = vpow2.f32 %v992_v61  ;;  %v706_v57 = vadd.f32 1.0, %v3739_v20  ;;  %v3741_v31 = vpop.eup %3740 }
 0x30d   :  { %3744 = vrcp.f32 %v1022_v36  ;;  %v939_v42 = vpop.f32.mrf.mxu1 }
 0x30e   :  { %3746 = vpow2.f32 %v677_v30  ;;  %v940_v37 = vadd.f32 %v939_v42, %v5208_v55  ;;  %v7067_v42 = vld [vmem:[#allocation20_spill] sm:$0xff] }
 0x30f   :  { %3748 = vrcp.f32 %v706_v57  ;;  %v7068_v55 = vld [vmem:[#allocation28_spill] sm:$0xff] }
 0x310   :  { %v976_v2 = vsub.f32 0.0, %v940_v37  ;;  %1442 = vmatmul.bf16.gmra.mxu1 %v5250_v50  ;;  %v737_v37 = vmul.f32 %v3741_v31, %v7067_v42 }
 0x312   :  { %v3743_v39 = vpop.eup %3742  ;;  %v994_v61 = vmul.f32 1.442695, %v976_v2 }
 0x313   :  { %v3745_v30 = vpop.eup %3744  ;;  %v1023_v22 = vadd.f32 1.0, %v3743_v39  ;;  %v5255_v36 = vpop.f32.mrf.mxu2 }
 0x314   :  { %7066 = vst [vmem:[#allocation72_spill] sm:$0xff] %v5255_v36  ;;  %v3747_v20 = vpop.eup %3746  ;;  %v1054_v40 = vmul.f32 %v3745_v30, %v7068_v55  ;;  %3750 = vpow2.f32 %v994_v61 }
 0x315   :  { %3752 = vrcp.f32 %v1023_v22  ;;  %v941_v50 = vpop.f32.mrf.mxu1  ;;  %v707_v26 = vadd.f32 1.0, %v3747_v20  ;;  %v3749_v57 = vpop.eup %3748  ;;  %v662_v20 = vsub.f32 0.0, %v630_v16 }
 0x316   :  { %3754 = vpow2.f32 %v679_v18  ;;  %v942_v46 = vadd.f32 %v941_v50, %v5240_v52  ;;  %v5260_v4 = vadd.f32 %v1054_v40, %v737_v37  ;;  %v738_v50 = vmul.f32 %v3749_v57, %v7071_v32  ;;  %v7072_v40 = vld [vmem:[#allocation31_spill] sm:$0xff]  ;;  %v7075_v32 = vld [vmem:[#allocation29_spill] sm:$0xff] }
 0x317   :  { %3756 = vrcp.f32 %v707_v26  ;;  %v5274_v26 = vld [vmem:[%s6771_s2 + $0x10] sm:$0xff] }
 0x318   :  { %7069 = vst [vmem:[#allocation20_spill] sm:$0xff] %v5260_v4  ;;  %v977_v2 = vsub.f32 0.0, %v942_v46 }
 0x31a   :  { %v3751_v39 = vpop.eup %3750  ;;  %v996_v31 = vmul.f32 1.442695, %v977_v2 }
 0x31b   :  { %v3753_v42 = vpop.eup %3752  ;;  %v1024_v55 = vadd.f32 1.0, %v3751_v39  ;;  %v5264_v61 = vpop.f32.mrf.mxu2  ;;  %v683_v39 = vmul.f32 1.442695, %v662_v20 }
 0x31c   :  { %7070 = vst [vmem:[#allocation28_spill] sm:$0xff] %v5264_v61  ;;  %v3755_v18 = vpop.eup %3754  ;;  %3758 = vpow2.f32 %v996_v31  ;;  %v1055_v30 = vmul.f32 %v3753_v42, %v7072_v40  ;;  %v7076_v40 = vld [vmem:[#allocation33_spill] sm:$0xff] }
 0x31d   :  { %3760 = vrcp.f32 %v1024_v55  ;;  %v944_v22 = vpop.f32.mrf.mxu1  ;;  %v708_v6 = vadd.f32 1.0, %v3755_v18  ;;  %v3757_v2 = vpop.eup %3756 }
 0x31e   :  { %3762 = vpow2.f32 %v681_v17  ;;  %v945_v45 = vadd.f32 %v944_v22, %v5227_v43  ;;  %v5269_v37 = vadd.f32 %v1055_v30, %v738_v50  ;;  %v633_v17 = vadd.f32 %v5138_v29, %v5192_v25 }
 0x31f   :  { %3764 = vrcp.f32 %v708_v6  ;;  %v739_v50 = vmul.f32 %v3757_v2, %v7075_v32  ;;  %v635_v43 = vadd.f32 %v5140_v54, %v5200_v34 }
 0x320   :  { %7073 = vst [vmem:[#allocation25_spill] sm:$0xff] %v5269_v37  ;;  %v978_v46 = vsub.f32 0.0, %v945_v45  ;;  %1447 = vmatmul.bf16.gmra.mxu1 %v5274_v26  ;;  %v663_v45 = vsub.f32 0.0, %v633_v17  ;;  %v7079_v17 = vld [vmem:[#allocation32_spill] sm:$0xff] }
 0x322   :  { %v3759_v57 = vpop.eup %3758  ;;  %v998_v16 = vmul.f32 1.442695, %v978_v46  ;;  %v685_v4 = vmul.f32 1.442695, %v663_v45 }
 0x323   :  { %v3761_v31 = vpop.eup %3760  ;;  %v1025_v42 = vadd.f32 1.0, %v3759_v57  ;;  %v5279_v55 = vpop.f32.mrf.mxu2 }
 0x324   :  { %7074 = vst [vmem:[#allocation31_spill] sm:$0xff] %v5279_v55  ;;  %v3763_v18 = vpop.eup %3762  ;;  %v1056_v30 = vmul.f32 %v3761_v31, %v7076_v40  ;;  %3766 = vpow2.f32 %v998_v16 }
 0x325   :  { %3768 = vrcp.f32 %v1025_v42  ;;  %v946_v22 = vpop.f32.mrf.mxu1  ;;  %v709_v29 = vadd.f32 1.0, %v3763_v18  ;;  %v3765_v6 = vpop.eup %3764 }
 0x326   :  { %3770 = vpow2.f32 %v683_v39  ;;  %v947_v20 = vadd.f32 %v946_v22, %v5202_v62  ;;  %v5284_v37 = vadd.f32 %v1056_v30, %v739_v50  ;;  %v740_v42 = vmul.f32 %v3765_v6, %v7079_v17  ;;  %v7080_v50 = vld [vmem:[#allocation34_spill] sm:$0xff]  ;;  %v7083_v17 = vld [vmem:[#allocation17_spill] sm:$0xff] }
 0x327   :  { %3772 = vrcp.f32 %v709_v29  ;;  %v664_v30 = vsub.f32 0.0, %v635_v43  ;;  %v5298_v29 = vld [vmem:[%s6771_s2 + $0x18] sm:$0xff] }
 0x328   :  { %7077 = vst [vmem:[#allocation29_spill] sm:$0xff] %v5284_v37  ;;  %v979_v46 = vsub.f32 0.0, %v947_v20 }
 0x32a   :  { %v3767_v57 = vpop.eup %3766  ;;  %v1000_v2 = vmul.f32 1.442695, %v979_v46 }
 0x32b   :  { %v3769_v32 = vpop.eup %3768  ;;  %v1026_v16 = vadd.f32 1.0, %v3767_v57  ;;  %v5288_v31 = vpop.f32.mrf.mxu2  ;;  %v687_v57 = vmul.f32 1.442695, %v664_v30 }
 0x32c   :  { %7078 = vst [vmem:[#allocation33_spill] sm:$0xff] %v5288_v31  ;;  %v3771_v39 = vpop.eup %3770  ;;  %3774 = vpow2.f32 %v1000_v2  ;;  %v1057_v40 = vmul.f32 %v3769_v32, %v7080_v50  ;;  %v7084_v50 = vld [vmem:[#allocation35_spill] sm:$0xff] }
 0x32d   :  { %3776 = vrcp.f32 %v1026_v16  ;;  %v949_v18 = vpop.f32.mrf.mxu1  ;;  %v710_v54 = vadd.f32 1.0, %v3771_v39  ;;  %v3773_v46 = vpop.eup %3772 }
 0x32e   :  { %3778 = vpow2.f32 %v685_v4  ;;  %v950_v22 = vadd.f32 %v949_v18, %v5192_v25  ;;  %v5293_v45 = vadd.f32 %v1057_v40, %v740_v42  ;;  %v638_v4 = vadd.f32 %v5158_v19, %v5186_v1 }
 0x32f   :  { %3780 = vrcp.f32 %v710_v54  ;;  %v741_v42 = vmul.f32 %v3773_v46, %v7083_v17 }
 0x330   :  { %7081 = vst [vmem:[#allocation32_spill] sm:$0xff] %v5293_v45  ;;  %v980_v20 = vsub.f32 0.0, %v950_v22  ;;  %1452 = vmatmul.bf16.gmra.mxu1 %v5298_v29  ;;  %v665_v22 = vsub.f32 0.0, %v638_v4  ;;  %v7088_v4 = vld [vmem:[#allocation36_spill] sm:$0xff] }
 0x332   :  { %v3775_v6 = vpop.eup %3774  ;;  %v1002_v43 = vmul.f32 1.442695, %v980_v20  ;;  %v689_v37 = vmul.f32 1.442695, %v665_v22  ;;  %v5320_v22 = vld [vmem:[%s6771_s2 + $0x20] sm:$0xff] }
 0x333   :  { %v3777_v2 = vpop.eup %3776  ;;  %v1027_v32 = vadd.f32 1.0, %v3775_v6  ;;  %v5303_v16 = vpop.f32.mrf.mxu2 }
 0x334   :  { %7082 = vst [vmem:[#allocation34_spill] sm:$0xff] %v5303_v16  ;;  %v3779_v39 = vpop.eup %3778  ;;  %v1058_v40 = vmul.f32 %v3777_v2, %v7084_v50  ;;  %3782 = vpow2.f32 %v1002_v43  ;;  %v7087_v2 = vld [vmem:[#allocation22_spill] sm:$0xff] }
 0x335   :  { %3784 = vrcp.f32 %v1027_v32  ;;  %v951_v18 = vpop.f32.mrf.mxu1  ;;  %v711_v19 = vadd.f32 1.0, %v3779_v39  ;;  %v3781_v54 = vpop.eup %3780 }
 0x336   :  { %3786 = vpow2.f32 %v687_v57  ;;  %v952_v30 = vadd.f32 %v951_v18, %v5200_v34  ;;  %v5308_v45 = vadd.f32 %v1058_v40, %v741_v42  ;;  %v742_v57 = vmul.f32 %v3781_v54, %v7087_v2  ;;  %v7092_v2 = vld [vmem:[#allocation37_spill] sm:$0xff] }
 0x337   :  { %3788 = vrcp.f32 %v711_v19 }
 0x338   :  { %7085 = vst [vmem:[#allocation17_spill] sm:$0xff] %v5308_v45  ;;  %v981_v20 = vsub.f32 0.0, %v952_v30 }
 0x33a   :  { %v3783_v6 = vpop.eup %3782  ;;  %v1004_v25 = vmul.f32 1.442695, %v981_v20 }
 0x33b   :  { %v3785_v62 = vpop.eup %3784  ;;  %v1028_v46 = vadd.f32 1.0, %v3783_v6  ;;  %v5310_v17 = vpop.f32.mrf.mxu2 }
 0x33c   :  { %7086 = vst [vmem:[#allocation35_spill] sm:$0xff] %v5310_v17  ;;  %v3787_v43 = vpop.eup %3786  ;;  %3790 = vpow2.f32 %v1004_v25  ;;  %v1059_v32 = vmul.f32 %v3785_v62, %v7088_v4  ;;  %v643_v62 = vadd.f32 %v5180_v60, %v5204_v49 }
 0x33d   :  { %3792 = vrcp.f32 %v1028_v46  ;;  %v954_v42 = vpop.f32.mrf.mxu1  ;;  %v712_v40 = vadd.f32 1.0, %v3787_v43  ;;  %v3789_v25 = vpop.eup %3788  ;;  %v7091_v46 = vld [vmem:[#allocation26_spill] sm:$0xff] }
 0x33e   :  { %3794 = vpow2.f32 %v689_v37  ;;  %v955_v39 = vadd.f32 %v954_v42, %v5186_v1  ;;  %v5315_v50 = vadd.f32 %v1059_v32, %v742_v57  ;;  %v743_v43 = vmul.f32 %v3789_v25, %v7091_v46  ;;  %v7096_v1 = vld [vmem:[#allocation30_spill] sm:$0xff] }
 0x33f   :  { %3796 = vrcp.f32 %v712_v40  ;;  %v667_v32 = vsub.f32 0.0, %v643_v62  ;;  %v7097_v46 = vld [vmem:[#allocation38_spill] sm:$0xff] }
 0x340   :  { %7089 = vst [vmem:[#allocation22_spill] sm:$0xff] %v5315_v50  ;;  %v982_v18 = vsub.f32 0.0, %v955_v39  ;;  %1457 = vmatmul.bf16.gmra.mxu1 %v5320_v22 }
 0x341   :  { %v693_v50 = vmul.f32 1.442695, %v667_v32 }
 0x342   :  { %v3791_v30 = vpop.eup %3790  ;;  %v1006_v19 = vmul.f32 1.442695, %v982_v18 }
 0x343   :  { %v3793_v37 = vpop.eup %3792  ;;  %v1029_v20 = vadd.f32 1.0, %v3791_v30  ;;  %v5325_v54 = vpop.f32.mrf.mxu2 }
 0x344   :  { %7090 = vst [vmem:[#allocation36_spill] sm:$0xff] %v5325_v54  ;;  %v3795_v6 = vpop.eup %3794  ;;  %v1060_v57 = vmul.f32 %v3793_v37, %v7092_v2  ;;  %3798 = vpow2.f32 %v1006_v19 }
 0x345   :  { %3800 = vrcp.f32 %v1029_v20  ;;  %v5329_v4 = vpop.f32.mrf.mxu1  ;;  %v713_v39 = vadd.f32 1.0, %v3795_v6  ;;  %v3797_v60 = vpop.eup %3796 }
 0x346   :  { %7093 = vst [vmem:[#allocation26_spill] sm:$0xff] %v5329_v4  ;;  %v5331_v42 = vadd.f32 %v1060_v57, %v743_v43  ;;  %v744_v25 = vmul.f32 %v3797_v60, %v7096_v1  ;;  %v5343_v43 = vld [vmem:[%s6771_s2 + $0x28] sm:$0xff]  ;;  %v648_v1 = vadd.f32 %v5198_v0, %v5166_v41  ;;  %v7101_v60 = vld [vmem:[#allocation16_spill] sm:$0xff] }
 0x347   :  { %3802 = vrcp.f32 %v713_v39  ;;  %7099 = vst [vmem:[#allocation38_spill] sm:$0xff] %v5343_v43 }
 0x348   :  { %7094 = vst [vmem:[#allocation37_spill] sm:$0xff] %v5331_v42 }
 0x34a   :  { %v3799_v18 = vpop.eup %3798 }
 0x34b   :  { %v3801_v40 = vpop.eup %3800  ;;  %v1030_v30 = vadd.f32 1.0, %v3799_v18  ;;  %v5333_v45 = vpop.f32.mrf.mxu2 }
 0x34c   :  { %7095 = vst [vmem:[#allocation73_spill] sm:$0xff] %v5333_v45  ;;  %v1061_v37 = vmul.f32 %v3801_v40, %v7097_v46  ;;  %v7102_v40 = vld [vmem:[#allocation39_spill] sm:$0xff]  ;;  %v669_v46 = vsub.f32 0.0, %v648_v1 }
 0x34d   :  { %3804 = vrcp.f32 %v1030_v30  ;;  %v959_v19 = vpop.f32.mrf.mxu1  ;;  %v3803_v2 = vpop.eup %3802 }
 0x34e   :  { %3806 = vpow2.f32 %v693_v50  ;;  %v960_v62 = vadd.f32 %v959_v19, %v5204_v49  ;;  %v5338_v20 = vadd.f32 %v1061_v37, %v744_v25  ;;  %v745_v18 = vmul.f32 %v3803_v2, %v7101_v60 }
 0x34f   :  { %v697_v4 = vmul.f32 1.442695, %v669_v46 }
 0x350   :  { %7098 = vst [vmem:[#allocation30_spill] sm:$0xff] %v5338_v20  ;;  %v984_v6 = vsub.f32 0.0, %v960_v62  ;;  %1462 = vmatmul.bf16.gmra.mxu1 %v5343_v43 }
 0x352   :  { %v1010_v57 = vmul.f32 1.442695, %v984_v6 }
 0x353   :  { %v3805_v32 = vpop.eup %3804  ;;  %v5348_v39 = vpop.f32.mrf.mxu2 }
 0x354   :  { %7100 = vst [vmem:[#allocation74_spill] sm:$0xff] %v5348_v39  ;;  %v3807_v50 = vpop.eup %3806  ;;  %v1062_v30 = vmul.f32 %v3805_v32, %v7102_v40  ;;  %3808 = vpow2.f32 %v1010_v57  ;;  %v5362_v57 = vld [vmem:[%s6771_s2 + $0x30] sm:$0xff]  ;;  %v653_v32 = vadd.f32 %v5216_v48, %v5162_v63 }
 0x355   :  { %v5352_v25 = vpop.f32.mrf.mxu1  ;;  %v715_v19 = vadd.f32 1.0, %v3807_v50  ;;  %7106 = vst [vmem:[#allocation76_spill] sm:$0xff] %v5362_v57 }
 0x356   :  { %7103 = vst [vmem:[#allocation16_spill] sm:$0xff] %v5352_v25  ;;  %v5354_v37 = vadd.f32 %v1062_v30, %v745_v18 }
 0x357   :  { %3810 = vrcp.f32 %v715_v19 }
 0x358   :  { %7104 = vst [vmem:[#allocation39_spill] sm:$0xff] %v5354_v37 }
 0x35a   :  { %v3809_v62 = vpop.eup %3808 }
 0x35b   :  { %v1032_v0 = vadd.f32 1.0, %v3809_v62  ;;  %v5356_v6 = vpop.f32.mrf.mxu2 }
 0x35c   :  { %7105 = vst [vmem:[#allocation75_spill] sm:$0xff] %v5356_v6 }
 0x35d   :  { %3812 = vrcp.f32 %v1032_v0  ;;  %v964_v20 = vpop.f32.mrf.mxu1  ;;  %v3811_v1 = vpop.eup %3810  ;;  %v671_v0 = vsub.f32 0.0, %v653_v32 }
 0x35e   :  { %3814 = vpow2.f32 %v697_v4  ;;  %v965_v2 = vadd.f32 %v964_v20, %v5166_v41  ;;  %v7108_v4 = vld [vmem:[#allocation23_spill] sm:$0xff]  ;;  %v7109_v20 = vld [vmem:[#allocation41_spill] sm:$0xff] }
 0x35f   :  { %v747_v46 = vmul.f32 %v3811_v1, %v7108_v4  ;;  %v701_v41 = vmul.f32 1.442695, %v671_v0 }
 0x360   :  { %v986_v60 = vsub.f32 0.0, %v965_v2  ;;  %1467 = vmatmul.bf16.gmra.mxu1 %v5362_v57  ;;  %v7146_v57 = vld [vmem:[#allocation10_spill] sm:$0xff] }
 0x362   :  { %v1014_v50 = vmul.f32 1.442695, %v986_v60 }
 0x363   :  { %v3813_v18 = vpop.eup %3812  ;;  %v5367_v40 = vpop.f32.mrf.mxu2 }
 0x364   :  { %7107 = vst [vmem:[#allocation77_spill] sm:$0xff] %v5367_v40  ;;  %v3815_v30 = vpop.eup %3814  ;;  %v1064_v19 = vmul.f32 %v3813_v18, %v7109_v20  ;;  %3816 = vpow2.f32 %v1014_v50  ;;  %v5381_v50 = vld [vmem:[%s6771_s2 + $0x38] sm:$0xff] }
 0x365   :  { %v5371_v62 = vpop.f32.mrf.mxu1  ;;  %v717_v25 = vadd.f32 1.0, %v3815_v30  ;;  %7113 = vst [vmem:[#allocation79_spill] sm:$0xff] %v5381_v50 }
 0x366   :  { %7110 = vst [vmem:[#allocation23_spill] sm:$0xff] %v5371_v62  ;;  %v5373_v2 = vadd.f32 %v1064_v19, %v747_v46  ;;  %v7115_v46 = vld [vmem:[#allocation15_spill] sm:$0xff] }
 0x367   :  { %3818 = vrcp.f32 %v717_v25  ;;  %v7116_v19 = vld [vmem:[#allocation43_spill] sm:$0xff] }
 0x368   :  { %7111 = vst [vmem:[#allocation41_spill] sm:$0xff] %v5373_v2 }
 0x36a   :  { %v3817_v37 = vpop.eup %3816 }
 0x36b   :  { %v1034_v48 = vadd.f32 1.0, %v3817_v37  ;;  %v5375_v60 = vpop.f32.mrf.mxu2 }
 0x36c   :  { %7112 = vst [vmem:[#allocation78_spill] sm:$0xff] %v5375_v60 }
 0x36d   :  { %3820 = vrcp.f32 %v1034_v48  ;;  %v969_v42 = vpop.f32.mrf.mxu1  ;;  %v3819_v32 = vpop.eup %3818 }
 0x36e   :  { %3822 = vpow2.f32 %v701_v41  ;;  %v970_v1 = vadd.f32 %v969_v42, %v5162_v63  ;;  %v749_v20 = vmul.f32 %v3819_v32, %v7115_v46  ;;  %v1167_v32 = vpack.c.bf16 %v5375_v60, %v5367_v40  ;;  %v7121_v46 = vld [vmem:[#allocation21_spill] sm:$0xff]  ;;  %v4259_v60 = vld [vmem:[%s6772_s3 + $0x18] sm:$0xff] }
 0x370   :  { %v988_v4 = vsub.f32 0.0, %v970_v1  ;;  %1472 = vmatmul.bf16.gmra.mxu1 %v5381_v50  ;;  %v7145_v50 = vld [vmem:[#allocation9_spill] sm:$0xff] }
 0x372   :  { %v1018_v18 = vmul.f32 1.442695, %v988_v4 }
 0x373   :  { %v3821_v30 = vpop.eup %3820  ;;  %v5384_v25 = vpop.f32.mrf.mxu2 }
 0x374   :  { %7114 = vst [vmem:[#allocation80_spill] sm:$0xff] %v5384_v25  ;;  %v3823_v37 = vpop.eup %3822  ;;  %v1066_v41 = vmul.f32 %v3821_v30, %v7116_v19  ;;  %3824 = vpow2.f32 %v1018_v18  ;;  %v1166_v30 = vpack.c.bf16 %v5356_v6, %v5348_v39  ;;  %v7122_v19 = vld [vmem:[#allocation45_spill] sm:$0xff] }
 0x375   :  { %v5388_v42 = vpop.f32.mrf.mxu1  ;;  %v719_v48 = vadd.f32 1.0, %v3823_v37 }
 0x376   :  { %7117 = vst [vmem:[#allocation15_spill] sm:$0xff] %v5388_v42  ;;  %v5390_v0 = vadd.f32 %v1066_v41, %v749_v20  ;;  %v4260_v42 = vld [vmem:[%s6772_s3 + $0x20] sm:$0xff] }
 0x377   :  { %3826 = vrcp.f32 %v719_v48 }
 0x378   :  { %7118 = vst [vmem:[#allocation43_spill] sm:$0xff] %v5390_v0  ;;  %v4261_v0 = vld [vmem:[%s6772_s3 + $0x28] sm:$0xff] }
 0x37a   :  { %v3825_v1 = vpop.eup %3824 }
 0x37b   :  { %v1036_v62 = vadd.f32 1.0, %v3825_v1  ;;  %v5392_v2 = vpop.f32.mrf.mxu2 }
 0x37c   :  { %7119 = vst [vmem:[#allocation81_spill] sm:$0xff] %v5392_v2  ;;  %v1168_v4 = vpack.c.bf16 %v5392_v2, %v5384_v25 }
 0x37d   :  { %3828 = vrcp.f32 %v1036_v62  ;;  %v5396_v63 = vpop.f32.mrf.mxu1  ;;  %v3827_v18 = vpop.eup %3826  ;;  %v1165_v62 = vpack.c.bf16 %v5333_v45, %v5325_v54 }
 0x37e   :  { %7120 = vst [vmem:[#allocation82_spill] sm:$0xff] %v5396_v63  ;;  %1169 = vmatpush.bf16.msra.mxu3 %v1168_v4  ;;  %v751_v20 = vmul.f32 %v3827_v18, %v7121_v46  ;;  %v1164_v4 = vpack.c.bf16 %v5310_v17, %v5303_v16  ;;  %v1162_v18 = vpack.c.bf16 %v5264_v61, %v5255_v36  ;;  %v4256_v46 = vld [vmem:[%s6772_s3] sm:$0xff]  ;;  %v4262_v16 = vld [vmem:[%s6772_s3 + $0x30] sm:$0xff] }
 0x382   :  { %1170 = vmatpush.bf16.msra.mxu3 %v1167_v32  ;;  %v1163_v32 = vpack.c.bf16 %v5288_v31, %v5279_v55  ;;  %v7140_v55 = vld [vmem:[#allocation49_spill] sm:$0xff] }
 0x383   :  { %v3829_v37 = vpop.eup %3828 }
 0x384   :  { %v1068_v41 = vmul.f32 %v3829_v37, %v7122_v19 }
 0x385   :  { %v5404_v48 = vpop.f32.mrf.mxu1 }
 0x386   :  { %7123 = vst [vmem:[#allocation21_spill] sm:$0xff] %v5404_v48  ;;  %v5408_v1 = vadd.f32 %v1068_v41, %v751_v20  ;;  %1171 = vmatpush.bf16.msra.mxu3 %v1166_v30  ;;  %v1161_v30 = vpack.c.bf16 %v5244_v21, %v5237_v27  ;;  %v4257_v41 = vld [vmem:[%s6772_s3 + $0x8] sm:$0xff] }
 0x388   :  { %7124 = vst [vmem:[#allocation45_spill] sm:$0xff] %v5408_v1 }
 0x38a   :  { %1172 = vmatpush.bf16.msra.mxu3 %v1165_v62 }
 0x38d   :  { %v5412_v2 = vpop.f32.mrf.mxu1 }
 0x38e   :  { %7125 = vst [vmem:[#allocation83_spill] sm:$0xff] %v5412_v2  ;;  %1173 = vmatpush.bf16.msra.mxu3 %v1164_v4 }
 0x392   :  { %1174 = vmatpush.bf16.msra.mxu3 %v1163_v32  ;;  %v4258_v32 = vld [vmem:[%s6772_s3 + $0x10] sm:$0xff] }
 0x395   :  { %v5418_v37 = vpop.f32.mrf.mxu1 }
 0x396   :  { %7126 = vst [vmem:[#allocation84_spill] sm:$0xff] %v5418_v37  ;;  %1175 = vmatpush.bf16.msra.mxu3 %v1162_v18 }
 0x39a   :  { %1176 = vmatpush.bf16.msra.mxu3 %v1161_v30 }
 0x39d   :  { %1177 = vmatmul.bf16.vlgmr.msra.gmra.mxu3 %v4256_v46  ;;  %v5425_v20 = vpop.f32.mrf.mxu1 }
 0x39e   :  { %7127 = vst [vmem:[#allocation85_spill] sm:$0xff] %v5425_v20 }
 0x3a5   :  { %v5427_v19 = vpop.f32.mrf.mxu1 }
 0x3a6   :  { %7128 = vst [vmem:[#allocation86_spill] sm:$0xff] %v5427_v19 }
 0x3ad   :  { %1182 = vmatmul.bf16.gmra.mxu3 %v4257_v41  ;;  %v5432_v62 = vpop.f32.mrf.mxu1 }
 0x3ae   :  { %7129 = vst [vmem:[#allocation87_spill] sm:$0xff] %v5432_v62 }
 0x3b5   :  { %v5434_v4 = vpop.f32.mrf.mxu1 }
 0x3b6   :  { %7130 = vst [vmem:[#allocation88_spill] sm:$0xff] %v5434_v4 }
 0x3bd   :  { %1187 = vmatmul.bf16.gmra.mxu3 %v4258_v32  ;;  %v5439_v18 = vpop.f32.mrf.mxu1 }
 0x3be   :  { %7131 = vst [vmem:[#allocation89_spill] sm:$0xff] %v5439_v18 }
 0x3c5   :  { %v5441_v30 = vpop.f32.mrf.mxu1 }
 0x3c6   :  { %7132 = vst [vmem:[#allocation90_spill] sm:$0xff] %v5441_v30  ;;  %v1482_v31 = vpack.c.bf16 %v5441_v30, %v5439_v18 }
 0x3cd   :  { %1192 = vmatmul.bf16.gmra.mxu3 %v4259_v60  ;;  %v5446_v6 = vpop.f32.mrf.mxu1 }
 0x3ce   :  { %7133 = vst [vmem:[#allocation91_spill] sm:$0xff] %v5446_v6 }
 0x3d5   :  { %v5448_v45 = vpop.f32.mrf.mxu1 }
 0x3d6   :  { %7134 = vst [vmem:[#allocation92_spill] sm:$0xff] %v5448_v45  ;;  %v1483_v49 = vpack.c.bf16 %v5448_v45, %v5446_v6 }
 0x3dd   :  { %1197 = vmatmul.bf16.gmra.mxu3 %v4260_v42  ;;  %v5453_v1 = vpop.f32.mrf.mxu1 }
 0x3de   :  { %7135 = vst [vmem:[#allocation93_spill] sm:$0xff] %v5453_v1 }
 0x3e5   :  { %v5455_v25 = vpop.f32.mrf.mxu1 }
 0x3e6   :  { %7136 = vst [vmem:[#allocation94_spill] sm:$0xff] %v5455_v25  ;;  %v1484_v17 = vpack.c.bf16 %v5455_v25, %v5453_v1 }
 0x3ed   :  { %1202 = vmatmul.bf16.gmra.mxu3 %v4261_v0  ;;  %v5460_v40 = vpop.f32.mrf.mxu1 }
 0x3ee   :  { %7137 = vst [vmem:[#allocation95_spill] sm:$0xff] %v5460_v40 }
 0x3f5   :  { %v5462_v39 = vpop.f32.mrf.mxu1 }
 0x3f6   :  { %7138 = vst [vmem:[#allocation96_spill] sm:$0xff] %v5462_v39  ;;  %v1485_v54 = vpack.c.bf16 %v5462_v39, %v5460_v40  ;;  %v4263_v39 = vld [vmem:[%s6772_s3 + $0x38] sm:$0xff] }
 0x3f8   :  { %1486 = vmatpush.bf16.msrb.mxu2 %v1485_v54  ;;  %v1481_v54 = vpack.c.bf16 %v5434_v4, %v5432_v62 }
 0x3fc   :  { %1487 = vmatpush.bf16.msrb.mxu2 %v1484_v17  ;;  %v1480_v17 = vpack.c.bf16 %v5427_v19, %v5425_v20  ;;  %v7139_v19 = vld [vmem:[#allocation47_spill] sm:$0xff] }
 0x3fd   :  { %1207 = vmatmul.bf16.gmra.mxu3 %v4262_v16 }
 0x400   :  { %1488 = vmatpush.bf16.msrb.mxu2 %v1483_v49  ;;  %v1479_v49 = vpack.c.bf16 %v5418_v37, %v5412_v2 }
 0x404   :  { %1489 = vmatpush.bf16.msrb.mxu2 %v1482_v31  ;;  %v1478_v31 = vpack.c.bf16 %v5404_v48, %v5396_v63 }
 0x408   :  { %1490 = vmatpush.bf16.msrb.mxu2 %v1481_v54 }
 0x40c   :  { %1491 = vmatpush.bf16.msrb.mxu2 %v1480_v17 }
 0x40d   :  { %1212 = vmatmul.bf16.gmra.mxu3 %v4263_v39 }
 0x410   :  { %1492 = vmatpush.bf16.msrb.mxu2 %v1479_v49 }
 0x414   :  { %1493 = vmatpush.bf16.msrb.mxu2 %v1478_v31 }
 0x417   :  { %1494 = vmatmul.bf16.vlgmr.msrb.gmra.mxu2 %v4256_v46 }
 0x420   :  { %v5486_v25 = vpop.f32.mrf.mxu3 }
 0x427   :  { %1499 = vmatmul.bf16.gmra.mxu2 %v4257_v41 }
 0x428   :  { %v1180_v54 = vpop.f32.mrf.mxu3 }
 0x430   :  { %v1183_v45 = vpop.f32.mrf.mxu3 }
 0x437   :  { %1504 = vmatmul.bf16.gmra.mxu2 %v4258_v32 }
 0x438   :  { %v1185_v17 = vpop.f32.mrf.mxu3 }
 0x440   :  { %v1188_v30 = vpop.f32.mrf.mxu3 }
 0x447   :  { %1509 = vmatmul.bf16.gmra.mxu2 %v4259_v60  ;;  %v7141_v60 = vld [vmem:[#allocation48_spill] sm:$0xff] }
 0x448   :  { %v1190_v40 = vpop.f32.mrf.mxu3 }
 0x450   :  { %v1193_v1 = vpop.f32.mrf.mxu3 }
 0x457   :  { %1514 = vmatmul.bf16.gmra.mxu2 %v4260_v42 }
 0x458   :  { %v1195_v6 = vpop.f32.mrf.mxu3 }
 0x460   :  { %v1198_v18 = vpop.f32.mrf.mxu3 }
 0x467   :  { %1519 = vmatmul.bf16.gmra.mxu2 %v4261_v0 }
 0x468   :  { %v1200_v49 = vpop.f32.mrf.mxu3 }
 0x470   :  { %v1203_v4 = vpop.f32.mrf.mxu3 }
 0x477   :  { %1524 = vmatmul.bf16.gmra.mxu2 %v4262_v16 }
 0x478   :  { %v1205_v31 = vpop.f32.mrf.mxu3 }
 0x479   :  { %v1206_v16 = vadd.f32 %v1205_v31, %v4954_v53 }
 0x47b   :  { %v1229_v63 = vmax.f32 %v1206_v16, 0.0 }
 0x480   :  { %v1208_v46 = vpop.f32.mrf.mxu3 }
 0x481   :  { %v1209_v42 = vadd.f32 %v1208_v46, %v4939_v56 }
 0x483   :  { %v1230_v21 = vmax.f32 %v1209_v42, 0.0 }
 0x487   :  { %1529 = vmatmul.bf16.gmra.mxu2 %v4263_v39  ;;  %v1204_v39 = vadd.f32 %v1203_v4, %v4945_v35 }
 0x488   :  { %v1210_v62 = vpop.f32.mrf.mxu3 }
 0x489   :  { %v1211_v37 = vadd.f32 %v1210_v62, %v7140_v55  ;;  %v1228_v52 = vmax.f32 %v1204_v39, 0.0  ;;  %v1179_v39 = vadd.f32 %v5486_v25, %v5007_v38 }
 0x48b   :  { %v1231_v36 = vmax.f32 %v1211_v37, 0.0  ;;  %v1239_v31 = vpack.c.bf16 %v1229_v63, %v1228_v52  ;;  %v1184_v63 = vadd.f32 %v1183_v45, %v4991_v24  ;;  %v5518_v45 = vld [vmem:[%s6774_s5] sm:$0xff] }
 0x48d   :  { %v1240_v62 = vpack.c.bf16 %v1231_v36, %v1230_v21  ;;  %v1189_v21 = vadd.f32 %v1188_v30, %v4977_v44  ;;  %v1220_v30 = vmax.f32 %v1184_v63, 0.0  ;;  %v5554_v63 = vld [vmem:[%s6774_s5 + $0x20] sm:$0xff] }
 0x48f   :  { %v1222_v52 = vmax.f32 %v1189_v21, 0.0 }
 0x490   :  { %v1213_v41 = vpop.f32.mrf.mxu3 }
 0x491   :  { %v1214_v20 = vadd.f32 %v1213_v41, %v7139_v19  ;;  %v1201_v41 = vadd.f32 %v1200_v49, %v4962_v23 }
 0x493   :  { %v1232_v0 = vmax.f32 %v1214_v20, 0.0  ;;  %v1227_v20 = vmax.f32 %v1201_v41, 0.0 }
 0x498   :  { %v1215_v32 = vpop.f32.mrf.mxu3 }
 0x499   :  { %v1216_v61 = vadd.f32 %v1215_v32, %v7141_v60  ;;  %v1199_v32 = vadd.f32 %v1198_v18, %v4956_v5  ;;  %v1186_v18 = vadd.f32 %v1185_v17, %v4999_v58  ;;  %v1218_v17 = vmax.f32 %v1179_v39, 0.0  ;;  %v7144_v39 = vld [vmem:[#allocation8_spill] sm:$0xff] }
 0x49a   :  { %v5491_v34 = vpop.f32.mrf.mxu2 }
 0x49b   :  { %v1233_v2 = vmax.f32 %v1216_v61, 0.0  ;;  %v1196_v61 = vadd.f32 %v1195_v6, %v4971_v59  ;;  %v1226_v37 = vmax.f32 %v1199_v32, 0.0 }
 0x49d   :  { %v1241_v48 = vpack.c.bf16 %v1233_v2, %v1232_v0  ;;  %v1194_v2 = vadd.f32 %v1193_v1, %v4973_v47  ;;  %v1225_v4 = vmax.f32 %v1196_v61, 0.0  ;;  %v1238_v49 = vpack.c.bf16 %v1227_v20, %v1226_v37  ;;  %v5528_v20 = vld [vmem:[%s6774_s5 + $0x8] sm:$0xff]  ;;  %v5538_v37 = vld [vmem:[%s6774_s5 + $0x10] sm:$0xff] }
 0x49e   :  { %v1181_v1 = vadd.f32 %v1180_v54, %v5005_v3  ;;  %v1221_v0 = vmax.f32 %v1186_v18, 0.0  ;;  %v1704_v18 = vperm.slane %v5145_v33, 4 }
 0x49f   :  { %1242 = vmatpush.bf16.msra.mxu0 %v1241_v48  ;;  %v1191_v48 = vadd.f32 %v1190_v40, %v4989_v51  ;;  %v1224_v36 = vmax.f32 %v1194_v2, 0.0 }
 0x4a0   :  { %v1219_v41 = vmax.f32 %v1181_v1, 0.0  ;;  %vm1719_vm0 = vcmp.eq.s32.totalorder %v4423_v7, %v1704_v18  ;;  %vm1720_vm1 = vcmp.eq.s32.totalorder %v4426_v8, %v1704_v18  ;;  %vm1717_vm3 = vcmp.eq.s32.totalorder %v4429_v9, %v1704_v18  ;;  %v5568_v1 = vld [vmem:[%s6774_s5 + $0x28] sm:$0xff] }
 0x4a1   :  { %v1223_v42 = vmax.f32 %v1191_v48, 0.0  ;;  %v1237_v6 = vpack.c.bf16 %v1225_v4, %v1224_v36  ;;  %vm3543_vm2 = vmpackc.low %vm1720_vm1, %vm1719_vm0  ;;  %vm1718_vm4 = vcmp.eq.s32.totalorder %v4432_v10, %v1704_v18  ;;  %vm1715_vm6 = vcmp.eq.s32.totalorder %v4435_v11, %v1704_v18 }
 0x4a2   :  { %v5497_v27 = vpop.f32.mrf.mxu2  ;;  %v1234_v32 = vpack.c.bf16 %v1219_v41, %v1218_v17  ;;  %vm3546_vm5 = vmpackc.low %vm1718_vm4, %vm1717_vm3  ;;  %vm1716_vm7 = vcmp.eq.s32.totalorder %v4438_v12, %v1704_v18  ;;  %vm1713_vm9 = vcmp.eq.s32.totalorder %v4457_v13, %v1704_v18  ;;  %vm1714_vm10 = vcmp.eq.s32.totalorder %v4460_v14, %v1704_v18 }
 0x4a3   :  { %1243 = vmatpush.bf16.msra.mxu0 %v1240_v62  ;;  %v1236_v40 = vpack.c.bf16 %v1223_v42, %v1222_v52  ;;  %v1235_v62 = vpack.c.bf16 %v1221_v0, %v1220_v30  ;;  %v1721_v42 = vperm.slane %v5151_v28, 4  ;;  %vm3549_vm8 = vmpackc.low %vm1716_vm7, %vm1715_vm6  ;;  %vm1711_vm12 = vcmp.eq.s32.totalorder %v4471_v15, %v1704_v18  ;;  %v7142_v52 = vld [vmem:[#allocation6_spill] sm:$0xff] }
 0x4a4   :  { %vm3552_vm11 = vmpackc.low %vm1714_vm10, %vm1713_vm9  ;;  %vm1712_vm13 = vcmp.eq.s32.totalorder %v7142_v52, %v1704_v18  ;;  %vm1710_vm0 = vcmp.eq.s32.totalorder %v7144_v39, %v1704_v18  ;;  %vm1708_vm3 = vcmp.eq.s32.totalorder %v7146_v57, %v1704_v18 }
 0x4a5   :  { %vm3555_vm14 = vmpackc.low %vm1712_vm13, %vm1711_vm12 }
 0x4a7   :  { %1244 = vmatpush.bf16.msra.mxu0 %v1239_v31 }
 0x4aa   :  { %v5503_v46 = vpop.f32.mrf.mxu2 }
 0x4ab   :  { %1245 = vmatpush.bf16.msra.mxu0 %v1238_v49  ;;  %v5544_v49 = vld [vmem:[%s6774_s5 + $0x18] sm:$0xff] }
 0x4af   :  { %1246 = vmatpush.bf16.msra.mxu0 %v1237_v6  ;;  %v3544_v6 = vpack.c.bf16 %v1721_v42, %v1721_v42 }
 0x4b2   :  { %v5509_v16 = vpop.f32.mrf.mxu2 }
 0x4b3   :  { %1247 = vmatpush.bf16.msra.mxu0 %v1236_v40  ;;  %v7143_v40 = vld [vmem:[#allocation7_spill] sm:$0xff] }
 0x4b4   :  { %vm1709_vm15 = vcmp.eq.s32.totalorder %v7143_v40, %v1704_v18 }
 0x4b5   :  { %vm3558_vm1 = vmpackc.low %vm1710_vm0, %vm1709_vm15 }
 0x4b7   :  { %1248 = vmatpush.bf16.msra.mxu0 %v1235_v62 }
 0x4ba   :  { %v5513_v61 = vpop.f32.mrf.mxu2 }
 0x4bb   :  { %1249 = vmatpush.bf16.msra.mxu0 %v1234_v32 }
 0x4be   :  { %1250 = vmatmul.bf16.vlgmr.msra.gmra.mxu0 %v5518_v45 }
 0x4bf   :  { %3545 = vmatpush.bf16.msk.msrb.mxu0 %vm3543_vm2, %v3544_v6  ;;  %vm1707_vm2 = vcmp.eq.s32.totalorder %v7145_v50, %v1704_v18 }
 0x4c0   :  { %vm3561_vm4 = vmpackc.low %vm1708_vm3, %vm1707_vm2 }
 0x4c2   :  { %v5521_v54 = vpop.f32.mrf.mxu2 }
 0x4c3   :  { %3548 = vmatpush.bf16.msk.msrb.mxu0 %vm3546_vm5, %v3544_v6 }
 0x4c7   :  { %3551 = vmatpush.bf16.msk.msrb.mxu0 %vm3549_vm8, %v3544_v6 }
 0x4ca   :  { %v5523_v25 = vpop.f32.mrf.mxu2 }
 0x4cb   :  { %3554 = vmatpush.bf16.msk.msrb.mxu0 %vm3552_vm11, %v3544_v6 }
 0x4ce   :  { %1255 = vmatmul.bf16.gmra.mxu0 %v5528_v20 }
 0x4cf   :  { %3557 = vmatpush.bf16.msk.msrb.mxu0 %vm3555_vm14, %v3544_v6 }
 0x4d2   :  { %v5531_v31 = vpop.f32.mrf.mxu2 }
 0x4d3   :  { %3560 = vmatpush.bf16.msk.msrb.mxu0 %vm3558_vm1, %v3544_v6 }
 0x4d7   :  { %3563 = vmatpush.bf16.msk.msrb.mxu0 %vm3561_vm4, %v3544_v6 }
 0x4da   :  { %v5533_v2 = vpop.f32.mrf.mxu2 }
 0x4de   :  { %1260 = vmatmul.bf16.gmra.mxu0 %v5538_v37 }
 0x4e2   :  { %v1517_v48 = vpop.f32.mrf.mxu2 }
 0x4ea   :  { %v1520_v4 = vpop.f32.mrf.mxu2 }
 0x4eb   :  { %v1521_v39 = vadd.f32 %v1520_v4, %v4945_v35  ;;  %v5589_v4 = vld [vmem:[%s6774_s5 + $0x30] sm:$0xff] }
 0x4ee   :  { %1265 = vmatmul.bf16.gmra.mxu0 %v5544_v49 }
 0x4f2   :  { %v1522_v21 = vpop.f32.mrf.mxu2 }
 0x4fa   :  { %v1525_v36 = vpop.f32.mrf.mxu2 }
 0x4fb   :  { %v1526_v17 = vadd.f32 %v1525_v36, %v4939_v56  ;;  %v1518_v36 = vadd.f32 %v1517_v48, %v4962_v23 }
 0x4fe   :  { %1270 = vmatmul.bf16.gmra.mxu0 %v5554_v63 }
 0x502   :  { %v1527_v33 = vpop.f32.mrf.mxu2 }
 0x503   :  { %v1528_v41 = vadd.f32 %v1527_v33, %v7140_v55  ;;  %v1547_v33 = vmax.f32 %v1526_v17, 0.0 }
 0x50a   :  { %v1530_v28 = vpop.f32.mrf.mxu2 }
 0x50b   :  { %v1531_v0 = vadd.f32 %v1530_v28, %v7139_v19  ;;  %v1523_v28 = vadd.f32 %v1522_v21, %v4954_v53  ;;  %v1548_v19 = vmax.f32 %v1528_v41, 0.0  ;;  %v1516_v21 = vadd.f32 %v5533_v2, %v4956_v5 }
 0x50c   :  { %v1545_v41 = vmax.f32 %v1521_v39, 0.0  ;;  %v1508_v2 = vadd.f32 %v5521_v54, %v4989_v51  ;;  %v1498_v54 = vadd.f32 %v5497_v27, %v5005_v3 }
 0x50d   :  { %v1549_v32 = vmax.f32 %v1531_v0, 0.0  ;;  %v1546_v0 = vmax.f32 %v1523_v28, 0.0 }
 0x50e   :  { %1275 = vmatmul.bf16.gmra.mxu0 %v5568_v1  ;;  %v1540_v28 = vmax.f32 %v1508_v2, 0.0 }
 0x50f   :  { %v1556_v48 = vpack.c.bf16 %v1546_v0, %v1545_v41 }
 0x512   :  { %v1532_v30 = vpop.f32.mrf.mxu2 }
 0x513   :  { %v1533_v62 = vadd.f32 %v1532_v30, %v7141_v60  ;;  %v7147_v30 = vld [vmem:[#allocation5_spill] sm:$0xff]  ;;  %v7148_v60 = vld [vmem:[#allocation11_spill] sm:$0xff] }
 0x514   :  { %vm1705_vm5 = vcmp.eq.s32.totalorder %v7147_v30, %v1704_v18  ;;  %vm1706_vm6 = vcmp.eq.s32.totalorder %v7148_v60, %v1704_v18  ;;  %v1544_v18 = vmax.f32 %v1518_v36, 0.0 }
 0x515   :  { %v1550_v42 = vmax.f32 %v1533_v62, 0.0  ;;  %vm3564_vm7 = vmpackc.low %vm1706_vm6, %vm1705_vm5  ;;  %v1557_v62 = vpack.c.bf16 %v1548_v19, %v1547_v33  ;;  %v1511_v19 = vadd.f32 %v5523_v25, %v4973_v47  ;;  %v1501_v25 = vadd.f32 %v5503_v46, %v4991_v24 }
 0x516   :  { %3566 = vmatpush.bf16.msk.msrb.mxu0 %vm3564_vm7, %v3544_v6  ;;  %v1543_v6 = vmax.f32 %v1516_v21, 0.0  ;;  %v1536_v46 = vmax.f32 %v1498_v54, 0.0 }
 0x517   :  { %v1558_v43 = vpack.c.bf16 %v1550_v42, %v1549_v32  ;;  %v1506_v32 = vadd.f32 %v5513_v61, %v4977_v44  ;;  %v1541_v42 = vmax.f32 %v1511_v19, 0.0  ;;  %v1496_v61 = vadd.f32 %v5491_v34, %v5007_v38  ;;  %v7149_v34 = vld [vmem:[#allocation67_spill] sm:$0xff] }
 0x518   :  { %v1555_v17 = vpack.c.bf16 %v1544_v18, %v1543_v6  ;;  %v1537_v21 = vmax.f32 %v1501_v25, 0.0  ;;  %v7150_v6 = vld [vmem:[#allocation71_spill] sm:$0xff]  ;;  %v7155_v25 = vld [vmem:[#allocation76_spill] sm:$0xff] }
 0x519   :  { %1559 = vmatpush.bf16.msrb.mxu3 %v1558_v43  ;;  %v1513_v43 = vadd.f32 %v5531_v31, %v4971_v59  ;;  %v1503_v31 = vadd.f32 %v5509_v16, %v4999_v58  ;;  %v1539_v36 = vmax.f32 %v1506_v32, 0.0  ;;  %v5611_v16 = vld [vmem:[%s6774_s5 + $0x38] sm:$0xff]  ;;  %v5641_v32 = vld [vmem:[%s6769_s0] sm:$0xff] }
 0x51b   :  { %v1542_v39 = vmax.f32 %v1513_v43, 0.0  ;;  %v1538_v0 = vmax.f32 %v1503_v31, 0.0  ;;  %v1535_v43 = vmax.f32 %v1496_v61, 0.0 }
 0x51d   :  { %1560 = vmatpush.bf16.msrb.mxu3 %v1557_v62  ;;  %v1554_v33 = vpack.c.bf16 %v1542_v39, %v1541_v42  ;;  %v1553_v62 = vpack.c.bf16 %v1540_v28, %v1539_v36  ;;  %v1552_v41 = vpack.c.bf16 %v1538_v0, %v1537_v21  ;;  %v1551_v18 = vpack.c.bf16 %v1536_v46, %v1535_v43  ;;  %v7153_v28 = vld [vmem:[#allocation38_spill] sm:$0xff]  ;;  %v7157_v0 = vld [vmem:[#allocation79_spill] sm:$0xff] }
 0x51e   :  { %1280 = vmatmul.bf16.gmra.mxu0 %v5589_v4 }
 0x521   :  { %1561 = vmatpush.bf16.msrb.mxu3 %v1556_v48 }
 0x525   :  { %1562 = vmatpush.bf16.msrb.mxu3 %v1555_v17 }
 0x529   :  { %1563 = vmatpush.bf16.msrb.mxu3 %v1554_v33 }
 0x52d   :  { %1564 = vmatpush.bf16.msrb.mxu3 %v1553_v62  ;;  %v7158_v62 = vld [vmem:[#allocation13_spill] sm:$0xff] }
 0x52e   :  { %1285 = vmatmul.bf16.gmra.mxu0 %v5611_v16 }
 0x531   :  { %1565 = vmatpush.bf16.msrb.mxu3 %v1552_v41 }
 0x535   :  { %1566 = vmatpush.bf16.msrb.mxu3 %v1551_v18  ;;  %v4274_v18 = vld [vmem:[%s6771_s2] sm:$0xff] }
 0x538   :  { %1567 = vmatmul.bf16.vlgmr.msrb.gmra.mxu3 %v5518_v45 }
 0x53b   :  { %v5615_v27 = vpop.f32.mrf.mxu0 }
 0x53c   :  { %v1252_v61 = vadd.f32 %v5615_v27, %v7158_v62 }
 0x53e   :  { %1754 = vmatmul.bf16.vlgmr.msrb.gmra.mxu0 %v7149_v34  ;;  %v1291_v46 = vsub.f32 0.0, %v1252_v61 }
 0x540   :  { %v1307_v41 = vmul.f32 1.442695, %v1291_v46 }
 0x542   :  { %3830 = vpow2.f32 %v1307_v41 }
 0x543   :  { %v5618_v48 = vpop.f32.mrf.mxu0 }
 0x548   :  { %1572 = vmatmul.bf16.gmra.mxu3 %v5528_v20 }
 0x54b   :  { %v5621_v19 = vpop.f32.mrf.mxu0 }
 0x54e   :  { %1759 = vmatmul.bf16.gmra.mxu0 %v7150_v6 }
 0x553   :  { %v5624_v2 = vpop.f32.mrf.mxu0 }
 0x558   :  { %1577 = vmatmul.bf16.gmra.mxu3 %v5538_v37  ;;  %v2021_v37 = vperm.slane %v5641_v32, 5 }
 0x55a   :  { %vm2036_vm8 = vcmp.eq.s32.totalorder %v4423_v7, %v2021_v37  ;;  %vm2037_vm9 = vcmp.eq.s32.totalorder %v4426_v8, %v2021_v37  ;;  %vm2034_vm11 = vcmp.eq.s32.totalorder %v4429_v9, %v2021_v37  ;;  %vm2035_vm12 = vcmp.eq.s32.totalorder %v4432_v10, %v2021_v37 }
 0x55b   :  { %v5627_v39 = vpop.f32.mrf.mxu0  ;;  %vm3567_vm10 = vmpackc.low %vm2037_vm9, %vm2036_vm8  ;;  %vm2032_vm14 = vcmp.eq.s32.totalorder %v4435_v11, %v2021_v37  ;;  %vm2033_vm15 = vcmp.eq.s32.totalorder %v4438_v12, %v2021_v37  ;;  %vm2030_vm1 = vcmp.eq.s32.totalorder %v4457_v13, %v2021_v37  ;;  %vm2031_vm2 = vcmp.eq.s32.totalorder %v4460_v14, %v2021_v37 }
 0x55c   :  { %vm3570_vm13 = vmpackc.low %vm2035_vm12, %vm2034_vm11  ;;  %vm2028_vm4 = vcmp.eq.s32.totalorder %v4471_v15, %v2021_v37  ;;  %vm2029_vm5 = vcmp.eq.s32.totalorder %v7142_v52, %v2021_v37  ;;  %vm2026_vm7 = vcmp.eq.s32.totalorder %v7143_v40, %v2021_v37  ;;  %vm2025_vm11 = vcmp.eq.s32.totalorder %v7146_v57, %v2021_v37 }
 0x55d   :  { %vm3573_vm0 = vmpackc.low %vm2033_vm15, %vm2032_vm14  ;;  %vm2023_vm14 = vcmp.eq.s32.totalorder %v7148_v60, %v2021_v37  ;;  %v7169_v60 = vld [vmem:[#allocation82_spill] sm:$0xff] }
 0x55e   :  { %1764 = vmatmul.bf16.gmra.mxu0 %v5274_v26  ;;  %v5647_v26 = vld [vmem:[%s6770_s1] sm:$0xff]  ;;  %vm3576_vm3 = vmpackc.low %vm2031_vm2, %vm2030_vm1 }
 0x55f   :  { %vm3579_vm6 = vmpackc.low %vm2029_vm5, %vm2028_vm4 }
 0x563   :  { %v5630_v45 = vpop.f32.mrf.mxu0 }
 0x568   :  { %1582 = vmatmul.bf16.gmra.mxu3 %v5544_v49  ;;  %v2038_v49 = vperm.slane %v5647_v26, 5 }
 0x56b   :  { %v5633_v17 = vpop.f32.mrf.mxu0 }
 0x56e   :  { %1769 = vmatmul.bf16.gmra.mxu0 %v5298_v29  ;;  %v3568_v29 = vpack.c.bf16 %v2038_v49, %v2038_v49 }
 0x570   :  { %3569 = vmatpush.bf16.msk.msra.mxu3 %vm3567_vm10, %v3568_v29  ;;  %vm2024_vm10 = vcmp.eq.s32.totalorder %v7145_v50, %v2021_v37 }
 0x571   :  { %vm3585_vm12 = vmpackc.low %vm2025_vm11, %vm2024_vm10 }
 0x573   :  { %v5636_v20 = vpop.f32.mrf.mxu0 }
 0x574   :  { %3572 = vmatpush.bf16.msk.msra.mxu3 %vm3570_vm13, %v3568_v29  ;;  %vm2022_vm13 = vcmp.eq.s32.totalorder %v7147_v30, %v2021_v37 }
 0x575   :  { %vm3588_vm15 = vmpackc.low %vm2023_vm14, %vm2022_vm13 }
 0x578   :  { %1587 = vmatmul.bf16.gmra.mxu3 %v5554_v63  ;;  %v7152_v63 = vld [vmem:[#allocation8_spill] sm:$0xff] }
 0x579   :  { %3575 = vmatpush.bf16.msk.msra.mxu3 %vm3573_vm0, %v3568_v29  ;;  %vm2027_vm8 = vcmp.eq.s32.totalorder %v7152_v63, %v2021_v37 }
 0x57a   :  { %vm3582_vm9 = vmpackc.low %vm2027_vm8, %vm2026_vm7 }
 0x57b   :  { %v5653_v42 = vpop.f32.mrf.mxu0 }
 0x57d   :  { %3578 = vmatpush.bf16.msk.msra.mxu3 %vm3576_vm3, %v3568_v29 }
 0x57e   :  { %1774 = vmatmul.bf16.gmra.mxu0 %v5320_v22 }
 0x581   :  { %3581 = vmatpush.bf16.msk.msra.mxu3 %vm3579_vm6, %v3568_v29 }
 0x583   :  { %v5660_v31 = vpop.f32.mrf.mxu0 }
 0x584   :  { %7151 = vst [vmem:[#allocation49_spill] sm:$0xff] %v5660_v31  ;;  %v7167_v31 = vld [vmem:[#allocation66_spill] sm:$0xff] }
 0x585   :  { %3584 = vmatpush.bf16.msk.msra.mxu3 %vm3582_vm9, %v3568_v29 }
 0x588   :  { %1592 = vmatmul.bf16.gmra.mxu3 %v5568_v1 }
 0x589   :  { %3587 = vmatpush.bf16.msk.msra.mxu3 %vm3585_vm12, %v3568_v29 }
 0x58b   :  { %v5667_v22 = vpop.f32.mrf.mxu0 }
 0x58d   :  { %3590 = vmatpush.bf16.msk.msra.mxu3 %vm3588_vm15, %v3568_v29  ;;  %v7162_v29 = vld [vmem:[#allocation62_spill] sm:$0xff] }
 0x58e   :  { %1779 = vmatmul.bf16.gmra.mxu0 %v7153_v28  ;;  %v1257_v28 = vadd.f32 %v5621_v19, %v7162_v29  ;;  %v5710_v19 = vld [vmem:[%s6771_s2 + $0x8] sm:$0xff] }
 0x58f   :  { %7165 = vst [vmem:[#allocation38_spill] sm:$0xff] %v5710_v19 }
 0x590   :  { %v1293_v46 = vsub.f32 0.0, %v1257_v28 }
 0x593   :  { %v5674_v33 = vpop.f32.mrf.mxu0 }
 0x594   :  { %7154 = vst [vmem:[#allocation6_spill] sm:$0xff] %v5674_v33 }
 0x598   :  { %1597 = vmatmul.bf16.gmra.mxu3 %v5589_v4  ;;  %v7160_v4 = vld [vmem:[#allocation64_spill] sm:$0xff] }
 0x599   :  { %v1254_v43 = vadd.f32 %v5618_v48, %v7160_v4 }
 0x59b   :  { %v5679_v1 = vpop.f32.mrf.mxu0  ;;  %v1292_v6 = vsub.f32 0.0, %v1254_v43 }
 0x59d   :  { %v1309_v49 = vmul.f32 1.442695, %v1292_v6 }
 0x59e   :  { %1784 = vmatmul.bf16.gmra.mxu0 %v7155_v25 }
 0x5a3   :  { %v5682_v36 = vpop.f32.mrf.mxu0 }
 0x5a4   :  { %7156 = vst [vmem:[#allocation7_spill] sm:$0xff] %v5682_v36  ;;  %v1311_v36 = vmul.f32 1.442695, %v1293_v46 }
 0x5a8   :  { %1602 = vmatmul.bf16.gmra.mxu3 %v5611_v16 }
 0x5ab   :  { %v5685_v54 = vpop.f32.mrf.mxu0 }
 0x5ae   :  { %1789 = vmatmul.bf16.gmra.mxu0 %v7157_v0  ;;  %v3831_v0 = vpop.eup %3830 }
 0x5b3   :  { %v5690_v21 = vpop.f32.mrf.mxu0 }
 0x5b4   :  { %7159 = vst [vmem:[#allocation67_spill] sm:$0xff] %v5690_v21  ;;  %v1339_v21 = vadd.f32 1.0, %v3831_v0 }
 0x5b8   :  { %2071 = vmatmul.bf16.vlgmr.msra.gmra.mxu3 %v4274_v18 }
 0x5bb   :  { %v1568_v16 = vpop.f32.mrf.mxu3  ;;  %v5697_v34 = vpop.f32.mrf.mxu0 }
 0x5bc   :  { %7161 = vst [vmem:[#allocation71_spill] sm:$0xff] %v5697_v34  ;;  %v1569_v37 = vadd.f32 %v1568_v16, %v7158_v62  ;;  %v7164_v16 = vld [vmem:[#allocation69_spill] sm:$0xff]  ;;  %v7168_v62 = vld [vmem:[#allocation68_spill] sm:$0xff] }
 0x5bd   :  { %v1259_v6 = vadd.f32 %v5624_v2, %v7164_v16 }
 0x5be   :  { %v1608_v27 = vsub.f32 0.0, %v1569_v37 }
 0x5bf   :  { %v1294_v0 = vsub.f32 0.0, %v1259_v6 }
 0x5c0   :  { %v1624_v25 = vmul.f32 1.442695, %v1608_v27 }
 0x5c1   :  { %v1313_v33 = vmul.f32 1.442695, %v1294_v0 }
 0x5c2   :  { %3832 = vpow2.f32 %v1624_v25 }
 0x5c3   :  { %v1570_v48 = vpop.f32.mrf.mxu3  ;;  %v5702_v61 = vpop.f32.mrf.mxu0  ;;  %3834 = vpow2.f32 %v1309_v49 }
 0x5c4   :  { %7163 = vst [vmem:[#allocation8_spill] sm:$0xff] %v5702_v61  ;;  %v1571_v18 = vadd.f32 %v1570_v48, %v7160_v4  ;;  %3836 = vrcp.f32 %v1339_v21  ;;  %v1262_v4 = vadd.f32 %v5627_v39, %v7167_v31 }
 0x5c6   :  { %v1609_v41 = vsub.f32 0.0, %v1571_v18 }
 0x5c8   :  { %v3833_v43 = vpop.eup %3832  ;;  %v1626_v37 = vmul.f32 1.442695, %v1609_v41  ;;  %2076 = vmatmul.bf16.gmra.mxu3 %v5710_v19 }
 0x5c9   :  { %v1656_v27 = vadd.f32 1.0, %v3833_v43  ;;  %v3835_v49 = vpop.eup %3834 }
 0x5ca   :  { %3838 = vpow2.f32 %v1626_v37  ;;  %v1340_v48 = vadd.f32 1.0, %v3835_v49  ;;  %v3837_v18 = vpop.eup %3836 }
 0x5cb   :  { %3840 = vrcp.f32 %v1656_v27  ;;  %v1573_v28 = vpop.f32.mrf.mxu3  ;;  %v5713_v25 = vpop.f32.mrf.mxu0  ;;  %v1371_v19 = vmul.f32 %v3837_v18, %v7168_v62  ;;  %v7173_v18 = vld [vmem:[#allocation59_spill] sm:$0xff] }
 0x5cc   :  { %7166 = vst [vmem:[#allocation76_spill] sm:$0xff] %v5713_v25  ;;  %3842 = vpow2.f32 %v1311_v36  ;;  %v1574_v2 = vadd.f32 %v1573_v28, %v7162_v29  ;;  %v1295_v28 = vsub.f32 0.0, %v1262_v4  ;;  %v7171_v29 = vld [vmem:[#allocation20_spill] sm:$0xff] }
 0x5cd   :  { %3844 = vrcp.f32 %v1340_v48 }
 0x5ce   :  { %v1610_v46 = vsub.f32 0.0, %v1574_v2  ;;  %v1315_v62 = vmul.f32 1.442695, %v1295_v28 }
 0x5d0   :  { %v3839_v41 = vpop.eup %3838  ;;  %v1628_v21 = vmul.f32 1.442695, %v1610_v46 }
 0x5d1   :  { %v3841_v43 = vpop.eup %3840  ;;  %v1657_v37 = vadd.f32 1.0, %v3839_v41 }
 0x5d2   :  { %v3843_v27 = vpop.eup %3842  ;;  %v1688_v36 = vmul.f32 %v3841_v43, %v7169_v60  ;;  %3846 = vpow2.f32 %v1628_v21  ;;  %v1264_v60 = vadd.f32 %v5630_v45, %v7173_v18 }
 0x5d3   :  { %3848 = vrcp.f32 %v1657_v37  ;;  %v1575_v6 = vpop.f32.mrf.mxu3  ;;  %v5720_v49 = vpop.f32.mrf.mxu0  ;;  %v1341_v39 = vadd.f32 1.0, %v3843_v27  ;;  %v7176_v27 = vld [vmem:[#allocation21_spill] sm:$0xff] }
 0x5d4   :  { %7170 = vst [vmem:[#allocation79_spill] sm:$0xff] %v5720_v49  ;;  %3850 = vpow2.f32 %v1313_v33  ;;  %v1576_v0 = vadd.f32 %v1575_v6, %v7164_v16  ;;  %v2988_v2 = vadd.f32 %v1688_v36, %v1371_v19  ;;  %v3845_v41 = vpop.eup %3844  ;;  %v5731_v33 = vld [vmem:[%s6771_s2 + $0x10] sm:$0xff]  ;;  %v1296_v28 = vsub.f32 0.0, %v1264_v60  ;;  %v7178_v16 = vld [vmem:[#allocation25_spill] sm:$0xff]  ;;  %v7181_v60 = vld [vmem:[#allocation72_spill] sm:$0xff] }
 0x5d5   :  { %7174 = vst [vmem:[#allocation82_spill] sm:$0xff] %v5731_v33  ;;  %3852 = vrcp.f32 %v1341_v39 }
 0x5d6   :  { %v1611_v46 = vsub.f32 0.0, %v1576_v0  ;;  %v5724_v48 = vadd.f32 %v2988_v2, %v7171_v29  ;;  %v7175_v29 = vld [vmem:[#allocation70_spill] sm:$0xff] }
 0x5d7   :  { %v1372_v37 = vmul.f32 %v3845_v41, %v7175_v29  ;;  %v7180_v41 = vld [vmem:[#allocation57_spill] sm:$0xff] }
 0x5d8   :  { %7172 = vst [vmem:[#allocation68_spill] sm:$0xff] %v5724_v48  ;;  %v3847_v30 = vpop.eup %3846  ;;  %v1630_v21 = vmul.f32 1.442695, %v1611_v46  ;;  %2081 = vmatmul.bf16.gmra.mxu3 %v5731_v33  ;;  %v1317_v33 = vmul.f32 1.442695, %v1296_v28 }
 0x5d9   :  { %v3849_v4 = vpop.eup %3848  ;;  %v1658_v19 = vadd.f32 1.0, %v3847_v30 }
 0x5da   :  { %v3851_v43 = vpop.eup %3850  ;;  %3854 = vpow2.f32 %v1630_v21  ;;  %v1689_v36 = vmul.f32 %v3849_v4, %v7176_v27  ;;  %v1267_v4 = vadd.f32 %v5633_v17, %v7180_v41 }
 0x5db   :  { %3856 = vrcp.f32 %v1658_v19  ;;  %v1578_v6 = vpop.f32.mrf.mxu3  ;;  %v5736_v45 = vpop.f32.mrf.mxu0  ;;  %v1342_v46 = vadd.f32 1.0, %v3851_v43 }
 0x5dc   :  { %7177 = vst [vmem:[#allocation20_spill] sm:$0xff] %v5736_v45  ;;  %3858 = vpow2.f32 %v1315_v62  ;;  %v1579_v0 = vadd.f32 %v1578_v6, %v7167_v31  ;;  %v2989_v2 = vadd.f32 %v1689_v36, %v1372_v37  ;;  %v3853_v30 = vpop.eup %3852  ;;  %v7182_v6 = vld [vmem:[#allocation83_spill] sm:$0xff]  ;;  %v1297_v36 = vsub.f32 0.0, %v1267_v4 }
 0x5dd   :  { %3860 = vrcp.f32 %v1342_v46  ;;  %v1373_v57 = vmul.f32 %v3853_v30, %v7181_v60  ;;  %v7186_v60 = vld [vmem:[#allocation58_spill] sm:$0xff] }
 0x5de   :  { %v1612_v48 = vsub.f32 0.0, %v1579_v0  ;;  %v5740_v39 = vadd.f32 %v2989_v2, %v7178_v16  ;;  %v7184_v2 = vld [vmem:[#allocation29_spill] sm:$0xff]  ;;  %v1319_v30 = vmul.f32 1.442695, %v1297_v36 }
 0x5e0   :  { %7179 = vst [vmem:[#allocation70_spill] sm:$0xff] %v5740_v39  ;;  %v3855_v21 = vpop.eup %3854  ;;  %v1632_v19 = vmul.f32 1.442695, %v1612_v48 }
 0x5e1   :  { %v3857_v29 = vpop.eup %3856  ;;  %v1659_v27 = vadd.f32 1.0, %v3855_v21 }
 0x5e2   :  { %v3859_v62 = vpop.eup %3858  ;;  %v1690_v37 = vmul.f32 %v3857_v29, %v7182_v6  ;;  %3862 = vpow2.f32 %v1632_v19  ;;  %v1269_v19 = vadd.f32 %v5636_v20, %v7186_v60 }
 0x5e3   :  { %3864 = vrcp.f32 %v1659_v27  ;;  %v1580_v43 = vpop.f32.mrf.mxu3  ;;  %v5746_v16 = vpop.f32.mrf.mxu0  ;;  %v1343_v17 = vadd.f32 1.0, %v3859_v62  ;;  %v7188_v62 = vld [vmem:[#allocation28_spill] sm:$0xff] }
 0x5e4   :  { %7183 = vst [vmem:[#allocation21_spill] sm:$0xff] %v5746_v16  ;;  %3866 = vpow2.f32 %v1317_v33  ;;  %v1581_v28 = vadd.f32 %v1580_v43, %v7173_v18  ;;  %v2990_v0 = vadd.f32 %v1690_v37, %v1373_v57  ;;  %v3861_v21 = vpop.eup %3860  ;;  %v5757_v33 = vld [vmem:[%s6771_s2 + $0x18] sm:$0xff] }
 0x5e5   :  { %7187 = vst [vmem:[#allocation72_spill] sm:$0xff] %v5757_v33  ;;  %3868 = vrcp.f32 %v1343_v17  ;;  %v1374_v6 = vmul.f32 %v3861_v21, %v7188_v62  ;;  %v7189_v37 = vld [vmem:[#allocation84_spill] sm:$0xff]  ;;  %v7193_v21 = vld [vmem:[#allocation55_spill] sm:$0xff] }
 0x5e6   :  { %v1613_v48 = vsub.f32 0.0, %v1581_v28  ;;  %v5750_v46 = vadd.f32 %v2990_v0, %v7184_v2  ;;  %v1298_v28 = vsub.f32 0.0, %v1269_v19  ;;  %v7191_v18 = vld [vmem:[#allocation32_spill] sm:$0xff]  ;;  %v7194_v19 = vld [vmem:[#allocation31_spill] sm:$0xff] }
 0x5e8   :  { %7185 = vst [vmem:[#allocation25_spill] sm:$0xff] %v5750_v46  ;;  %v3863_v39 = vpop.eup %3862  ;;  %v1634_v29 = vmul.f32 1.442695, %v1613_v48  ;;  %2086 = vmatmul.bf16.gmra.mxu3 %v5757_v33  ;;  %v1321_v31 = vmul.f32 1.442695, %v1298_v28 }
 0x5e9   :  { %v3865_v57 = vpop.eup %3864  ;;  %v1660_v4 = vadd.f32 1.0, %v3863_v39 }
 0x5ea   :  { %v3867_v27 = vpop.eup %3866  ;;  %3870 = vpow2.f32 %v1634_v29  ;;  %v1691_v43 = vmul.f32 %v3865_v57, %v7189_v37  ;;  %v1272_v57 = vadd.f32 %v5653_v42, %v7193_v21 }
 0x5eb   :  { %3872 = vrcp.f32 %v1660_v4  ;;  %v1583_v36 = vpop.f32.mrf.mxu3  ;;  %v5762_v20 = vpop.f32.mrf.mxu0  ;;  %v1344_v2 = vadd.f32 1.0, %v3867_v27 }
 0x5ec   :  { %7190 = vst [vmem:[#allocation83_spill] sm:$0xff] %v5762_v20  ;;  %3874 = vpow2.f32 %v1319_v30  ;;  %v1584_v0 = vadd.f32 %v1583_v36, %v7180_v41  ;;  %v2991_v48 = vadd.f32 %v1691_v43, %v1374_v6  ;;  %v3869_v39 = vpop.eup %3868  ;;  %v7195_v36 = vld [vmem:[#allocation85_spill] sm:$0xff]  ;;  %v1299_v43 = vsub.f32 0.0, %v1272_v57  ;;  %v7206_v41 = vld [vmem:[#allocation87_spill] sm:$0xff] }
 0x5ed   :  { %3876 = vrcp.f32 %v1344_v2  ;;  %v1375_v33 = vmul.f32 %v3869_v39, %v7194_v19 }
 0x5ee   :  { %v1614_v46 = vsub.f32 0.0, %v1584_v0  ;;  %v5766_v17 = vadd.f32 %v2991_v48, %v7191_v18  ;;  %v7197_v48 = vld [vmem:[#allocation17_spill] sm:$0xff]  ;;  %v1323_v39 = vmul.f32 1.442695, %v1299_v43 }
 0x5f0   :  { %7192 = vst [vmem:[#allocation29_spill] sm:$0xff] %v5766_v17  ;;  %v3871_v29 = vpop.eup %3870  ;;  %v1636_v4 = vmul.f32 1.442695, %v1614_v46 }
 0x5f1   :  { %v3873_v62 = vpop.eup %3872  ;;  %v1661_v37 = vadd.f32 1.0, %v3871_v29 }
 0x5f2   :  { %v3875_v30 = vpop.eup %3874  ;;  %v1692_v6 = vmul.f32 %v3873_v62, %v7195_v36  ;;  %3878 = vpow2.f32 %v1636_v4  ;;  %v5781_v4 = vld [vmem:[%s6771_s2 + $0x20] sm:$0xff] }
 0x5f3   :  { %3880 = vrcp.f32 %v1661_v37  ;;  %v1585_v27 = vpop.f32.mrf.mxu3  ;;  %v5772_v18 = vpop.f32.mrf.mxu0  ;;  %v1345_v42 = vadd.f32 1.0, %v3875_v30  ;;  %v7199_v62 = vld [vmem:[#allocation33_spill] sm:$0xff]  ;;  %v7200_v30 = vld [vmem:[#allocation86_spill] sm:$0xff] }
 0x5f4   :  { %7196 = vst [vmem:[#allocation28_spill] sm:$0xff] %v5772_v18  ;;  %3882 = vpow2.f32 %v1321_v31  ;;  %v1586_v28 = vadd.f32 %v1585_v27, %v7186_v60  ;;  %v2992_v0 = vadd.f32 %v1692_v6, %v1375_v33  ;;  %v3877_v29 = vpop.eup %3876  ;;  %v7205_v60 = vld [vmem:[#allocation34_spill] sm:$0xff] }
 0x5f5   :  { %3884 = vrcp.f32 %v1345_v42  ;;  %v1376_v37 = vmul.f32 %v3877_v29, %v7199_v62 }
 0x5f6   :  { %v1615_v46 = vsub.f32 0.0, %v1586_v28  ;;  %v5776_v2 = vadd.f32 %v2992_v0, %v7197_v48  ;;  %v7202_v48 = vld [vmem:[#allocation22_spill] sm:$0xff] }
 0x5f8   :  { %7198 = vst [vmem:[#allocation84_spill] sm:$0xff] %v5776_v2  ;;  %v3879_v17 = vpop.eup %3878  ;;  %v1638_v19 = vmul.f32 1.442695, %v1615_v46  ;;  %2091 = vmatmul.bf16.gmra.mxu3 %v5781_v4 }
 0x5f9   :  { %v3881_v31 = vpop.eup %3880  ;;  %v1662_v57 = vadd.f32 1.0, %v3879_v17 }
 0x5fa   :  { %v3883_v33 = vpop.eup %3882  ;;  %3886 = vpow2.f32 %v1638_v19  ;;  %v1693_v36 = vmul.f32 %v3881_v31, %v7200_v30  ;;  %v7204_v19 = vld [vmem:[#allocation60_spill] sm:$0xff] }
 0x5fb   :  { %3888 = vrcp.f32 %v1662_v57  ;;  %v1588_v6 = vpop.f32.mrf.mxu3  ;;  %v5786_v27 = vpop.f32.mrf.mxu0  ;;  %v1346_v0 = vadd.f32 1.0, %v3883_v33  ;;  %v1277_v29 = vadd.f32 %v5667_v22, %v7204_v19 }
 0x5fc   :  { %7201 = vst [vmem:[#allocation32_spill] sm:$0xff] %v5786_v27  ;;  %3890 = vpow2.f32 %v1323_v39  ;;  %v1589_v43 = vadd.f32 %v1588_v6, %v7193_v21  ;;  %v2993_v28 = vadd.f32 %v1693_v36, %v1376_v37  ;;  %v3885_v17 = vpop.eup %3884 }
 0x5fd   :  { %3892 = vrcp.f32 %v1346_v0  ;;  %v1377_v39 = vmul.f32 %v3885_v17, %v7205_v60  ;;  %v1301_v36 = vsub.f32 0.0, %v1277_v29  ;;  %v5806_v60 = vld [vmem:[%s6771_s2 + $0x28] sm:$0xff] }
 0x5fe   :  { %v1616_v46 = vsub.f32 0.0, %v1589_v43  ;;  %v5790_v2 = vadd.f32 %v2993_v28, %v7202_v48  ;;  %v7209_v48 = vld [vmem:[#allocation37_spill] sm:$0xff] }
 0x600   :  { %7203 = vst [vmem:[#allocation31_spill] sm:$0xff] %v5790_v2  ;;  %v3887_v42 = vpop.eup %3886  ;;  %v1640_v62 = vmul.f32 1.442695, %v1616_v46 }
 0x601   :  { %v3889_v31 = vpop.eup %3888  ;;  %v1663_v57 = vadd.f32 1.0, %v3887_v42  ;;  %v1327_v42 = vmul.f32 1.442695, %v1301_v36 }
 0x602   :  { %v3891_v30 = vpop.eup %3890  ;;  %v1694_v6 = vmul.f32 %v3889_v31, %v7206_v41  ;;  %3894 = vpow2.f32 %v1640_v62  ;;  %v7211_v62 = vld [vmem:[#allocation35_spill] sm:$0xff]  ;;  %v7212_v31 = vld [vmem:[#allocation88_spill] sm:$0xff] }
 0x603   :  { %3896 = vrcp.f32 %v1663_v57  ;;  %v5796_v33 = vpop.f32.mrf.mxu3  ;;  %v5798_v37 = vpop.f32.mrf.mxu0  ;;  %v1347_v28 = vadd.f32 1.0, %v3891_v30 }
 0x604   :  { %7207 = vst [vmem:[#allocation85_spill] sm:$0xff] %v5796_v33  ;;  %v2994_v43 = vadd.f32 %v1694_v6, %v1377_v39  ;;  %v3893_v46 = vpop.eup %3892  ;;  %v7216_v33 = vld [vmem:[#allocation52_spill] sm:$0xff] }
 0x605   :  { %7208 = vst [vmem:[#allocation17_spill] sm:$0xff] %v5798_v37  ;;  %3898 = vrcp.f32 %v1347_v28  ;;  %v1378_v29 = vmul.f32 %v3893_v46, %v7211_v62  ;;  %v1282_v28 = vadd.f32 %v5679_v1, %v7216_v33 }
 0x606   :  { %v5801_v22 = vadd.f32 %v2994_v43, %v7209_v48  ;;  %v7214_v48 = vld [vmem:[#allocation30_spill] sm:$0xff] }
 0x608   :  { %7210 = vst [vmem:[#allocation33_spill] sm:$0xff] %v5801_v22  ;;  %v3895_v0 = vpop.eup %3894  ;;  %2096 = vmatmul.bf16.gmra.mxu3 %v5806_v60 }
 0x609   :  { %v3897_v41 = vpop.eup %3896  ;;  %v1664_v17 = vadd.f32 1.0, %v3895_v0 }
 0x60a   :  { %v1695_v57 = vmul.f32 %v3897_v41, %v7212_v31  ;;  %v7217_v41 = vld [vmem:[#allocation36_spill] sm:$0xff]  ;;  %v7218_v31 = vld [vmem:[#allocation89_spill] sm:$0xff] }
 0x60b   :  { %3900 = vrcp.f32 %v1664_v17  ;;  %v1593_v30 = vpop.f32.mrf.mxu3  ;;  %v5811_v39 = vpop.f32.mrf.mxu0 }
 0x60c   :  { %7213 = vst [vmem:[#allocation86_spill] sm:$0xff] %v5811_v39  ;;  %3902 = vpow2.f32 %v1327_v42  ;;  %v1594_v6 = vadd.f32 %v1593_v30, %v7204_v19  ;;  %v2995_v36 = vadd.f32 %v1695_v57, %v1378_v29  ;;  %v3899_v2 = vpop.eup %3898  ;;  %v1303_v29 = vsub.f32 0.0, %v1282_v28 }
 0x60d   :  { %v1379_v17 = vmul.f32 %v3899_v2, %v7217_v41  ;;  %v7225_v41 = vld [vmem:[#allocation51_spill] sm:$0xff] }
 0x60e   :  { %v1618_v43 = vsub.f32 0.0, %v1594_v6  ;;  %v5815_v22 = vadd.f32 %v2995_v36, %v7214_v48  ;;  %v7221_v36 = vld [vmem:[#allocation39_spill] sm:$0xff]  ;;  %v1331_v1 = vmul.f32 1.442695, %v1303_v29 }
 0x610   :  { %7215 = vst [vmem:[#allocation22_spill] sm:$0xff] %v5815_v22  ;;  %v1644_v0 = vmul.f32 1.442695, %v1618_v43  ;;  %v5831_v43 = vld [vmem:[%s6771_s2 + $0x30] sm:$0xff] }
 0x611   :  { %v3901_v46 = vpop.eup %3900  ;;  %7223 = vst [vmem:[#allocation35_spill] sm:$0xff] %v5831_v43 }
 0x612   :  { %v3903_v62 = vpop.eup %3902  ;;  %v1696_v21 = vmul.f32 %v3901_v46, %v7218_v31  ;;  %3904 = vpow2.f32 %v1644_v0 }
 0x613   :  { %v5821_v42 = vpop.f32.mrf.mxu3  ;;  %v5823_v30 = vpop.f32.mrf.mxu0  ;;  %v1349_v6 = vadd.f32 1.0, %v3903_v62 }
 0x614   :  { %7219 = vst [vmem:[#allocation34_spill] sm:$0xff] %v5821_v42  ;;  %v2996_v57 = vadd.f32 %v1696_v21, %v1379_v17  ;;  %v1287_v17 = vadd.f32 %v5685_v54, %v7225_v41  ;;  %v7227_v42 = vld [vmem:[#allocation91_spill] sm:$0xff] }
 0x615   :  { %7220 = vst [vmem:[#allocation87_spill] sm:$0xff] %v5823_v30  ;;  %3906 = vrcp.f32 %v1349_v6 }
 0x616   :  { %v5826_v48 = vadd.f32 %v2996_v57, %v7221_v36  ;;  %v7226_v36 = vld [vmem:[#allocation74_spill] sm:$0xff] }
 0x618   :  { %7222 = vst [vmem:[#allocation37_spill] sm:$0xff] %v5826_v48  ;;  %v3905_v22 = vpop.eup %3904  ;;  %2101 = vmatmul.bf16.gmra.mxu3 %v5831_v43 }
 0x619   :  { %v1666_v2 = vadd.f32 1.0, %v3905_v22 }
 0x61b   :  { %3908 = vrcp.f32 %v1666_v2  ;;  %v1598_v0 = vpop.f32.mrf.mxu3  ;;  %v5834_v46 = vpop.f32.mrf.mxu0 }
 0x61c   :  { %7224 = vst [vmem:[#allocation88_spill] sm:$0xff] %v5834_v46  ;;  %3910 = vpow2.f32 %v1331_v1  ;;  %v1599_v21 = vadd.f32 %v1598_v0, %v7216_v33  ;;  %v3907_v62 = vpop.eup %3906  ;;  %v1305_v1 = vsub.f32 0.0, %v1287_v17 }
 0x61d   :  { %v1381_v48 = vmul.f32 %v3907_v62, %v7226_v36 }
 0x61e   :  { %v1620_v28 = vsub.f32 0.0, %v1599_v21  ;;  %v7230_v21 = vld [vmem:[#allocation41_spill] sm:$0xff]  ;;  %v1335_v54 = vmul.f32 1.442695, %v1305_v1 }
 0x620   :  { %v1648_v31 = vmul.f32 1.442695, %v1620_v28  ;;  %v5851_v28 = vld [vmem:[%s6771_s2 + $0x38] sm:$0xff] }
 0x621   :  { %v3909_v29 = vpop.eup %3908  ;;  %7232 = vst [vmem:[#allocation39_spill] sm:$0xff] %v5851_v28 }
 0x622   :  { %v3911_v57 = vpop.eup %3910  ;;  %v1698_v6 = vmul.f32 %v3909_v29, %v7227_v42  ;;  %3912 = vpow2.f32 %v1648_v31 }
 0x623   :  { %v5841_v22 = vpop.f32.mrf.mxu3  ;;  %v5843_v2 = vpop.f32.mrf.mxu0  ;;  %v1351_v0 = vadd.f32 1.0, %v3911_v57 }
 0x624   :  { %7228 = vst [vmem:[#allocation30_spill] sm:$0xff] %v5841_v22  ;;  %v2998_v19 = vadd.f32 %v1698_v6, %v1381_v48  ;;  %v7234_v6 = vld [vmem:[#allocation77_spill] sm:$0xff] }
 0x625   :  { %7229 = vst [vmem:[#allocation36_spill] sm:$0xff] %v5843_v2  ;;  %3914 = vrcp.f32 %v1351_v0 }
 0x626   :  { %v5846_v33 = vadd.f32 %v2998_v19, %v7230_v21  ;;  %v7235_v21 = vld [vmem:[#allocation93_spill] sm:$0xff] }
 0x628   :  { %7231 = vst [vmem:[#allocation89_spill] sm:$0xff] %v5846_v33  ;;  %v3913_v43 = vpop.eup %3912  ;;  %2106 = vmatmul.bf16.gmra.mxu3 %v5851_v28 }
 0x629   :  { %v1668_v42 = vadd.f32 1.0, %v3913_v43 }
 0x62b   :  { %3916 = vrcp.f32 %v1668_v42  ;;  %v1603_v62 = vpop.f32.mrf.mxu3  ;;  %v5854_v31 = vpop.f32.mrf.mxu0 }
 0x62c   :  { %7233 = vst [vmem:[#allocation74_spill] sm:$0xff] %v5854_v31  ;;  %3918 = vpow2.f32 %v1335_v54  ;;  %v1604_v48 = vadd.f32 %v1603_v62, %v7225_v41  ;;  %v3915_v17 = vpop.eup %3914  ;;  %v1801_v62 = vpack.c.bf16 %v5843_v2, %v5834_v46 }
 0x62d   :  { %v1383_v1 = vmul.f32 %v3915_v17, %v7234_v6 }
 0x62e   :  { %v1622_v19 = vsub.f32 0.0, %v1604_v48  ;;  %v7238_v48 = vld [vmem:[#allocation43_spill] sm:$0xff] }
 0x630   :  { %v1652_v29 = vmul.f32 1.442695, %v1622_v19 }
 0x631   :  { %v3917_v57 = vpop.eup %3916 }
 0x632   :  { %v3919_v36 = vpop.eup %3918  ;;  %v1700_v33 = vmul.f32 %v3917_v57, %v7235_v21  ;;  %3920 = vpow2.f32 %v1652_v29  ;;  %v1800_v29 = vpack.c.bf16 %v5823_v30, %v5811_v39  ;;  %v7241_v21 = vld [vmem:[#allocation80_spill] sm:$0xff]  ;;  %v4286_v30 = vld [vmem:[%s6772_s3 + $0x20] sm:$0xff] }
 0x633   :  { %v5859_v22 = vpop.f32.mrf.mxu3  ;;  %v5861_v43 = vpop.f32.mrf.mxu0  ;;  %v1353_v42 = vadd.f32 1.0, %v3919_v36 }
 0x634   :  { %7236 = vst [vmem:[#allocation91_spill] sm:$0xff] %v5859_v22  ;;  %v1802_v0 = vpack.c.bf16 %v5861_v43, %v5854_v31  ;;  %v3000_v54 = vadd.f32 %v1700_v33, %v1383_v1  ;;  %v1799_v33 = vpack.c.bf16 %v5798_v37, %v5786_v27  ;;  %v4287_v31 = vld [vmem:[%s6772_s3 + $0x28] sm:$0xff]  ;;  %v4288_v27 = vld [vmem:[%s6772_s3 + $0x30] sm:$0xff] }
 0x635   :  { %7237 = vst [vmem:[#allocation41_spill] sm:$0xff] %v5861_v43  ;;  %3922 = vrcp.f32 %v1353_v42  ;;  %v7242_v42 = vld [vmem:[#allocation95_spill] sm:$0xff]  ;;  %v7244_v43 = vld [vmem:[#allocation45_spill] sm:$0xff] }
 0x636   :  { %1803 = vmatpush.bf16.msra.mxu1 %v1802_v0  ;;  %v5868_v19 = vadd.f32 %v3000_v54, %v7238_v48  ;;  %v1798_v54 = vpack.c.bf16 %v5772_v18, %v5762_v20 }
 0x638   :  { %7239 = vst [vmem:[#allocation77_spill] sm:$0xff] %v5868_v19  ;;  %v3921_v17 = vpop.eup %3920 }
 0x639   :  { %v1670_v57 = vadd.f32 1.0, %v3921_v17 }
 0x63a   :  { %1804 = vmatpush.bf16.msra.mxu1 %v1801_v62 }
 0x63b   :  { %3924 = vrcp.f32 %v1670_v57  ;;  %v5872_v6 = vpop.f32.mrf.mxu3  ;;  %v3923_v36 = vpop.eup %3922  ;;  %v1797_v57 = vpack.c.bf16 %v5746_v16, %v5736_v45 }
 0x63c   :  { %7240 = vst [vmem:[#allocation93_spill] sm:$0xff] %v5872_v6  ;;  %v1385_v0 = vmul.f32 %v3923_v36, %v7241_v21  ;;  %v4282_v21 = vld [vmem:[%s6772_s3] sm:$0xff] }
 0x63e   :  { %1805 = vmatpush.bf16.msra.mxu1 %v1800_v29  ;;  %v1796_v29 = vpack.c.bf16 %v5720_v49, %v5713_v25 }
 0x641   :  { %v3925_v1 = vpop.eup %3924 }
 0x642   :  { %v1702_v48 = vmul.f32 %v3925_v1, %v7242_v42  ;;  %1806 = vmatpush.bf16.msra.mxu1 %v1799_v33  ;;  %v1795_v33 = vpack.c.bf16 %v5702_v61, %v5697_v34 }
 0x643   :  { %v5880_v17 = vpop.f32.mrf.mxu3 }
 0x644   :  { %7243 = vst [vmem:[#allocation43_spill] sm:$0xff] %v5880_v17  ;;  %v3002_v62 = vadd.f32 %v1702_v48, %v1385_v0 }
 0x646   :  { %1807 = vmatpush.bf16.msra.mxu1 %v1798_v54  ;;  %v5885_v2 = vadd.f32 %v3002_v62, %v7244_v43  ;;  %v4283_v54 = vld [vmem:[%s6772_s3 + $0x8] sm:$0xff]  ;;  %v4284_v62 = vld [vmem:[%s6772_s3 + $0x10] sm:$0xff] }
 0x648   :  { %7245 = vst [vmem:[#allocation80_spill] sm:$0xff] %v5885_v2 }
 0x64a   :  { %1808 = vmatpush.bf16.msra.mxu1 %v1797_v57 }
 0x64b   :  { %v5889_v36 = vpop.f32.mrf.mxu3 }
 0x64c   :  { %7246 = vst [vmem:[#allocation95_spill] sm:$0xff] %v5889_v36 }
 0x64e   :  { %1809 = vmatpush.bf16.msra.mxu1 %v1796_v29 }
 0x652   :  { %1810 = vmatpush.bf16.msra.mxu1 %v1795_v33  ;;  %v4285_v33 = vld [vmem:[%s6772_s3 + $0x18] sm:$0xff] }
 0x653   :  { %v5893_v1 = vpop.f32.mrf.mxu3 }
 0x654   :  { %7247 = vst [vmem:[#allocation45_spill] sm:$0xff] %v5893_v1 }
 0x655   :  { %1811 = vmatmul.bf16.vlgmr.msra.gmra.mxu1 %v4282_v21 }
 0x65b   :  { %v5898_v43 = vpop.f32.mrf.mxu3 }
 0x65c   :  { %7248 = vst [vmem:[#allocation97_spill] sm:$0xff] %v5898_v43 }
 0x663   :  { %v5900_v0 = vpop.f32.mrf.mxu3 }
 0x664   :  { %7249 = vst [vmem:[#allocation98_spill] sm:$0xff] %v5900_v0 }
 0x665   :  { %1816 = vmatmul.bf16.gmra.mxu1 %v4283_v54 }
 0x66b   :  { %v5905_v42 = vpop.f32.mrf.mxu3 }
 0x66c   :  { %7250 = vst [vmem:[#allocation99_spill] sm:$0xff] %v5905_v42 }
 0x673   :  { %v5907_v48 = vpop.f32.mrf.mxu3 }
 0x674   :  { %7251 = vst [vmem:[#allocation100_spill] sm:$0xff] %v5907_v48 }
 0x675   :  { %1821 = vmatmul.bf16.gmra.mxu1 %v4284_v62 }
 0x67b   :  { %v5912_v57 = vpop.f32.mrf.mxu3 }
 0x67c   :  { %7252 = vst [vmem:[#allocation101_spill] sm:$0xff] %v5912_v57 }
 0x683   :  { %v5914_v29 = vpop.f32.mrf.mxu3 }
 0x684   :  { %7253 = vst [vmem:[#allocation102_spill] sm:$0xff] %v5914_v29  ;;  %v2116_v16 = vpack.c.bf16 %v5914_v29, %v5912_v57 }
 0x685   :  { %1826 = vmatmul.bf16.gmra.mxu1 %v4285_v33 }
 0x68b   :  { %v5919_v2 = vpop.f32.mrf.mxu3 }
 0x68c   :  { %7254 = vst [vmem:[#allocation103_spill] sm:$0xff] %v5919_v2 }
 0x693   :  { %v5921_v19 = vpop.f32.mrf.mxu3 }
 0x694   :  { %7255 = vst [vmem:[#allocation104_spill] sm:$0xff] %v5921_v19  ;;  %v2117_v20 = vpack.c.bf16 %v5921_v19, %v5919_v2 }
 0x695   :  { %1831 = vmatmul.bf16.gmra.mxu1 %v4286_v30 }
 0x69b   :  { %v5926_v22 = vpop.f32.mrf.mxu3 }
 0x69c   :  { %7256 = vst [vmem:[#allocation105_spill] sm:$0xff] %v5926_v22 }
 0x6a3   :  { %v5928_v37 = vpop.f32.mrf.mxu3 }
 0x6a4   :  { %7257 = vst [vmem:[#allocation106_spill] sm:$0xff] %v5928_v37  ;;  %v2118_v18 = vpack.c.bf16 %v5928_v37, %v5926_v22 }
 0x6a5   :  { %1836 = vmatmul.bf16.gmra.mxu1 %v4287_v31 }
 0x6ab   :  { %v5933_v46 = vpop.f32.mrf.mxu3 }
 0x6ac   :  { %7258 = vst [vmem:[#allocation107_spill] sm:$0xff] %v5933_v46 }
 0x6b3   :  { %v5935_v39 = vpop.f32.mrf.mxu3 }
 0x6b4   :  { %7259 = vst [vmem:[#allocation108_spill] sm:$0xff] %v5935_v39  ;;  %v2119_v41 = vpack.c.bf16 %v5935_v39, %v5933_v46  ;;  %v2115_v39 = vpack.c.bf16 %v5907_v48, %v5905_v42  ;;  %v4289_v46 = vld [vmem:[%s6772_s3 + $0x38] sm:$0xff] }
 0x6b5   :  { %1841 = vmatmul.bf16.gmra.mxu1 %v4288_v27 }
 0x6b6   :  { %2120 = vmatpush.bf16.msra.mxu0 %v2119_v41 }
 0x6ba   :  { %2121 = vmatpush.bf16.msra.mxu0 %v2118_v18  ;;  %v2114_v18 = vpack.c.bf16 %v5900_v0, %v5898_v43  ;;  %v7260_v43 = vld [vmem:[#allocation47_spill] sm:$0xff] }
 0x6be   :  { %2122 = vmatpush.bf16.msra.mxu0 %v2117_v20  ;;  %v2113_v20 = vpack.c.bf16 %v5893_v1, %v5889_v36  ;;  %v7261_v1 = vld [vmem:[#allocation48_spill] sm:$0xff] }
 0x6c2   :  { %2123 = vmatpush.bf16.msra.mxu0 %v2116_v16  ;;  %v2112_v16 = vpack.c.bf16 %v5880_v17, %v5872_v6 }
 0x6c5   :  { %1846 = vmatmul.bf16.gmra.mxu1 %v4289_v46 }
 0x6c6   :  { %2124 = vmatpush.bf16.msra.mxu0 %v2115_v39 }
 0x6ca   :  { %2125 = vmatpush.bf16.msra.mxu0 %v2114_v18 }
 0x6ce   :  { %2126 = vmatpush.bf16.msra.mxu0 %v2113_v20 }
 0x6d2   :  { %v5959_v41 = vpop.f32.mrf.mxu1  ;;  %2127 = vmatpush.bf16.msra.mxu0 %v2112_v16 }
 0x6d5   :  { %2128 = vmatmul.bf16.vlgmr.msra.gmra.mxu0 %v4282_v21 }
 0x6da   :  { %v1814_v37 = vpop.f32.mrf.mxu1 }
 0x6e2   :  { %v1817_v19 = vpop.f32.mrf.mxu1 }
 0x6e5   :  { %2133 = vmatmul.bf16.gmra.mxu0 %v4283_v54 }
 0x6ea   :  { %v1819_v29 = vpop.f32.mrf.mxu1 }
 0x6f2   :  { %v1822_v39 = vpop.f32.mrf.mxu1 }
 0x6f5   :  { %2138 = vmatmul.bf16.gmra.mxu0 %v4284_v62 }
 0x6fa   :  { %v1824_v22 = vpop.f32.mrf.mxu1 }
 0x702   :  { %v1827_v2 = vpop.f32.mrf.mxu1 }
 0x705   :  { %2143 = vmatmul.bf16.gmra.mxu0 %v4285_v33 }
 0x70a   :  { %v1829_v18 = vpop.f32.mrf.mxu1 }
 0x712   :  { %v1832_v57 = vpop.f32.mrf.mxu1 }
 0x715   :  { %2148 = vmatmul.bf16.gmra.mxu0 %v4286_v30 }
 0x71a   :  { %v1834_v20 = vpop.f32.mrf.mxu1 }
 0x722   :  { %v1837_v48 = vpop.f32.mrf.mxu1 }
 0x725   :  { %2153 = vmatmul.bf16.gmra.mxu0 %v4287_v31 }
 0x72a   :  { %v1839_v42 = vpop.f32.mrf.mxu1 }
 0x72b   :  { %v1840_v25 = vadd.f32 %v1839_v42, %v4954_v53 }
 0x72d   :  { %v1863_v6 = vmax.f32 %v1840_v25, 0.0 }
 0x732   :  { %v1842_v0 = vpop.f32.mrf.mxu1 }
 0x733   :  { %v1843_v33 = vadd.f32 %v1842_v0, %v4939_v56 }
 0x735   :  { %2158 = vmatmul.bf16.gmra.mxu0 %v4288_v27  ;;  %v1838_v27 = vadd.f32 %v1837_v48, %v4945_v35  ;;  %v1864_v61 = vmax.f32 %v1843_v33, 0.0 }
 0x737   :  { %v1862_v34 = vmax.f32 %v1838_v27, 0.0  ;;  %v1813_v27 = vadd.f32 %v5959_v41, %v5007_v38 }
 0x739   :  { %v1873_v42 = vpack.c.bf16 %v1863_v6, %v1862_v34  ;;  %v1818_v34 = vadd.f32 %v1817_v19, %v4991_v24 }
 0x73a   :  { %v1844_v16 = vpop.f32.mrf.mxu1 }
 0x73b   :  { %v1845_v62 = vadd.f32 %v1844_v16, %v7140_v55 }
 0x73d   :  { %v1865_v31 = vmax.f32 %v1845_v62, 0.0 }
 0x73f   :  { %v1874_v16 = vpack.c.bf16 %v1865_v31, %v1864_v61  ;;  %v1823_v61 = vadd.f32 %v1822_v39, %v4977_v44  ;;  %v1854_v39 = vmax.f32 %v1818_v34, 0.0  ;;  %v6027_v34 = vld [vmem:[%s6774_s5 + $0x20] sm:$0xff] }
 0x741   :  { %v1856_v6 = vmax.f32 %v1823_v61, 0.0 }
 0x742   :  { %v1847_v21 = vpop.f32.mrf.mxu1 }
 0x743   :  { %v1848_v54 = vadd.f32 %v1847_v21, %v7260_v43  ;;  %v1835_v21 = vadd.f32 %v1834_v20, %v4962_v23 }
 0x745   :  { %2163 = vmatmul.bf16.gmra.mxu0 %v4289_v46  ;;  %v1866_v36 = vmax.f32 %v1848_v54, 0.0  ;;  %v1861_v0 = vmax.f32 %v1835_v21, 0.0 }
 0x74a   :  { %v1849_v45 = vpop.f32.mrf.mxu1 }
 0x74b   :  { %v1850_v49 = vadd.f32 %v1849_v45, %v7261_v1  ;;  %v1833_v45 = vadd.f32 %v1832_v57, %v4956_v5  ;;  %v1820_v57 = vadd.f32 %v1819_v29, %v4999_v58  ;;  %v1852_v29 = vmax.f32 %v1813_v27, 0.0 }
 0x74d   :  { %v1867_v30 = vmax.f32 %v1850_v49, 0.0  ;;  %v1830_v49 = vadd.f32 %v1829_v18, %v4971_v59  ;;  %v1860_v54 = vmax.f32 %v1833_v45, 0.0  ;;  %v1855_v31 = vmax.f32 %v1820_v57, 0.0 }
 0x74e   :  { %v2338_v57 = vperm.slane %v5641_v32, 6 }
 0x74f   :  { %v1875_v17 = vpack.c.bf16 %v1867_v30, %v1866_v36  ;;  %v1828_v36 = vadd.f32 %v1827_v2, %v4973_v47  ;;  %v1859_v62 = vmax.f32 %v1830_v49, 0.0  ;;  %v1872_v20 = vpack.c.bf16 %v1861_v0, %v1860_v54  ;;  %v5989_v49 = vld [vmem:[%s6774_s5] sm:$0xff]  ;;  %v5999_v0 = vld [vmem:[%s6774_s5 + $0x8] sm:$0xff]  ;;  %v6009_v54 = vld [vmem:[%s6774_s5 + $0x10] sm:$0xff] }
 0x750   :  { %v1815_v30 = vadd.f32 %v1814_v37, %v5005_v3  ;;  %vm2353_vm0 = vcmp.eq.s32.totalorder %v4423_v7, %v2338_v57  ;;  %vm2354_vm1 = vcmp.eq.s32.totalorder %v4426_v8, %v2338_v57  ;;  %vm2351_vm3 = vcmp.eq.s32.totalorder %v4429_v9, %v2338_v57 }
 0x751   :  { %1876 = vmatpush.bf16.msra.mxu2 %v1875_v17  ;;  %v1825_v17 = vadd.f32 %v1824_v22, %v4989_v51  ;;  %v1858_v25 = vmax.f32 %v1828_v36, 0.0  ;;  %vm3591_vm2 = vmpackc.low %vm2354_vm1, %vm2353_vm0  ;;  %vm2352_vm4 = vcmp.eq.s32.totalorder %v4432_v10, %v2338_v57  ;;  %vm2349_vm6 = vcmp.eq.s32.totalorder %v4435_v11, %v2338_v57 }
 0x752   :  { %v5967_v46 = vpop.f32.mrf.mxu0  ;;  %v1853_v21 = vmax.f32 %v1815_v30, 0.0  ;;  %vm3594_vm5 = vmpackc.low %vm2352_vm4, %vm2351_vm3  ;;  %vm2350_vm7 = vcmp.eq.s32.totalorder %v4438_v12, %v2338_v57  ;;  %vm2347_vm9 = vcmp.eq.s32.totalorder %v4457_v13, %v2338_v57  ;;  %vm2348_vm10 = vcmp.eq.s32.totalorder %v4460_v14, %v2338_v57 }
 0x753   :  { %v1857_v33 = vmax.f32 %v1825_v17, 0.0  ;;  %v1871_v18 = vpack.c.bf16 %v1859_v62, %v1858_v25  ;;  %vm3597_vm8 = vmpackc.low %vm2350_vm7, %vm2349_vm6  ;;  %vm2345_vm12 = vcmp.eq.s32.totalorder %v4471_v15, %v2338_v57  ;;  %vm2346_vm13 = vcmp.eq.s32.totalorder %v7142_v52, %v2338_v57 }
 0x754   :  { %v1868_v19 = vpack.c.bf16 %v1853_v21, %v1852_v29  ;;  %vm3600_vm11 = vmpackc.low %vm2348_vm10, %vm2347_vm9  ;;  %vm2343_vm15 = vcmp.eq.s32.totalorder %v7143_v40, %v2338_v57  ;;  %vm2344_vm0 = vcmp.eq.s32.totalorder %v7152_v63, %v2338_v57  ;;  %v7264_v29 = vld [vmem:[#allocation11_spill] sm:$0xff] }
 0x755   :  { %1877 = vmatpush.bf16.msra.mxu2 %v1874_v16  ;;  %v1870_v22 = vpack.c.bf16 %v1857_v33, %v1856_v6  ;;  %v1869_v16 = vpack.c.bf16 %v1855_v31, %v1854_v39  ;;  %v2355_v33 = vperm.slane %v5647_v26, 6  ;;  %v6041_v26 = vld [vmem:[%s6774_s5 + $0x28] sm:$0xff]  ;;  %vm3603_vm14 = vmpackc.low %vm2346_vm13, %vm2345_vm12  ;;  %vm2340_vm6 = vcmp.eq.s32.totalorder %v7264_v29, %v2338_v57 }
 0x756   :  { %vm3606_vm1 = vmpackc.low %vm2344_vm0, %vm2343_vm15  ;;  %v7262_v31 = vld [vmem:[#allocation10_spill] sm:$0xff] }
 0x757   :  { %vm2342_vm3 = vcmp.eq.s32.totalorder %v7262_v31, %v2338_v57 }
 0x759   :  { %1878 = vmatpush.bf16.msra.mxu2 %v1873_v42 }
 0x75a   :  { %v5973_v48 = vpop.f32.mrf.mxu0 }
 0x75d   :  { %1879 = vmatpush.bf16.msra.mxu2 %v1872_v20  ;;  %v6017_v20 = vld [vmem:[%s6774_s5 + $0x18] sm:$0xff] }
 0x761   :  { %1880 = vmatpush.bf16.msra.mxu2 %v1871_v18  ;;  %v3592_v18 = vpack.c.bf16 %v2355_v33, %v2355_v33 }
 0x762   :  { %v5979_v2 = vpop.f32.mrf.mxu0 }
 0x765   :  { %1881 = vmatpush.bf16.msra.mxu2 %v1870_v22 }
 0x769   :  { %1882 = vmatpush.bf16.msra.mxu2 %v1869_v16  ;;  %v7263_v16 = vld [vmem:[#allocation5_spill] sm:$0xff] }
 0x76a   :  { %v5984_v45 = vpop.f32.mrf.mxu0 }
 0x76d   :  { %1883 = vmatpush.bf16.msra.mxu2 %v1868_v19 }
 0x770   :  { %1884 = vmatmul.bf16.vlgmr.msra.gmra.mxu2 %v5989_v49 }
 0x771   :  { %3593 = vmatpush.bf16.msk.msrb.mxu2 %vm3591_vm2, %v3592_v18  ;;  %vm2341_vm2 = vcmp.eq.s32.totalorder %v7145_v50, %v2338_v57 }
 0x772   :  { %v5992_v37 = vpop.f32.mrf.mxu0  ;;  %vm3609_vm4 = vmpackc.low %vm2342_vm3, %vm2341_vm2 }
 0x775   :  { %3596 = vmatpush.bf16.msk.msrb.mxu2 %vm3594_vm5, %v3592_v18  ;;  %vm2339_vm5 = vcmp.eq.s32.totalorder %v7263_v16, %v2338_v57 }
 0x776   :  { %vm3612_vm7 = vmpackc.low %vm2340_vm6, %vm2339_vm5 }
 0x779   :  { %3599 = vmatpush.bf16.msk.msrb.mxu2 %vm3597_vm8, %v3592_v18 }
 0x77a   :  { %v5994_v41 = vpop.f32.mrf.mxu0 }
 0x77d   :  { %3602 = vmatpush.bf16.msk.msrb.mxu2 %vm3600_vm11, %v3592_v18 }
 0x780   :  { %1889 = vmatmul.bf16.gmra.mxu2 %v5999_v0 }
 0x781   :  { %3605 = vmatpush.bf16.msk.msrb.mxu2 %vm3603_vm14, %v3592_v18 }
 0x782   :  { %v6002_v42 = vpop.f32.mrf.mxu0 }
 0x785   :  { %3608 = vmatpush.bf16.msk.msrb.mxu2 %vm3606_vm1, %v3592_v18 }
 0x789   :  { %3611 = vmatpush.bf16.msk.msrb.mxu2 %vm3609_vm4, %v3592_v18 }
 0x78a   :  { %v6004_v36 = vpop.f32.mrf.mxu0 }
 0x78d   :  { %3614 = vmatpush.bf16.msk.msrb.mxu2 %vm3612_vm7, %v3592_v18 }
 0x790   :  { %1894 = vmatmul.bf16.gmra.mxu2 %v6009_v54 }
 0x792   :  { %v6012_v17 = vpop.f32.mrf.mxu0 }
 0x79a   :  { %v2151_v62 = vpop.f32.mrf.mxu0 }
 0x7a0   :  { %1899 = vmatmul.bf16.gmra.mxu2 %v6017_v20 }
 0x7a2   :  { %v2154_v61 = vpop.f32.mrf.mxu0 }
 0x7aa   :  { %v2156_v25 = vpop.f32.mrf.mxu0 }
 0x7ab   :  { %v2157_v31 = vadd.f32 %v2156_v25, %v4954_v53  ;;  %v2150_v25 = vadd.f32 %v6012_v17, %v4956_v5  ;;  %v2145_v53 = vadd.f32 %v6002_v42, %v4973_v47  ;;  %v2140_v17 = vadd.f32 %v5992_v37, %v4977_v44  ;;  %v6078_v42 = vld [vmem:[%s6774_s5 + $0x38] sm:$0xff] }
 0x7b0   :  { %1904 = vmatmul.bf16.gmra.mxu2 %v6027_v34 }
 0x7b2   :  { %v2159_v6 = vpop.f32.mrf.mxu0 }
 0x7b3   :  { %v2160_v19 = vadd.f32 %v2159_v6, %v4939_v56  ;;  %v2152_v6 = vadd.f32 %v2151_v62, %v4962_v23  ;;  %v2142_v62 = vadd.f32 %v5994_v41, %v4989_v51  ;;  %v2135_v41 = vadd.f32 %v5979_v2, %v4991_v24  ;;  %v6091_v2 = vld [vmem:[%s6771_s2] sm:$0xff] }
 0x7b5   :  { %v2181_v57 = vmax.f32 %v2160_v19, 0.0  ;;  %v2175_v19 = vmax.f32 %v2145_v53, 0.0  ;;  %v2132_v53 = vadd.f32 %v5973_v48, %v5005_v3 }
 0x7ba   :  { %v2161_v32 = vpop.f32.mrf.mxu0 }
 0x7bb   :  { %v2162_v39 = vadd.f32 %v2161_v32, %v7140_v55  ;;  %v6058_v32 = vld [vmem:[%s6774_s5 + $0x30] sm:$0xff] }
 0x7bd   :  { %v2182_v50 = vmax.f32 %v2162_v39, 0.0  ;;  %v2178_v39 = vmax.f32 %v2152_v6, 0.0 }
 0x7c0   :  { %1909 = vmatmul.bf16.gmra.mxu2 %v6041_v26 }
 0x7c2   :  { %v2164_v30 = vpop.f32.mrf.mxu0 }
 0x7c3   :  { %v2165_v22 = vadd.f32 %v2164_v30, %v7260_v43 }
 0x7c5   :  { %v2183_v33 = vmax.f32 %v2165_v22, 0.0  ;;  %v2180_v22 = vmax.f32 %v2157_v31, 0.0 }
 0x7ca   :  { %v2166_v27 = vpop.f32.mrf.mxu0 }
 0x7cb   :  { %v2167_v21 = vadd.f32 %v2166_v27, %v7261_v1  ;;  %v2155_v27 = vadd.f32 %v2154_v61, %v4945_v35  ;;  %v2177_v61 = vmax.f32 %v2150_v25, 0.0 }
 0x7cd   :  { %v2184_v28 = vmax.f32 %v2167_v21, 0.0  ;;  %v2191_v21 = vpack.c.bf16 %v2182_v50, %v2181_v57  ;;  %v2179_v18 = vmax.f32 %v2155_v27, 0.0  ;;  %v2189_v50 = vpack.c.bf16 %v2178_v39, %v2177_v61  ;;  %v7265_v39 = vld [vmem:[#allocation38_spill] sm:$0xff] }
 0x7ce   :  { %v2173_v57 = vmax.f32 %v2140_v17, 0.0 }
 0x7cf   :  { %v2192_v30 = vpack.c.bf16 %v2184_v28, %v2183_v33  ;;  %v2147_v28 = vadd.f32 %v6004_v36, %v4971_v59  ;;  %v2190_v33 = vpack.c.bf16 %v2180_v22, %v2179_v18  ;;  %v2137_v36 = vadd.f32 %v5984_v45, %v4999_v58 }
 0x7d0   :  { %1914 = vmatmul.bf16.gmra.mxu2 %v6058_v32  ;;  %v2130_v45 = vadd.f32 %v5967_v46, %v5007_v38  ;;  %v2171_v22 = vmax.f32 %v2135_v41, 0.0 }
 0x7d1   :  { %2193 = vmatpush.bf16.msrb.mxu1 %v2192_v30  ;;  %v2176_v31 = vmax.f32 %v2147_v28, 0.0  ;;  %v2174_v30 = vmax.f32 %v2142_v62, 0.0  ;;  %v2172_v37 = vmax.f32 %v2137_v36, 0.0 }
 0x7d2   :  { %v2169_v18 = vmax.f32 %v2130_v45, 0.0 }
 0x7d3   :  { %v2188_v27 = vpack.c.bf16 %v2176_v31, %v2175_v19  ;;  %v2187_v6 = vpack.c.bf16 %v2174_v30, %v2173_v57  ;;  %v2186_v25 = vpack.c.bf16 %v2172_v37, %v2171_v22  ;;  %v4299_v19 = vld [vmem:[%s6769_s0] sm:$0xff] }
 0x7d4   :  { %v2655_v36 = vperm.slane %v4299_v19, 7 }
 0x7d5   :  { %2194 = vmatpush.bf16.msrb.mxu1 %v2191_v21  ;;  %v2170_v21 = vmax.f32 %v2132_v53, 0.0  ;;  %v7278_v53 = vld [vmem:[#allocation62_spill] sm:$0xff] }
 0x7d6   :  { %vm2670_vm8 = vcmp.eq.s32.totalorder %v4423_v7, %v2655_v36  ;;  %vm2671_vm9 = vcmp.eq.s32.totalorder %v4426_v8, %v2655_v36  ;;  %vm2668_vm11 = vcmp.eq.s32.totalorder %v4429_v9, %v2655_v36  ;;  %vm2669_vm12 = vcmp.eq.s32.totalorder %v4432_v10, %v2655_v36  ;;  %v7269_v9 = vld [vmem:[#allocation9_spill] sm:$0xff]  ;;  %v7270_v10 = vld [vmem:[#allocation10_spill] sm:$0xff] }
 0x7d7   :  { %v2185_v28 = vpack.c.bf16 %v2170_v21, %v2169_v18  ;;  %vm3615_vm10 = vmpackc.low %vm2671_vm9, %vm2670_vm8  ;;  %vm2666_vm14 = vcmp.eq.s32.totalorder %v4435_v11, %v2655_v36  ;;  %vm2667_vm15 = vcmp.eq.s32.totalorder %v4438_v12, %v2655_v36  ;;  %vm2664_vm1 = vcmp.eq.s32.totalorder %v4457_v13, %v2655_v36  ;;  %v7272_v12 = vld [vmem:[#allocation35_spill] sm:$0xff] }
 0x7d8   :  { %vm3618_vm13 = vmpackc.low %vm2669_vm12, %vm2668_vm11  ;;  %vm2665_vm2 = vcmp.eq.s32.totalorder %v4460_v14, %v2655_v36  ;;  %vm2662_vm4 = vcmp.eq.s32.totalorder %v4471_v15, %v2655_v36  ;;  %vm2663_vm5 = vcmp.eq.s32.totalorder %v7142_v52, %v2655_v36  ;;  %vm2660_vm7 = vcmp.eq.s32.totalorder %v7143_v40, %v2655_v36  ;;  %v7274_v15 = vld [vmem:[#allocation39_spill] sm:$0xff]  ;;  %v7275_v52 = vld [vmem:[#allocation13_spill] sm:$0xff] }
 0x7d9   :  { %2195 = vmatpush.bf16.msrb.mxu1 %v2190_v33  ;;  %vm3621_vm0 = vmpackc.low %vm2667_vm15, %vm2666_vm14  ;;  %vm2661_vm8 = vcmp.eq.s32.totalorder %v7152_v63, %v2655_v36  ;;  %vm2659_vm11 = vcmp.eq.s32.totalorder %v7270_v10, %v2655_v36  ;;  %vm2657_vm14 = vcmp.eq.s32.totalorder %v7264_v29, %v2655_v36 }
 0x7da   :  { %vm3624_vm3 = vmpackc.low %vm2665_vm2, %vm2664_vm1 }
 0x7db   :  { %vm3627_vm6 = vmpackc.low %vm2663_vm5, %vm2662_vm4 }
 0x7dc   :  { %vm3630_vm9 = vmpackc.low %vm2661_vm8, %vm2660_vm7 }
 0x7dd   :  { %2196 = vmatpush.bf16.msrb.mxu1 %v2189_v50  ;;  %v7267_v50 = vld [vmem:[#allocation72_spill] sm:$0xff] }
 0x7e0   :  { %1919 = vmatmul.bf16.gmra.mxu2 %v6078_v42 }
 0x7e1   :  { %2197 = vmatpush.bf16.msrb.mxu1 %v2188_v27 }
 0x7e5   :  { %2198 = vmatpush.bf16.msrb.mxu1 %v2187_v6 }
 0x7e9   :  { %2199 = vmatpush.bf16.msrb.mxu1 %v2186_v25 }
 0x7ed   :  { %2200 = vmatpush.bf16.msrb.mxu1 %v2185_v28 }
 0x7f0   :  { %2201 = vmatmul.bf16.vlgmr.msrb.gmra.mxu1 %v5989_v49  ;;  %2388 = vmatmul.bf16.vlgmr.msrb.gmra.mxu2 %v6091_v2  ;;  %v7266_v49 = vld [vmem:[#allocation82_spill] sm:$0xff] }
 0x7f3   :  { %v6094_v48 = vpop.f32.mrf.mxu2 }
 0x7f4   :  { %v1886_v40 = vadd.f32 %v6094_v48, %v7275_v52 }
 0x7fb   :  { %v6096_v46 = vpop.f32.mrf.mxu2 }
 0x800   :  { %2206 = vmatmul.bf16.gmra.mxu1 %v5999_v0  ;;  %2393 = vmatmul.bf16.gmra.mxu2 %v7265_v39 }
 0x803   :  { %v6100_v33 = vpop.f32.mrf.mxu2 }
 0x804   :  { %v1891_v37 = vadd.f32 %v6100_v33, %v7278_v53 }
 0x806   :  { %v1927_v25 = vsub.f32 0.0, %v1891_v37 }
 0x808   :  { %v1945_v39 = vmul.f32 1.442695, %v1927_v25 }
 0x80b   :  { %v6102_v61 = vpop.f32.mrf.mxu2 }
 0x810   :  { %2211 = vmatmul.bf16.gmra.mxu1 %v6009_v54  ;;  %2398 = vmatmul.bf16.gmra.mxu2 %v7266_v49  ;;  %v4300_v54 = vld [vmem:[%s6770_s1] sm:$0xff] }
 0x811   :  { %v2672_v30 = vperm.slane %v4300_v54, 7  ;;  %v7279_v49 = vld [vmem:[#allocation69_spill] sm:$0xff] }
 0x813   :  { %v6106_v62 = vpop.f32.mrf.mxu2 }
 0x81b   :  { %v6108_v31 = vpop.f32.mrf.mxu2 }
 0x820   :  { %2216 = vmatmul.bf16.gmra.mxu1 %v6017_v20  ;;  %2403 = vmatmul.bf16.gmra.mxu2 %v7267_v50  ;;  %v3616_v20 = vpack.c.bf16 %v2672_v30, %v2672_v30 }
 0x822   :  { %3617 = vmatpush.bf16.msk.msra.mxu1 %vm3615_vm10, %v3616_v20  ;;  %vm2658_vm10 = vcmp.eq.s32.totalorder %v7269_v9, %v2655_v36 }
 0x823   :  { %v6112_v17 = vpop.f32.mrf.mxu2  ;;  %vm3633_vm12 = vmpackc.low %vm2659_vm11, %vm2658_vm10 }
 0x826   :  { %3620 = vmatpush.bf16.msk.msra.mxu1 %vm3618_vm13, %v3616_v20  ;;  %vm2656_vm13 = vcmp.eq.s32.totalorder %v7263_v16, %v2655_v36 }
 0x827   :  { %vm3636_vm15 = vmpackc.low %vm2657_vm14, %vm2656_vm13 }
 0x82a   :  { %3623 = vmatpush.bf16.msk.msra.mxu1 %vm3621_vm0, %v3616_v20 }
 0x82b   :  { %v6114_v0 = vpop.f32.mrf.mxu2 }
 0x82e   :  { %3626 = vmatpush.bf16.msk.msra.mxu1 %vm3624_vm3, %v3616_v20 }
 0x830   :  { %2221 = vmatmul.bf16.gmra.mxu1 %v6027_v34  ;;  %2408 = vmatmul.bf16.gmra.mxu2 %v5781_v4  ;;  %v1925_v4 = vsub.f32 0.0, %v1886_v40  ;;  %v7276_v34 = vld [vmem:[#allocation64_spill] sm:$0xff] }
 0x832   :  { %3629 = vmatpush.bf16.msk.msra.mxu1 %vm3627_vm6, %v3616_v20 }
 0x833   :  { %v6126_v27 = vpop.f32.mrf.mxu2 }
 0x836   :  { %3632 = vmatpush.bf16.msk.msra.mxu1 %vm3630_vm9, %v3616_v20 }
 0x83a   :  { %3635 = vmatpush.bf16.msk.msra.mxu1 %vm3633_vm12, %v3616_v20 }
 0x83b   :  { %v6132_v7 = vpop.f32.mrf.mxu2 }
 0x83c   :  { %7268 = vst [vmem:[#allocation47_spill] sm:$0xff] %v6132_v7 }
 0x83e   :  { %3638 = vmatpush.bf16.msk.msra.mxu1 %vm3636_vm15, %v3616_v20 }
 0x840   :  { %2226 = vmatmul.bf16.gmra.mxu1 %v6041_v26  ;;  %2413 = vmatmul.bf16.gmra.mxu2 %v5806_v60  ;;  %v1941_v60 = vmul.f32 1.442695, %v1925_v4  ;;  %v1888_v26 = vadd.f32 %v6096_v46, %v7276_v34  ;;  %v7280_v4 = vld [vmem:[#allocation66_spill] sm:$0xff] }
 0x842   :  { %3926 = vpow2.f32 %v1941_v60  ;;  %v1896_v60 = vadd.f32 %v6106_v62, %v7280_v4 }
 0x843   :  { %v6140_v8 = vpop.f32.mrf.mxu2 }
 0x844   :  { %v1929_v25 = vsub.f32 0.0, %v1896_v60 }
 0x848   :  { %v3927_v22 = vpop.eup %3926 }
 0x849   :  { %v1973_v28 = vadd.f32 1.0, %v3927_v22 }
 0x84b   :  { %v6146_v11 = vpop.f32.mrf.mxu2 }
 0x84c   :  { %7271 = vst [vmem:[#allocation48_spill] sm:$0xff] %v6146_v11 }
 0x850   :  { %2231 = vmatmul.bf16.gmra.mxu1 %v6058_v32  ;;  %2418 = vmatmul.bf16.gmra.mxu2 %v7272_v12  ;;  %v1926_v32 = vsub.f32 0.0, %v1888_v26  ;;  %v4301_v12 = vld [vmem:[%s6771_s2 + $0x8] sm:$0xff] }
 0x852   :  { %v1943_v57 = vmul.f32 1.442695, %v1926_v32 }
 0x853   :  { %v6152_v13 = vpop.f32.mrf.mxu2 }
 0x85b   :  { %v6154_v14 = vpop.f32.mrf.mxu2 }
 0x85c   :  { %7273 = vst [vmem:[#allocation5_spill] sm:$0xff] %v6154_v14 }
 0x860   :  { %2236 = vmatmul.bf16.gmra.mxu1 %v6078_v42  ;;  %2423 = vmatmul.bf16.gmra.mxu2 %v7274_v15 }
 0x863   :  { %v6160_v63 = vpop.f32.mrf.mxu2 }
 0x86b   :  { %v6164_v16 = vpop.f32.mrf.mxu2 }
 0x86c   :  { %7277 = vst [vmem:[#allocation11_spill] sm:$0xff] %v6164_v16 }
 0x86d   :  { %v2202_v29 = vpop.f32.mrf.mxu1 }
 0x86e   :  { %v2203_v41 = vadd.f32 %v2202_v29, %v7275_v52 }
 0x870   :  { %v2242_v42 = vsub.f32 0.0, %v2203_v41  ;;  %2705 = vmatmul.bf16.vlgmr.msra.gmra.mxu1 %v6091_v2  ;;  %v1893_v2 = vadd.f32 %v6102_v61, %v7279_v49 }
 0x872   :  { %v2258_v6 = vmul.f32 1.442695, %v2242_v42  ;;  %v1928_v30 = vsub.f32 0.0, %v1893_v2  ;;  %v1949_v2 = vmul.f32 1.442695, %v1929_v25 }
 0x873   :  { %v6170_v45 = vpop.f32.mrf.mxu2 }
 0x874   :  { %3928 = vpow2.f32 %v2258_v6  ;;  %v1947_v40 = vmul.f32 1.442695, %v1928_v30  ;;  %v7282_v6 = vld [vmem:[#allocation93_spill] sm:$0xff] }
 0x875   :  { %v2204_v21 = vpop.f32.mrf.mxu1  ;;  %3930 = vpow2.f32 %v1943_v57  ;;  %v7281_v57 = vld [vmem:[#allocation71_spill] sm:$0xff] }
 0x876   :  { %v2205_v18 = vadd.f32 %v2204_v21, %v7276_v34  ;;  %3932 = vrcp.f32 %v1973_v28 }
 0x878   :  { %v2243_v48 = vsub.f32 0.0, %v2205_v18 }
 0x87a   :  { %v3929_v46 = vpop.eup %3928  ;;  %v2260_v50 = vmul.f32 1.442695, %v2243_v48 }
 0x87b   :  { %v2290_v33 = vadd.f32 1.0, %v3929_v46  ;;  %v6175_v19 = vpop.f32.mrf.mxu2  ;;  %v3931_v36 = vpop.eup %3930 }
 0x87c   :  { %3934 = vpow2.f32 %v2260_v50  ;;  %v1974_v9 = vadd.f32 1.0, %v3931_v36  ;;  %v3933_v61 = vpop.eup %3932  ;;  %v7283_v50 = vld [vmem:[#allocation59_spill] sm:$0xff] }
 0x87d   :  { %3936 = vrcp.f32 %v2290_v33  ;;  %v2207_v54 = vpop.f32.mrf.mxu1  ;;  %v2005_v37 = vmul.f32 %v3933_v61, %v7281_v57  ;;  %v1898_v33 = vadd.f32 %v6108_v31, %v7283_v50  ;;  %v7286_v61 = vld [vmem:[#allocation43_spill] sm:$0xff] }
 0x87e   :  { %3938 = vpow2.f32 %v1945_v39  ;;  %v2208_v20 = vadd.f32 %v2207_v54, %v7278_v53 }
 0x87f   :  { %3940 = vrcp.f32 %v1974_v9  ;;  %v1930_v60 = vsub.f32 0.0, %v1898_v33  ;;  %v7290_v33 = vld [vmem:[#allocation95_spill] sm:$0xff] }
 0x880   :  { %v2244_v10 = vsub.f32 0.0, %v2208_v20  ;;  %2710 = vmatmul.bf16.gmra.mxu1 %v4301_v12 }
 0x882   :  { %v3935_v15 = vpop.eup %3934  ;;  %v2262_v26 = vmul.f32 1.442695, %v2244_v10  ;;  %v7285_v10 = vld [vmem:[#allocation8_spill] sm:$0xff] }
 0x883   :  { %v3937_v29 = vpop.eup %3936  ;;  %v2291_v32 = vadd.f32 1.0, %v3935_v15  ;;  %v6183_v41 = vpop.f32.mrf.mxu2 }
 0x884   :  { %v3939_v42 = vpop.eup %3938  ;;  %v2322_v22 = vmul.f32 %v3937_v29, %v7282_v6  ;;  %3942 = vpow2.f32 %v2262_v26  ;;  %v1951_v6 = vmul.f32 1.442695, %v1930_v60  ;;  %v7291_v60 = vld [vmem:[#allocation58_spill] sm:$0xff] }
 0x885   :  { %3944 = vrcp.f32 %v2291_v32  ;;  %v2209_v21 = vpop.f32.mrf.mxu1  ;;  %v1975_v62 = vadd.f32 1.0, %v3939_v42  ;;  %v3941_v46 = vpop.eup %3940  ;;  %v4302_v42 = vld [vmem:[%s6771_s2 + $0x10] sm:$0xff] }
 0x886   :  { %3946 = vpow2.f32 %v1947_v40  ;;  %v2210_v18 = vadd.f32 %v2209_v21, %v7279_v49  ;;  %v6188_v28 = vadd.f32 %v2322_v22, %v2005_v37  ;;  %v2006_v12 = vmul.f32 %v3941_v46, %v7285_v10  ;;  %v7287_v22 = vld [vmem:[#allocation57_spill] sm:$0xff] }
 0x887   :  { %3948 = vrcp.f32 %v1975_v62  ;;  %v1901_v21 = vadd.f32 %v6112_v17, %v7287_v22 }
 0x888   :  { %v2245_v48 = vsub.f32 0.0, %v2210_v18 }
 0x88a   :  { %v3943_v39 = vpop.eup %3942  ;;  %v2264_v36 = vmul.f32 1.442695, %v2245_v48 }
 0x88b   :  { %v3945_v54 = vpop.eup %3944  ;;  %v2292_v30 = vadd.f32 1.0, %v3943_v39  ;;  %v6192_v20 = vpop.f32.mrf.mxu2  ;;  %v7289_v39 = vld [vmem:[#allocation76_spill] sm:$0xff] }
 0x88c   :  { %7284 = vst [vmem:[#allocation38_spill] sm:$0xff] %v6192_v20  ;;  %v3947_v9 = vpop.eup %3946  ;;  %3950 = vpow2.f32 %v2264_v36  ;;  %v2323_v15 = vmul.f32 %v3945_v54, %v7286_v61 }
 0x88d   :  { %3952 = vrcp.f32 %v2292_v30  ;;  %v2212_v40 = vpop.f32.mrf.mxu1  ;;  %v1976_v31 = vadd.f32 1.0, %v3947_v9  ;;  %v3949_v57 = vpop.eup %3948  ;;  %v1931_v30 = vsub.f32 0.0, %v1901_v21 }
 0x88e   :  { %3954 = vpow2.f32 %v1949_v2  ;;  %v2213_v26 = vadd.f32 %v2212_v40, %v7280_v4  ;;  %v6197_v29 = vadd.f32 %v2323_v15, %v2006_v12  ;;  %v2007_v2 = vmul.f32 %v3949_v57, %v7289_v39 }
 0x88f   :  { %3956 = vrcp.f32 %v1976_v31  ;;  %v1953_v40 = vmul.f32 1.442695, %v1931_v30 }
 0x890   :  { %v2246_v32 = vsub.f32 0.0, %v2213_v26  ;;  %2715 = vmatmul.bf16.gmra.mxu1 %v4302_v42  ;;  %v1903_v26 = vadd.f32 %v6114_v0, %v7291_v60 }
 0x892   :  { %v3951_v37 = vpop.eup %3950  ;;  %v2266_v25 = vmul.f32 1.442695, %v2246_v32 }
 0x893   :  { %v3953_v18 = vpop.eup %3952  ;;  %v2293_v62 = vadd.f32 1.0, %v3951_v37  ;;  %v6204_v48 = vpop.f32.mrf.mxu2 }
 0x894   :  { %7288 = vst [vmem:[#allocation82_spill] sm:$0xff] %v6204_v48  ;;  %v3955_v46 = vpop.eup %3954  ;;  %v2324_v36 = vmul.f32 %v3953_v18, %v7290_v33  ;;  %3958 = vpow2.f32 %v2266_v25  ;;  %v7294_v25 = vld [vmem:[#allocation45_spill] sm:$0xff] }
 0x895   :  { %3960 = vrcp.f32 %v2293_v62  ;;  %v2214_v54 = vpop.f32.mrf.mxu1  ;;  %v1977_v17 = vadd.f32 1.0, %v3955_v46  ;;  %v3957_v61 = vpop.eup %3956  ;;  %v1932_v46 = vsub.f32 0.0, %v1903_v26 }
 0x896   :  { %3962 = vpow2.f32 %v1951_v6  ;;  %v2215_v9 = vadd.f32 %v2214_v54, %v7283_v50  ;;  %v6209_v10 = vadd.f32 %v2324_v36, %v2007_v2  ;;  %v7293_v6 = vld [vmem:[#allocation79_spill] sm:$0xff]  ;;  %v4303_v36 = vld [vmem:[%s6771_s2 + $0x18] sm:$0xff] }
 0x897   :  { %3964 = vrcp.f32 %v1977_v17  ;;  %v2008_v21 = vmul.f32 %v3957_v61, %v7293_v6  ;;  %v7296_v17 = vld [vmem:[#allocation55_spill] sm:$0xff] }
 0x898   :  { %v2247_v12 = vsub.f32 0.0, %v2215_v9  ;;  %v1955_v9 = vmul.f32 1.442695, %v1932_v46 }
 0x89a   :  { %v3959_v15 = vpop.eup %3958  ;;  %v2268_v31 = vmul.f32 1.442695, %v2247_v12  ;;  %v1906_v12 = vadd.f32 %v6126_v27, %v7296_v17 }
 0x89b   :  { %v3961_v32 = vpop.eup %3960  ;;  %v2294_v42 = vadd.f32 1.0, %v3959_v15  ;;  %v6213_v57 = vpop.f32.mrf.mxu2 }
 0x89c   :  { %7292 = vst [vmem:[#allocation72_spill] sm:$0xff] %v6213_v57  ;;  %v3963_v37 = vpop.eup %3962  ;;  %3966 = vpow2.f32 %v2268_v31  ;;  %v2325_v18 = vmul.f32 %v3961_v32, %v7294_v25  ;;  %v7298_v32 = vld [vmem:[#allocation20_spill] sm:$0xff]  ;;  %v1933_v25 = vsub.f32 0.0, %v1906_v12  ;;  %v7303_v12 = vld [vmem:[#allocation98_spill] sm:$0xff] }
 0x89d   :  { %3968 = vrcp.f32 %v2294_v42  ;;  %v2217_v62 = vpop.f32.mrf.mxu1  ;;  %v1978_v0 = vadd.f32 1.0, %v3963_v37  ;;  %v3965_v54 = vpop.eup %3964  ;;  %v7299_v37 = vld [vmem:[#allocation97_spill] sm:$0xff] }
 0x89e   :  { %3970 = vpow2.f32 %v1953_v40  ;;  %v2218_v39 = vadd.f32 %v2217_v62, %v7287_v22  ;;  %v6218_v2 = vadd.f32 %v2325_v18, %v2008_v21  ;;  %v2009_v42 = vmul.f32 %v3965_v54, %v7298_v32 }
 0x89f   :  { %3972 = vrcp.f32 %v1978_v0 }
 0x8a0   :  { %7295 = vst [vmem:[#allocation9_spill] sm:$0xff] %v6218_v2  ;;  %v2248_v33 = vsub.f32 0.0, %v2218_v39  ;;  %2720 = vmatmul.bf16.gmra.mxu1 %v4303_v36 }
 0x8a2   :  { %v3967_v30 = vpop.eup %3966  ;;  %v2270_v61 = vmul.f32 1.442695, %v2248_v33  ;;  %v1957_v33 = vmul.f32 1.442695, %v1933_v25  ;;  %v4304_v25 = vld [vmem:[%s6771_s2 + $0x20] sm:$0xff] }
 0x8a3   :  { %v3969_v15 = vpop.eup %3968  ;;  %v2295_v40 = vadd.f32 1.0, %v3967_v30  ;;  %v6225_v26 = vpop.f32.mrf.mxu2 }
 0x8a4   :  { %7297 = vst [vmem:[#allocation10_spill] sm:$0xff] %v6225_v26  ;;  %v3971_v31 = vpop.eup %3970  ;;  %v2326_v6 = vmul.f32 %v3969_v15, %v7299_v37  ;;  %3974 = vpow2.f32 %v2270_v61  ;;  %v7302_v15 = vld [vmem:[#allocation21_spill] sm:$0xff] }
 0x8a5   :  { %3976 = vrcp.f32 %v2295_v40  ;;  %v2219_v21 = vpop.f32.mrf.mxu1  ;;  %v1979_v27 = vadd.f32 1.0, %v3971_v31  ;;  %v3973_v39 = vpop.eup %3972 }
 0x8a6   :  { %3978 = vpow2.f32 %v1955_v9  ;;  %v2220_v18 = vadd.f32 %v2219_v21, %v7291_v60  ;;  %v6230_v62 = vadd.f32 %v2326_v6, %v2009_v42  ;;  %v2010_v9 = vmul.f32 %v3973_v39, %v7302_v15  ;;  %v7307_v15 = vld [vmem:[#allocation83_spill] sm:$0xff] }
 0x8a7   :  { %3980 = vrcp.f32 %v1979_v27 }
 0x8a8   :  { %7300 = vst [vmem:[#allocation35_spill] sm:$0xff] %v6230_v62  ;;  %v2249_v46 = vsub.f32 0.0, %v2220_v18 }
 0x8aa   :  { %v3975_v0 = vpop.eup %3974  ;;  %v2272_v36 = vmul.f32 1.442695, %v2249_v46  ;;  %v7305_v46 = vld [vmem:[#allocation60_spill] sm:$0xff] }
 0x8ab   :  { %v3977_v30 = vpop.eup %3976  ;;  %v2296_v54 = vadd.f32 1.0, %v3975_v0  ;;  %v6232_v32 = vpop.f32.mrf.mxu2  ;;  %v1911_v39 = vadd.f32 %v6140_v8, %v7305_v46 }
 0x8ac   :  { %7301 = vst [vmem:[#allocation39_spill] sm:$0xff] %v6232_v32  ;;  %v3979_v61 = vpop.eup %3978  ;;  %3982 = vpow2.f32 %v2272_v36  ;;  %v2327_v40 = vmul.f32 %v3977_v30, %v7303_v12 }
 0x8ad   :  { %3984 = vrcp.f32 %v2296_v54  ;;  %v2222_v42 = vpop.f32.mrf.mxu1  ;;  %v1980_v6 = vadd.f32 1.0, %v3979_v61  ;;  %v3981_v18 = vpop.eup %3980 }
 0x8ae   :  { %3986 = vpow2.f32 %v1957_v33  ;;  %v2223_v31 = vadd.f32 %v2222_v42, %v7296_v17  ;;  %v6237_v37 = vadd.f32 %v2327_v40, %v2010_v9  ;;  %v2011_v61 = vmul.f32 %v3981_v18, %v7307_v15  ;;  %v7308_v9 = vld [vmem:[#allocation99_spill] sm:$0xff]  ;;  %v7313_v15 = vld [vmem:[#allocation100_spill] sm:$0xff] }
 0x8af   :  { %3988 = vrcp.f32 %v1980_v6  ;;  %v1935_v42 = vsub.f32 0.0, %v1911_v39 }
 0x8b0   :  { %7304 = vst [vmem:[#allocation13_spill] sm:$0xff] %v6237_v37  ;;  %v2250_v21 = vsub.f32 0.0, %v2223_v31  ;;  %2725 = vmatmul.bf16.gmra.mxu1 %v4304_v25  ;;  %v7312_v37 = vld [vmem:[#allocation28_spill] sm:$0xff] }
 0x8b1   :  { %v1961_v16 = vmul.f32 1.442695, %v1935_v42 }
 0x8b2   :  { %v3983_v27 = vpop.eup %3982  ;;  %v2274_v0 = vmul.f32 1.442695, %v2250_v21 }
 0x8b3   :  { %v3985_v36 = vpop.eup %3984  ;;  %v2297_v33 = vadd.f32 1.0, %v3983_v27  ;;  %v6244_v30 = vpop.f32.mrf.mxu2 }
 0x8b4   :  { %7306 = vst [vmem:[#allocation64_spill] sm:$0xff] %v6244_v30  ;;  %v3987_v54 = vpop.eup %3986  ;;  %v2328_v12 = vmul.f32 %v3985_v36, %v7308_v9  ;;  %3990 = vpow2.f32 %v2274_v0 }
 0x8b5   :  { %3992 = vrcp.f32 %v2297_v33  ;;  %v6248_v40 = vpop.f32.mrf.mxu1  ;;  %v1981_v25 = vadd.f32 1.0, %v3987_v54  ;;  %v3989_v8 = vpop.eup %3988 }
 0x8b6   :  { %7309 = vst [vmem:[#allocation62_spill] sm:$0xff] %v6248_v40  ;;  %v6250_v31 = vadd.f32 %v2328_v12, %v2011_v61  ;;  %v2012_v18 = vmul.f32 %v3989_v8, %v7312_v37  ;;  %v4305_v61 = vld [vmem:[%s6771_s2 + $0x28] sm:$0xff]  ;;  %v7315_v12 = vld [vmem:[#allocation52_spill] sm:$0xff] }
 0x8b7   :  { %3994 = vrcp.f32 %v1981_v25  ;;  %v1916_v42 = vadd.f32 %v6152_v13, %v7315_v12 }
 0x8b8   :  { %7310 = vst [vmem:[#allocation69_spill] sm:$0xff] %v6250_v31 }
 0x8ba   :  { %v3991_v21 = vpop.eup %3990 }
 0x8bb   :  { %v3993_v6 = vpop.eup %3992  ;;  %v2298_v27 = vadd.f32 1.0, %v3991_v21  ;;  %v6252_v14 = vpop.f32.mrf.mxu2 }
 0x8bc   :  { %7311 = vst [vmem:[#allocation66_spill] sm:$0xff] %v6252_v14  ;;  %v2329_v36 = vmul.f32 %v3993_v6, %v7313_v15 }
 0x8bd   :  { %3996 = vrcp.f32 %v2298_v27  ;;  %v2227_v0 = vpop.f32.mrf.mxu1  ;;  %v3995_v9 = vpop.eup %3994  ;;  %v7318_v27 = vld [vmem:[#allocation101_spill] sm:$0xff] }
 0x8be   :  { %3998 = vpow2.f32 %v1961_v16  ;;  %v2228_v39 = vadd.f32 %v2227_v0, %v7305_v46  ;;  %v6257_v33 = vadd.f32 %v2329_v36, %v2012_v18  ;;  %v7317_v16 = vld [vmem:[#allocation32_spill] sm:$0xff]  ;;  %v1937_v36 = vsub.f32 0.0, %v1916_v42 }
 0x8bf   :  { %v2013_v6 = vmul.f32 %v3995_v9, %v7317_v16 }
 0x8c0   :  { %7314 = vst [vmem:[#allocation71_spill] sm:$0xff] %v6257_v33  ;;  %v2252_v54 = vsub.f32 0.0, %v2228_v39  ;;  %2730 = vmatmul.bf16.gmra.mxu1 %v4305_v61  ;;  %v1965_v33 = vmul.f32 1.442695, %v1937_v36 }
 0x8c2   :  { %v2278_v37 = vmul.f32 1.442695, %v2252_v54 }
 0x8c3   :  { %v3997_v25 = vpop.eup %3996  ;;  %v6264_v8 = vpop.f32.mrf.mxu2 }
 0x8c4   :  { %7316 = vst [vmem:[#allocation93_spill] sm:$0xff] %v6264_v8  ;;  %v3999_v21 = vpop.eup %3998  ;;  %v2330_v18 = vmul.f32 %v3997_v25, %v7318_v27  ;;  %4000 = vpow2.f32 %v2278_v37  ;;  %v4306_v37 = vld [vmem:[%s6771_s2 + $0x30] sm:$0xff] }
 0x8c5   :  { %v6268_v15 = vpop.f32.mrf.mxu1  ;;  %v1983_v39 = vadd.f32 1.0, %v3999_v21  ;;  %v7322_v25 = vld [vmem:[#allocation51_spill] sm:$0xff] }
 0x8c6   :  { %7319 = vst [vmem:[#allocation59_spill] sm:$0xff] %v6268_v15  ;;  %v6270_v0 = vadd.f32 %v2330_v18, %v2013_v6  ;;  %v1921_v21 = vadd.f32 %v6160_v63, %v7322_v25 }
 0x8c7   :  { %4002 = vrcp.f32 %v1983_v39  ;;  %v7324_v39 = vld [vmem:[#allocation86_spill] sm:$0xff] }
 0x8c8   :  { %7320 = vst [vmem:[#allocation8_spill] sm:$0xff] %v6270_v0 }
 0x8ca   :  { %v4001_v61 = vpop.eup %4000 }
 0x8cb   :  { %v2300_v13 = vadd.f32 1.0, %v4001_v61  ;;  %v6272_v54 = vpop.f32.mrf.mxu2 }
 0x8cc   :  { %7321 = vst [vmem:[#allocation43_spill] sm:$0xff] %v6272_v54 }
 0x8cd   :  { %4004 = vrcp.f32 %v2300_v13  ;;  %v2232_v31 = vpop.f32.mrf.mxu1  ;;  %v4003_v42 = vpop.eup %4002 }
 0x8ce   :  { %4006 = vpow2.f32 %v1965_v33  ;;  %v2233_v9 = vadd.f32 %v2232_v31, %v7315_v12  ;;  %v2015_v61 = vmul.f32 %v4003_v42, %v7324_v39  ;;  %v7325_v33 = vld [vmem:[#allocation103_spill] sm:$0xff] }
 0x8d0   :  { %v2254_v16 = vsub.f32 0.0, %v2233_v9  ;;  %2735 = vmatmul.bf16.gmra.mxu1 %v4306_v37  ;;  %v1939_v9 = vsub.f32 0.0, %v1921_v21 }
 0x8d2   :  { %v2282_v6 = vmul.f32 1.442695, %v2254_v16  ;;  %v1969_v15 = vmul.f32 1.442695, %v1939_v9  ;;  %v7331_v9 = vld [vmem:[#allocation105_spill] sm:$0xff] }
 0x8d3   :  { %v4005_v27 = vpop.eup %4004  ;;  %v6280_v18 = vpop.f32.mrf.mxu2 }
 0x8d4   :  { %7323 = vst [vmem:[#allocation57_spill] sm:$0xff] %v6280_v18  ;;  %v4007_v36 = vpop.eup %4006  ;;  %v2332_v13 = vmul.f32 %v4005_v27, %v7325_v33  ;;  %4008 = vpow2.f32 %v2282_v6  ;;  %v4307_v6 = vld [vmem:[%s6771_s2 + $0x38] sm:$0xff] }
 0x8d5   :  { %v6284_v31 = vpop.f32.mrf.mxu1  ;;  %v1985_v37 = vadd.f32 1.0, %v4007_v36 }
 0x8d6   :  { %7326 = vst [vmem:[#allocation76_spill] sm:$0xff] %v6284_v31  ;;  %v6286_v0 = vadd.f32 %v2332_v13, %v2015_v61 }
 0x8d7   :  { %4010 = vrcp.f32 %v1985_v37 }
 0x8d8   :  { %7327 = vst [vmem:[#allocation95_spill] sm:$0xff] %v6286_v0 }
 0x8da   :  { %v4009_v12 = vpop.eup %4008 }
 0x8db   :  { %v2302_v63 = vadd.f32 1.0, %v4009_v12  ;;  %v6288_v16 = vpop.f32.mrf.mxu2  ;;  %v7330_v12 = vld [vmem:[#allocation88_spill] sm:$0xff] }
 0x8dc   :  { %7328 = vst [vmem:[#allocation58_spill] sm:$0xff] %v6288_v16 }
 0x8dd   :  { %4012 = vrcp.f32 %v2302_v63  ;;  %v2237_v46 = vpop.f32.mrf.mxu1  ;;  %v4011_v21 = vpop.eup %4010 }
 0x8de   :  { %4014 = vpow2.f32 %v1969_v15  ;;  %v2238_v42 = vadd.f32 %v2237_v46, %v7322_v25  ;;  %v2017_v13 = vmul.f32 %v4011_v21, %v7330_v12  ;;  %v2435_v21 = vpack.c.bf16 %v6288_v16, %v6280_v18  ;;  %v7335_v12 = vld [vmem:[#allocation74_spill] sm:$0xff] }
 0x8e0   :  { %v2256_v39 = vsub.f32 0.0, %v2238_v42  ;;  %2740 = vmatmul.bf16.gmra.mxu1 %v4307_v6 }
 0x8e2   :  { %v2286_v27 = vmul.f32 1.442695, %v2256_v39 }
 0x8e3   :  { %v4013_v36 = vpop.eup %4012  ;;  %v6294_v61 = vpop.f32.mrf.mxu2 }
 0x8e4   :  { %7329 = vst [vmem:[#allocation79_spill] sm:$0xff] %v6294_v61  ;;  %v4015_v33 = vpop.eup %4014  ;;  %v2334_v37 = vmul.f32 %v4013_v36, %v7331_v9  ;;  %4016 = vpow2.f32 %v2286_v27  ;;  %v2434_v36 = vpack.c.bf16 %v6272_v54, %v6264_v8  ;;  %v7336_v9 = vld [vmem:[#allocation107_spill] sm:$0xff] }
 0x8e5   :  { %v6298_v15 = vpop.f32.mrf.mxu1  ;;  %v1987_v63 = vadd.f32 1.0, %v4015_v33 }
 0x8e6   :  { %7332 = vst [vmem:[#allocation45_spill] sm:$0xff] %v6298_v15  ;;  %v6300_v46 = vadd.f32 %v2334_v37, %v2017_v13  ;;  %v4313_v15 = vld [vmem:[%s6772_s3 + $0x28] sm:$0xff] }
 0x8e7   :  { %4018 = vrcp.f32 %v1987_v63 }
 0x8e8   :  { %7333 = vst [vmem:[#allocation20_spill] sm:$0xff] %v6300_v46  ;;  %v4312_v46 = vld [vmem:[%s6772_s3 + $0x20] sm:$0xff] }
 0x8ea   :  { %v4017_v42 = vpop.eup %4016 }
 0x8eb   :  { %v2304_v0 = vadd.f32 1.0, %v4017_v42  ;;  %v6302_v6 = vpop.f32.mrf.mxu2 }
 0x8ec   :  { %7334 = vst [vmem:[#allocation97_spill] sm:$0xff] %v6302_v6  ;;  %v2436_v39 = vpack.c.bf16 %v6302_v6, %v6294_v61 }
 0x8ed   :  { %4020 = vrcp.f32 %v2304_v0  ;;  %v6306_v25 = vpop.f32.mrf.mxu1  ;;  %v4019_v27 = vpop.eup %4018  ;;  %v2433_v0 = vpack.c.bf16 %v6252_v14, %v6244_v30 }
 0x8ee   :  { %2437 = vmatpush.bf16.msrb.mxu3 %v2436_v39  ;;  %v2019_v13 = vmul.f32 %v4019_v27, %v7335_v12  ;;  %v2432_v39 = vpack.c.bf16 %v6232_v32, %v6225_v26  ;;  %v2430_v27 = vpack.c.bf16 %v6192_v20, %v6183_v41  ;;  %v4308_v12 = vld [vmem:[%s6772_s3] sm:$0xff]  ;;  %v4314_v32 = vld [vmem:[%s6772_s3 + $0x30] sm:$0xff] }
 0x8f2   :  { %2438 = vmatpush.bf16.msrb.mxu3 %v2435_v21  ;;  %v2431_v21 = vpack.c.bf16 %v6213_v57, %v6204_v48 }
 0x8f3   :  { %v4021_v33 = vpop.eup %4020 }
 0x8f4   :  { %v2336_v37 = vmul.f32 %v4021_v33, %v7336_v9 }
 0x8f5   :  { %v6314_v63 = vpop.f32.mrf.mxu1 }
 0x8f6   :  { %v6318_v42 = vadd.f32 %v2336_v37, %v2019_v13  ;;  %2439 = vmatpush.bf16.msrb.mxu3 %v2434_v36  ;;  %v2429_v36 = vpack.c.bf16 %v6175_v19, %v6170_v45  ;;  %v4309_v37 = vld [vmem:[%s6772_s3 + $0x8] sm:$0xff] }
 0x8f8   :  { %7337 = vst [vmem:[#allocation21_spill] sm:$0xff] %v6318_v42  ;;  %v4311_v42 = vld [vmem:[%s6772_s3 + $0x18] sm:$0xff] }
 0x8fa   :  { %2440 = vmatpush.bf16.msrb.mxu3 %v2433_v0 }
 0x8fd   :  { %v6322_v6 = vpop.f32.mrf.mxu1 }
 0x8fe   :  { %2441 = vmatpush.bf16.msrb.mxu3 %v2432_v39 }
 0x902   :  { %2442 = vmatpush.bf16.msrb.mxu3 %v2431_v21  ;;  %v4310_v21 = vld [vmem:[%s6772_s3 + $0x10] sm:$0xff] }
 0x905   :  { %v6328_v33 = vpop.f32.mrf.mxu1 }
 0x906   :  { %7338 = vst [vmem:[#allocation98_spill] sm:$0xff] %v6328_v33  ;;  %2443 = vmatpush.bf16.msrb.mxu3 %v2430_v27 }
 0x90a   :  { %2444 = vmatpush.bf16.msrb.mxu3 %v2429_v36 }
 0x90d   :  { %2445 = vmatmul.bf16.vlgmr.msrb.gmra.mxu3 %v4308_v12  ;;  %v6335_v13 = vpop.f32.mrf.mxu1 }
 0x90e   :  { %7339 = vst [vmem:[#allocation83_spill] sm:$0xff] %v6335_v13 }
 0x915   :  { %v6337_v9 = vpop.f32.mrf.mxu1 }
 0x916   :  { %7340 = vst [vmem:[#allocation99_spill] sm:$0xff] %v6337_v9 }
 0x91d   :  { %2450 = vmatmul.bf16.gmra.mxu3 %v4309_v37  ;;  %v6342_v0 = vpop.f32.mrf.mxu1 }
 0x91e   :  { %7341 = vst [vmem:[#allocation28_spill] sm:$0xff] %v6342_v0 }
 0x925   :  { %v6344_v39 = vpop.f32.mrf.mxu1 }
 0x926   :  { %7342 = vst [vmem:[#allocation100_spill] sm:$0xff] %v6344_v39 }
 0x92d   :  { %2455 = vmatmul.bf16.gmra.mxu3 %v4310_v21  ;;  %v6349_v27 = vpop.f32.mrf.mxu1 }
 0x92e   :  { %7343 = vst [vmem:[#allocation32_spill] sm:$0xff] %v6349_v27 }
 0x935   :  { %v6351_v36 = vpop.f32.mrf.mxu1 }
 0x936   :  { %7344 = vst [vmem:[#allocation101_spill] sm:$0xff] %v6351_v36  ;;  %v2750_v11 = vpack.c.bf16 %v6351_v36, %v6349_v27 }
 0x93d   :  { %2460 = vmatmul.bf16.gmra.mxu3 %v4311_v42  ;;  %v6356_v61 = vpop.f32.mrf.mxu1 }
 0x93e   :  { %7345 = vst [vmem:[#allocation86_spill] sm:$0xff] %v6356_v61 }
 0x945   :  { %v6358_v16 = vpop.f32.mrf.mxu1 }
 0x946   :  { %7346 = vst [vmem:[#allocation103_spill] sm:$0xff] %v6358_v16  ;;  %v2751_v26 = vpack.c.bf16 %v6358_v16, %v6356_v61 }
 0x94d   :  { %2465 = vmatmul.bf16.gmra.mxu3 %v4312_v46  ;;  %v6363_v18 = vpop.f32.mrf.mxu1 }
 0x94e   :  { %7347 = vst [vmem:[#allocation88_spill] sm:$0xff] %v6363_v18 }
 0x955   :  { %v6365_v54 = vpop.f32.mrf.mxu1 }
 0x956   :  { %7348 = vst [vmem:[#allocation105_spill] sm:$0xff] %v6365_v54  ;;  %v2752_v30 = vpack.c.bf16 %v6365_v54, %v6363_v18 }
 0x95d   :  { %2470 = vmatmul.bf16.gmra.mxu3 %v4313_v15  ;;  %v6370_v8 = vpop.f32.mrf.mxu1 }
 0x95e   :  { %7349 = vst [vmem:[#allocation74_spill] sm:$0xff] %v6370_v8 }
 0x965   :  { %v6372_v14 = vpop.f32.mrf.mxu1 }
 0x966   :  { %7350 = vst [vmem:[#allocation107_spill] sm:$0xff] %v6372_v14  ;;  %v2753_v31 = vpack.c.bf16 %v6372_v14, %v6370_v8  ;;  %v4315_v14 = vld [vmem:[%s6772_s3 + $0x38] sm:$0xff] }
 0x968   :  { %2754 = vmatpush.bf16.msra.mxu2 %v2753_v31  ;;  %v2749_v31 = vpack.c.bf16 %v6344_v39, %v6342_v0 }
 0x96c   :  { %2755 = vmatpush.bf16.msra.mxu2 %v2752_v30  ;;  %v2748_v30 = vpack.c.bf16 %v6337_v9, %v6335_v13  ;;  %v7351_v13 = vld [vmem:[#allocation50_spill] sm:$0xff] }
 0x96d   :  { %2475 = vmatmul.bf16.gmra.mxu3 %v4314_v32 }
 0x970   :  { %2756 = vmatpush.bf16.msra.mxu2 %v2751_v26  ;;  %v2747_v26 = vpack.c.bf16 %v6328_v33, %v6322_v6 }
 0x974   :  { %2757 = vmatpush.bf16.msra.mxu2 %v2750_v11  ;;  %v2746_v11 = vpack.c.bf16 %v6314_v63, %v6306_v25 }
 0x978   :  { %2758 = vmatpush.bf16.msra.mxu2 %v2749_v31 }
 0x97c   :  { %2759 = vmatpush.bf16.msra.mxu2 %v2748_v30 }
 0x97d   :  { %2480 = vmatmul.bf16.gmra.mxu3 %v4315_v14 }
 0x980   :  { %2760 = vmatpush.bf16.msra.mxu2 %v2747_v26 }
 0x984   :  { %2761 = vmatpush.bf16.msra.mxu2 %v2746_v11 }
 0x987   :  { %2762 = vmatmul.bf16.vlgmr.msra.gmra.mxu2 %v4308_v12 }
 0x990   :  { %v6396_v8 = vpop.f32.mrf.mxu3 }
 0x997   :  { %2767 = vmatmul.bf16.gmra.mxu2 %v4309_v37 }
 0x998   :  { %v6398_v31 = vpop.f32.mrf.mxu3 }
 0x9a0   :  { %v2451_v30 = vpop.f32.mrf.mxu3 }
 0x9a7   :  { %2772 = vmatmul.bf16.gmra.mxu2 %v4310_v21 }
 0x9a8   :  { %v2453_v54 = vpop.f32.mrf.mxu3 }
 0x9b0   :  { %v2456_v18 = vpop.f32.mrf.mxu3 }
 0x9b7   :  { %2777 = vmatmul.bf16.gmra.mxu2 %v4311_v42 }
 0x9b8   :  { %v2458_v16 = vpop.f32.mrf.mxu3 }
 0x9c0   :  { %v2461_v61 = vpop.f32.mrf.mxu3 }
 0x9c7   :  { %2782 = vmatmul.bf16.gmra.mxu2 %v4312_v46 }
 0x9c8   :  { %v2463_v36 = vpop.f32.mrf.mxu3 }
 0x9d0   :  { %v2466_v26 = vpop.f32.mrf.mxu3 }
 0x9d1   :  { %v2467_v33 = vadd.f32 %v2466_v26, %v4956_v5 }
 0x9d7   :  { %2787 = vmatmul.bf16.gmra.mxu2 %v4313_v15 }
 0x9d8   :  { %v2468_v27 = vpop.f32.mrf.mxu3 }
 0x9e0   :  { %v2471_v39 = vpop.f32.mrf.mxu3 }
 0x9e7   :  { %2792 = vmatmul.bf16.gmra.mxu2 %v4314_v32 }
 0x9e8   :  { %v2473_v12 = vpop.f32.mrf.mxu3 }
 0x9e9   :  { %v2474_v48 = vadd.f32 %v2473_v12, %v7351_v13 }
 0x9eb   :  { %v2497_v2 = vmax.f32 %v2474_v48, 0.0 }
 0x9f0   :  { %v2476_v11 = vpop.f32.mrf.mxu3 }
 0x9f1   :  { %v2477_v46 = vadd.f32 %v2476_v11, %v4939_v56 }
 0x9f3   :  { %v2498_v17 = vmax.f32 %v2477_v46, 0.0 }
 0x9f7   :  { %2797 = vmatmul.bf16.gmra.mxu2 %v4315_v14  ;;  %v2472_v14 = vadd.f32 %v2471_v39, %v4945_v35 }
 0x9f8   :  { %v2478_v37 = vpop.f32.mrf.mxu3 }
 0x9f9   :  { %v2479_v9 = vadd.f32 %v2478_v37, %v7140_v55  ;;  %v2496_v11 = vmax.f32 %v2472_v14, 0.0  ;;  %v2452_v14 = vadd.f32 %v2451_v30, %v4991_v24 }
 0x9fb   :  { %v2499_v32 = vmax.f32 %v2479_v9, 0.0  ;;  %v2464_v9 = vadd.f32 %v2463_v36, %v4971_v59  ;;  %v2507_v12 = vpack.c.bf16 %v2497_v2, %v2496_v11  ;;  %v2454_v36 = vadd.f32 %v2453_v54, %v4999_v58 }
 0x9fc   :  { %v2488_v11 = vmax.f32 %v2452_v14, 0.0 }
 0x9fd   :  { %v2508_v20 = vpack.c.bf16 %v2499_v32, %v2498_v17  ;;  %v2459_v17 = vadd.f32 %v2458_v16, %v4989_v51 }
 0x9ff   :  { %v2491_v2 = vmax.f32 %v2459_v17, 0.0 }
 0xa00   :  { %v2481_v0 = vpop.f32.mrf.mxu3 }
 0xa01   :  { %v2482_v57 = vadd.f32 %v2481_v0, %v7260_v43  ;;  %v2469_v0 = vadd.f32 %v2468_v27, %v4962_v23  ;;  %v2494_v27 = vmax.f32 %v2467_v33, 0.0  ;;  %v2449_v33 = vadd.f32 %v6398_v31, %v5005_v3 }
 0xa03   :  { %v2500_v40 = vmax.f32 %v2482_v57, 0.0 }
 0xa08   :  { %v2483_v21 = vpop.f32.mrf.mxu3 }
 0xa09   :  { %v2484_v42 = vadd.f32 %v2483_v21, %v7261_v1 }
 0xa0a   :  { %v2763_v62 = vpop.f32.mrf.mxu2 }
 0xa0b   :  { %v2501_v15 = vmax.f32 %v2484_v42, 0.0  ;;  %v2764_v37 = vadd.f32 %v2763_v62, %v5007_v38  ;;  %v2493_v62 = vmax.f32 %v2464_v9, 0.0 }
 0xa0d   :  { %v2509_v7 = vpack.c.bf16 %v2501_v15, %v2500_v40  ;;  %v2495_v40 = vmax.f32 %v2469_v0, 0.0  ;;  %v2803_v39 = vmax.f32 %v2764_v37, 0.0  ;;  %v2457_v15 = vadd.f32 %v2456_v18, %v4977_v44 }
 0xa0e   :  { %v2489_v0 = vmax.f32 %v2454_v36, 0.0  ;;  %v2447_v18 = vadd.f32 %v6396_v8, %v5007_v38 }
 0xa0f   :  { %2510 = vmatpush.bf16.msrb.mxu0 %v2509_v7  ;;  %v2462_v7 = vadd.f32 %v2461_v61, %v4973_v47  ;;  %v2506_v26 = vpack.c.bf16 %v2495_v40, %v2494_v27  ;;  %v2490_v61 = vmax.f32 %v2457_v15, 0.0 }
 0xa10   :  { %v2503_v40 = vpack.c.bf16 %v2489_v0, %v2488_v11 }
 0xa11   :  { %v2504_v37 = vpack.c.bf16 %v2491_v2, %v2490_v61  ;;  %v4319_v61 = vld [vmem:[%s6774_s5 + $0x18] sm:$0xff] }
 0xa12   :  { %v2765_v21 = vpop.f32.mrf.mxu2 }
 0xa13   :  { %v2766_v57 = vadd.f32 %v2765_v21, %v5005_v3  ;;  %2511 = vmatpush.bf16.msrb.mxu0 %v2508_v20  ;;  %v2492_v20 = vmax.f32 %v2462_v7, 0.0 }
 0xa15   :  { %v2804_v42 = vmax.f32 %v2766_v57, 0.0  ;;  %v2505_v32 = vpack.c.bf16 %v2493_v62, %v2492_v20  ;;  %v2487_v57 = vmax.f32 %v2449_v33, 0.0  ;;  %v4317_v62 = vld [vmem:[%s6774_s5 + $0x8] sm:$0xff] }
 0xa17   :  { %v6412_v48 = vpack.c.bf16 %v2804_v42, %v2803_v39  ;;  %2512 = vmatpush.bf16.msrb.mxu0 %v2507_v12  ;;  %v2486_v12 = vmax.f32 %v2447_v18, 0.0 }
 0xa19   :  { %v2502_v3 = vpack.c.bf16 %v2487_v57, %v2486_v12 }
 0xa1a   :  { %v2768_v46 = vpop.f32.mrf.mxu2 }
 0xa1b   :  { %2513 = vmatpush.bf16.msrb.mxu0 %v2506_v26  ;;  %v2769_v16 = vadd.f32 %v2768_v46, %v4991_v24  ;;  %v6429_v24 = vld [vmem:[%s6774_s5] sm:$0xff] }
 0xa1d   :  { %v2805_v9 = vmax.f32 %v2769_v16, 0.0 }
 0xa1f   :  { %2514 = vmatpush.bf16.msrb.mxu0 %v2505_v32 }
 0xa22   :  { %v2770_v21 = vpop.f32.mrf.mxu2 }
 0xa23   :  { %v2771_v54 = vadd.f32 %v2770_v21, %v4999_v58  ;;  %2515 = vmatpush.bf16.msrb.mxu0 %v2504_v37  ;;  %v4321_v37 = vld [vmem:[%s6774_s5 + $0x28] sm:$0xff] }
 0xa25   :  { %v2806_v30 = vmax.f32 %v2771_v54, 0.0 }
 0xa27   :  { %v6424_v39 = vpack.c.bf16 %v2806_v30, %v2805_v9  ;;  %2516 = vmatpush.bf16.msrb.mxu0 %v2503_v40 }
 0xa2a   :  { %v2773_v31 = vpop.f32.mrf.mxu2 }
 0xa2b   :  { %2517 = vmatpush.bf16.msrb.mxu0 %v2502_v3  ;;  %v2774_v58 = vadd.f32 %v2773_v31, %v4977_v44 }
 0xa2d   :  { %v2807_v42 = vmax.f32 %v2774_v58, 0.0 }
 0xa2e   :  { %2518 = vmatmul.bf16.vlgmr.msrb.gmra.mxu0 %v6429_v24 }
 0xa32   :  { %v2775_v38 = vpop.f32.mrf.mxu2 }
 0xa33   :  { %v2776_v8 = vadd.f32 %v2775_v38, %v4989_v51  ;;  %v4318_v51 = vld [vmem:[%s6774_s5 + $0x10] sm:$0xff] }
 0xa35   :  { %v2808_v7 = vmax.f32 %v2776_v8, 0.0 }
 0xa37   :  { %v2821_v27 = vpack.c.bf16 %v2808_v7, %v2807_v42 }
 0xa3a   :  { %v2778_v17 = vpop.f32.mrf.mxu2 }
 0xa3b   :  { %v2779_v26 = vadd.f32 %v2778_v17, %v4973_v47 }
 0xa3d   :  { %v2809_v20 = vmax.f32 %v2779_v26, 0.0 }
 0xa3e   :  { %2523 = vmatmul.bf16.gmra.mxu0 %v4317_v62 }
 0xa42   :  { %v2780_v46 = vpop.f32.mrf.mxu2 }
 0xa43   :  { %v2781_v15 = vadd.f32 %v2780_v46, %v4971_v59  ;;  %v4320_v59 = vld [vmem:[%s6774_s5 + $0x20] sm:$0xff] }
 0xa45   :  { %v2810_v36 = vmax.f32 %v2781_v15, 0.0 }
 0xa47   :  { %v2822_v44 = vpack.c.bf16 %v2810_v36, %v2809_v20  ;;  %v7352_v20 = vld [vmem:[#allocation63_spill] sm:$0xff] }
 0xa4a   :  { %v2783_v2 = vpop.f32.mrf.mxu2 }
 0xa4e   :  { %2528 = vmatmul.bf16.gmra.mxu0 %v4318_v51 }
 0xa52   :  { %v2785_v32 = vpop.f32.mrf.mxu2 }
 0xa53   :  { %v2786_v38 = vadd.f32 %v2785_v32, %v4962_v23  ;;  %v4323_v23 = vld [vmem:[%s6774_s5 + $0x38] sm:$0xff] }
 0xa5a   :  { %v2788_v14 = vpop.f32.mrf.mxu2 }
 0xa5b   :  { %v2789_v31 = vadd.f32 %v2788_v14, %v4945_v35  ;;  %v7356_v14 = vld [vmem:[#allocation14_spill] sm:$0xff] }
 0xa5d   :  { %v2813_v42 = vmax.f32 %v2789_v31, 0.0  ;;  %v7358_v31 = vld [vmem:[#allocation26_spill] sm:$0xff] }
 0xa5e   :  { %2533 = vmatmul.bf16.gmra.mxu0 %v4319_v61 }
 0xa62   :  { %v2790_v47 = vpop.f32.mrf.mxu2 }
 0xa63   :  { %v2791_v40 = vadd.f32 %v2790_v47, %v7351_v13 }
 0xa6a   :  { %v2793_v33 = vpop.f32.mrf.mxu2 }
 0xa6b   :  { %v2794_v57 = vadd.f32 %v2793_v33, %v4939_v56  ;;  %v4322_v56 = vld [vmem:[%s6774_s5 + $0x30] sm:$0xff] }
 0xa6d   :  { %v2815_v58 = vmax.f32 %v2794_v57, 0.0 }
 0xa6e   :  { %2538 = vmatmul.bf16.gmra.mxu0 %v4320_v59 }
 0xa72   :  { %v2795_v0 = vpop.f32.mrf.mxu2 }
 0xa73   :  { %v2796_v11 = vadd.f32 %v2795_v0, %v7140_v55  ;;  %v2784_v55 = vadd.f32 %v2783_v2, %v4956_v5  ;;  %v7354_v2 = vld [vmem:[#allocation54_spill] sm:$0xff] }
 0xa75   :  { %v2816_v12 = vmax.f32 %v2796_v11, 0.0  ;;  %v2811_v7 = vmax.f32 %v2784_v55, 0.0 }
 0xa77   :  { %v2825_v8 = vpack.c.bf16 %v2816_v12, %v2815_v58  ;;  %v957_v58 = vadd.f32 %v7358_v31, %v7352_v20 }
 0xa7a   :  { %v2798_v16 = vpop.f32.mrf.mxu2 }
 0xa7b   :  { %v2799_v21 = vadd.f32 %v2798_v16, %v7260_v43  ;;  %v2814_v43 = vmax.f32 %v2791_v40, 0.0 }
 0xa7d   :  { %v2817_v9 = vmax.f32 %v2799_v21, 0.0  ;;  %v2824_v13 = vpack.c.bf16 %v2814_v43, %v2813_v42 }
 0xa7e   :  { %2543 = vmatmul.bf16.gmra.mxu0 %v4321_v37 }
 0xa82   :  { %v2800_v18 = vpop.f32.mrf.mxu2 }
 0xa83   :  { %v2801_v54 = vadd.f32 %v2800_v18, %v7261_v1  ;;  %v2812_v1 = vmax.f32 %v2786_v38, 0.0 }
 0xa85   :  { %v2818_v30 = vmax.f32 %v2801_v54, 0.0  ;;  %v2823_v35 = vpack.c.bf16 %v2812_v1, %v2811_v7 }
 0xa87   :  { %v2826_v3 = vpack.c.bf16 %v2818_v30, %v2817_v9 }
 0xa89   :  { %2827 = vmatpush.bf16.msra.mxu3 %v2826_v3 }
 0xa8d   :  { %2828 = vmatpush.bf16.msra.mxu3 %v2825_v8 }
 0xa8e   :  { %2548 = vmatmul.bf16.gmra.mxu0 %v4322_v56 }
 0xa91   :  { %2829 = vmatpush.bf16.msra.mxu3 %v2824_v13 }
 0xa95   :  { %2830 = vmatpush.bf16.msra.mxu3 %v2823_v35 }
 0xa99   :  { %2831 = vmatpush.bf16.msra.mxu3 %v2822_v44 }
 0xa9d   :  { %2832 = vmatpush.bf16.msra.mxu3 %v2821_v27 }
 0xa9e   :  { %2553 = vmatmul.bf16.gmra.mxu0 %v4323_v23 }
 0xaa1   :  { %2833 = vmatpush.bf16.msra.mxu3 %v6424_v39  ;;  %v7353_v39 = vld [vmem:[#allocation53_spill] sm:$0xff] }
 0xaa2   :  { %v640_v36 = vadd.f32 %v7353_v39, %v7352_v20 }
 0xaa5   :  { %2834 = vmatpush.bf16.msra.mxu3 %v6412_v48 }
 0xaa8   :  { %2835 = vmatmul.bf16.vlgmr.msra.gmra.mxu3 %v6429_v24 }
 0xaab   :  { %v2519_v5 = vpop.f32.mrf.mxu0 }
 0xaac   :  { %v2520_v46 = vadd.f32 %v2519_v5, %v7275_v52  ;;  %v7359_v5 = vld [vmem:[#allocation16_spill] sm:$0xff] }
 0xaae   :  { %v2559_v15 = vsub.f32 0.0, %v2520_v46 }
 0xab0   :  { %v2575_v44 = vmul.f32 1.442695, %v2559_v15 }
 0xab2   :  { %4022 = vpow2.f32 %v2575_v44 }
 0xab3   :  { %v2521_v17 = vpop.f32.mrf.mxu0 }
 0xab4   :  { %v2522_v24 = vadd.f32 %v2521_v17, %v7276_v34  ;;  %v962_v17 = vadd.f32 %v7359_v5, %v7354_v2 }
 0xab8   :  { %2840 = vmatmul.bf16.gmra.mxu3 %v4317_v62  ;;  %v666_v62 = vsub.f32 0.0, %v640_v36  ;;  %v4023_v30 = vpop.eup %4022 }
 0xab9   :  { %v2607_v43 = vadd.f32 1.0, %v4023_v30 }
 0xaba   :  { %v691_v16 = vmul.f32 1.442695, %v666_v62  ;;  %v985_v62 = vsub.f32 0.0, %v962_v17 }
 0xabb   :  { %v2524_v27 = vpop.f32.mrf.mxu0 }
 0xabc   :  { %v2525_v54 = vadd.f32 %v2524_v27, %v7278_v53  ;;  %4024 = vpow2.f32 %v691_v16 }
 0xac2   :  { %v4025_v55 = vpop.eup %4024 }
 0xac3   :  { %v2526_v26 = vpop.f32.mrf.mxu0  ;;  %v714_v27 = vadd.f32 1.0, %v4025_v55 }
 0xac4   :  { %v2527_v13 = vadd.f32 %v2526_v26, %v7279_v49 }
 0xac6   :  { %v2562_v36 = vsub.f32 0.0, %v2527_v13 }
 0xac8   :  { %2845 = vmatmul.bf16.gmra.mxu3 %v4318_v51  ;;  %v7355_v51 = vld [vmem:[#allocation56_spill] sm:$0xff] }
 0xac9   :  { %v645_v32 = vadd.f32 %v7355_v51, %v7354_v2 }
 0xacb   :  { %v2529_v48 = vpop.f32.mrf.mxu0 }
 0xad3   :  { %v6478_v9 = vpop.f32.mrf.mxu0 }
 0xad8   :  { %2850 = vmatmul.bf16.gmra.mxu3 %v4319_v61  ;;  %v7357_v61 = vld [vmem:[#allocation61_spill] sm:$0xff] }
 0xad9   :  { %v650_v47 = vadd.f32 %v7357_v61, %v7356_v14 }
 0xadb   :  { %v670_v18 = vsub.f32 0.0, %v650_v47  ;;  %v2581_v47 = vmul.f32 1.442695, %v2562_v36 }
 0xadd   :  { %v699_v12 = vmul.f32 1.442695, %v670_v18 }
 0xae8   :  { %2855 = vmatmul.bf16.gmra.mxu3 %v4320_v59  ;;  %v2560_v59 = vsub.f32 0.0, %v2522_v24 }
 0xaea   :  { %v2577_v11 = vmul.f32 1.442695, %v2560_v59 }
 0xaf8   :  { %2860 = vmatmul.bf16.gmra.mxu3 %v4321_v37  ;;  %v668_v37 = vsub.f32 0.0, %v645_v32 }
 0xafa   :  { %v695_v40 = vmul.f32 1.442695, %v668_v37  ;;  %v7360_v37 = vld [vmem:[#allocation12_spill] sm:$0xff] }
 0xb08   :  { %2865 = vmatmul.bf16.gmra.mxu3 %v4322_v56  ;;  %v983_v56 = vsub.f32 0.0, %v957_v58 }
 0xb0a   :  { %v1008_v39 = vmul.f32 1.442695, %v983_v56 }
 0xb18   :  { %2870 = vmatmul.bf16.gmra.mxu3 %v4323_v23 }
 0xb2b   :  { %v2836_v33 = vpop.f32.mrf.mxu3 }
 0xb2c   :  { %v2837_v0 = vadd.f32 %v2836_v33, %v7275_v52  ;;  %v2561_v52 = vsub.f32 0.0, %v2525_v54  ;;  %v2530_v33 = vadd.f32 %v2529_v48, %v7280_v4  ;;  %v1012_v54 = vmul.f32 1.442695, %v985_v62  ;;  %v7365_v62 = vld [vmem:[#allocation6_spill] sm:$0xff] }
 0xb2e   :  { %v2876_v21 = vsub.f32 0.0, %v2837_v0  ;;  %v2579_v1 = vmul.f32 1.442695, %v2561_v52  ;;  %v2563_v31 = vsub.f32 0.0, %v2530_v33 }
 0xb30   :  { %v2892_v57 = vmul.f32 1.442695, %v2876_v21  ;;  %v7361_v21 = vld [vmem:[#allocation65_spill] sm:$0xff] }
 0xb31   :  { %v655_v18 = vadd.f32 %v7361_v21, %v7360_v37 }
 0xb32   :  { %4026 = vpow2.f32 %v2892_v57 }
 0xb33   :  { %v2838_v3 = vpop.f32.mrf.mxu3  ;;  %4028 = vpow2.f32 %v2577_v11 }
 0xb34   :  { %v2839_v38 = vadd.f32 %v2838_v3, %v7276_v34  ;;  %4030 = vpow2.f32 %v695_v40  ;;  %v6486_v34 = vpop.f32.mrf.mxu0 }
 0xb35   :  { %4032 = vpow2.f32 %v699_v12  ;;  %v7362_v12 = vld [vmem:[#allocation23_spill] sm:$0xff] }
 0xb36   :  { %v2877_v8 = vsub.f32 0.0, %v2839_v38  ;;  %4034 = vrcp.f32 %v2607_v43  ;;  %v967_v3 = vadd.f32 %v7362_v12, %v7356_v14  ;;  %v672_v43 = vsub.f32 0.0, %v655_v18  ;;  %v7366_v12 = vld [vmem:[#allocation70_spill] sm:$0xff] }
 0xb38   :  { %v4027_v42 = vpop.eup %4026  ;;  %v2894_v7 = vmul.f32 1.442695, %v2877_v8 }
 0xb39   :  { %v2924_v35 = vadd.f32 1.0, %v4027_v42  ;;  %v4029_v23 = vpop.eup %4028 }
 0xb3a   :  { %4036 = vpow2.f32 %v2894_v7  ;;  %v4031_v15 = vpop.eup %4030  ;;  %v2608_v24 = vadd.f32 1.0, %v4029_v23  ;;  %v2583_v7 = vmul.f32 1.442695, %v2563_v31  ;;  %v7363_v23 = vld [vmem:[#allocation68_spill] sm:$0xff]  ;;  %v7367_v31 = vld [vmem:[#allocation15_spill] sm:$0xff] }
 0xb3b   :  { %4038 = vrcp.f32 %v2924_v35  ;;  %v2841_v46 = vpop.f32.mrf.mxu3  ;;  %v4033_v26 = vpop.eup %4032  ;;  %v716_v16 = vadd.f32 1.0, %v4031_v15 }
 0xb3c   :  { %4040 = vpow2.f32 %v2579_v1  ;;  %v2842_v44 = vadd.f32 %v2841_v46, %v7278_v53  ;;  %v4035_v32 = vpop.eup %4034  ;;  %v718_v40 = vadd.f32 1.0, %v4033_v26  ;;  %v987_v1 = vsub.f32 0.0, %v967_v3  ;;  %v7364_v46 = vld [vmem:[#allocation49_spill] sm:$0xff] }
 0xb3d   :  { %4042 = vrcp.f32 %v714_v27  ;;  %v2639_v57 = vmul.f32 %v4035_v32, %v6170_v45  ;;  %v6499_v45 = vpop.f32.mrf.mxu0  ;;  %v703_v27 = vmul.f32 1.442695, %v672_v43  ;;  %v1274_v15 = vadd.f32 %v7364_v46, %v7352_v20 }
 0xb3e   :  { %v2878_v51 = vsub.f32 0.0, %v2842_v44  ;;  %4044 = vpow2.f32 %v1008_v39 }
 0xb3f   :  { %4046 = vrcp.f32 %v2608_v24 }
 0xb40   :  { %v4037_v61 = vpop.eup %4036  ;;  %v2896_v59 = vmul.f32 1.442695, %v2878_v51  ;;  %v1279_v51 = vadd.f32 %v7365_v62, %v7354_v2 }
 0xb41   :  { %v4039_v0 = vpop.eup %4038  ;;  %v2925_v11 = vadd.f32 1.0, %v4037_v61 }
 0xb42   :  { %v4041_v53 = vpop.eup %4040  ;;  %v2956_v30 = vmul.f32 %v4039_v0, %v6306_v25  ;;  %4048 = vpow2.f32 %v2896_v59 }
 0xb43   :  { %4050 = vrcp.f32 %v2925_v11  ;;  %v2843_v48 = vpop.f32.mrf.mxu3  ;;  %v6497_v38 = vpop.eup %4042  ;;  %v2609_v8 = vadd.f32 1.0, %v4041_v53  ;;  %v1302_v53 = vsub.f32 0.0, %v1279_v51 }
 0xb44   :  { %4052 = vpow2.f32 %v2581_v47  ;;  %v2844_v58 = vadd.f32 %v2843_v48, %v7279_v49  ;;  %v3020_v52 = vadd.f32 %v2956_v30, %v2639_v57  ;;  %v4045_v25 = vpop.eup %4044  ;;  %v2532_v49 = vadd.f32 %v6478_v9, %v7283_v50 }
 0xb45   :  { %4054 = vrcp.f32 %v716_v16  ;;  %v4047_v56 = vpop.eup %4046  ;;  %v1031_v36 = vadd.f32 1.0, %v4045_v25  ;;  %v1016_v9 = vmul.f32 1.442695, %v987_v1 }
 0xb46   :  { %4056 = vpow2.f32 %v1012_v54  ;;  %v2879_v55 = vsub.f32 0.0, %v2844_v58  ;;  %v3052_v42 = vadd.f32 %v3020_v52, %v6188_v28  ;;  %v2640_v26 = vmul.f32 %v4047_v56, %v6175_v19  ;;  %v6519_v54 = vpop.f32.mrf.mxu0  ;;  %v7368_v56 = vld [vmem:[#allocation7_spill] sm:$0xff] }
 0xb47   :  { %4058 = vrcp.f32 %v718_v40  ;;  %v2564_v47 = vsub.f32 0.0, %v2532_v49  ;;  %v972_v58 = vadd.f32 %v7367_v31, %v7360_v37  ;;  %v1284_v1 = vadd.f32 %v7368_v56, %v7356_v14  ;;  %v7373_v31 = vld [vmem:[#allocation9_spill] sm:$0xff] }
 0xb48   :  { %v4049_v13 = vpop.eup %4048  ;;  %v2898_v35 = vmul.f32 1.442695, %v2879_v55  ;;  %v6505_v5 = vadd.f32 %v3052_v42, %v7363_v23  ;;  %4060 = vrcp.f32 %v2609_v8  ;;  %v1329_v42 = vmul.f32 1.442695, %v1302_v53 }
 0xb49   :  { %v4051_v17 = vpop.eup %4050  ;;  %v2926_v39 = vadd.f32 1.0, %v4049_v13  ;;  %v2585_v30 = vmul.f32 1.442695, %v2564_v47 }
 0xb4a   :  { %v4053_v28 = vpop.eup %4052  ;;  %v2957_v44 = vmul.f32 %v4051_v17, %v6314_v63  ;;  %4062 = vpow2.f32 %v2898_v35  ;;  %v1300_v63 = vsub.f32 0.0, %v1274_v15  ;;  %v989_v17 = vsub.f32 0.0, %v972_v58 }
 0xb4b   :  { %v6511_v24 = vpop.eup %4054  ;;  %4064 = vrcp.f32 %v2926_v39  ;;  %v2846_v32 = vpop.f32.mrf.mxu3  ;;  %v2610_v16 = vadd.f32 1.0, %v4053_v28  ;;  %v1304_v39 = vsub.f32 0.0, %v1284_v1 }
 0xb4c   :  { %v4057_v61 = vpop.eup %4056  ;;  %4066 = vpow2.f32 %v2583_v7  ;;  %v2847_v33 = vadd.f32 %v2846_v32, %v7280_v4  ;;  %v3021_v59 = vadd.f32 %v2957_v44, %v2640_v26  ;;  %v2535_v4 = vadd.f32 %v6486_v34, %v7287_v22 }
 0xb4d   :  { %v6516_v0 = vpop.eup %4058  ;;  %4068 = vpow2.f32 %v703_v27  ;;  %v1033_v11 = vadd.f32 1.0, %v4057_v61  ;;  %v2537_v44 = vadd.f32 %v6499_v45, %v7291_v60  ;;  %v1333_v45 = vmul.f32 1.442695, %v1304_v39 }
 0xb4e   :  { %4070 = vrcp.f32 %v1031_v36  ;;  %v2880_v19 = vsub.f32 0.0, %v2847_v33  ;;  %v3053_v21 = vadd.f32 %v3021_v59, %v6197_v29  ;;  %v4061_v18 = vpop.eup %4060  ;;  %v1325_v29 = vmul.f32 1.442695, %v1300_v63  ;;  %v6545_v32 = vpop.f32.mrf.mxu0  ;;  %v7370_v33 = vld [vmem:[#allocation98_spill] sm:$0xff] }
 0xb4f   :  { %4072 = vpow2.f32 %v1016_v9  ;;  %v2641_v8 = vmul.f32 %v4061_v18, %v6183_v41  ;;  %v2565_v49 = vsub.f32 0.0, %v2535_v4  ;;  %v7369_v9 = vld [vmem:[#allocation25_spill] sm:$0xff]  ;;  %v7371_v63 = vld [vmem:[#allocation38_spill] sm:$0xff] }
 0xb50   :  { %v4063_v57 = vpop.eup %4062  ;;  %v2900_v40 = vmul.f32 1.442695, %v2880_v19  ;;  %v6524_v3 = vadd.f32 %v3053_v21, %v7366_v12  ;;  %4074 = vrcp.f32 %v2610_v16  ;;  %v7372_v21 = vld [vmem:[#allocation85_spill] sm:$0xff] }
 0xb51   :  { %v4065_v48 = vpop.eup %4064  ;;  %v2927_v52 = vadd.f32 1.0, %v4063_v57  ;;  %v2587_v36 = vmul.f32 1.442695, %v2565_v49  ;;  %v1591_v18 = vadd.f32 %v7372_v21, %v7352_v20  ;;  %v2566_v57 = vsub.f32 0.0, %v2537_v44  ;;  %v7379_v44 = vld [vmem:[#allocation62_spill] sm:$0xff] }
 0xb52   :  { %v4067_v43 = vpop.eup %4066  ;;  %v2958_v25 = vmul.f32 %v4065_v48, %v6322_v6  ;;  %4076 = vpow2.f32 %v2900_v40  ;;  %v3100_v34 = vpack.c.bf16 %v6524_v3, %v6505_v5  ;;  %v3699_v5 = vld [vmem:[%s6776_s7 + $0x20] sm:$0xff]  ;;  %v3700_v3 = vld [vmem:[%s6776_s7 + $0x28] sm:$0xff] }
 0xb53   :  { %v6532_v55 = vpop.eup %4068  ;;  %4078 = vrcp.f32 %v2927_v52  ;;  %v2848_v13 = vpop.f32.mrf.mxu3  ;;  %v2611_v23 = vadd.f32 1.0, %v4067_v43  ;;  %v1617_v43 = vsub.f32 0.0, %v1591_v18 }
 0xb54   :  { %v6536_v7 = vpop.eup %4070  ;;  %4080 = vpow2.f32 %v2585_v30  ;;  %v2849_v41 = vadd.f32 %v2848_v13, %v7283_v50  ;;  %v3022_v35 = vadd.f32 %v2958_v25, %v2641_v8  ;;  %v2589_v25 = vmul.f32 1.442695, %v2566_v57  ;;  %v7375_v13 = vld [vmem:[#allocation29_spill] sm:$0xff] }
 0xb55   :  { %v4073_v6 = vpop.eup %4072  ;;  %4082 = vrcp.f32 %v1033_v11 }
 0xb56   :  { %4084 = vpow2.f32 %v1325_v29  ;;  %v2881_v27 = vsub.f32 0.0, %v2849_v41  ;;  %v3054_v46 = vadd.f32 %v3022_v35, %v6209_v10  ;;  %v4075_v15 = vpop.eup %4074  ;;  %v1035_v51 = vadd.f32 1.0, %v4073_v6  ;;  %v7376_v35 = vld [vmem:[#allocation47_spill] sm:$0xff] }
 0xb57   :  { %4086 = vpow2.f32 %v1329_v42  ;;  %v1020_v10 = vmul.f32 1.442695, %v989_v17  ;;  %v2642_v16 = vmul.f32 %v4075_v15, %v7371_v63  ;;  %v7374_v42 = vld [vmem:[#allocation55_spill] sm:$0xff]  ;;  %v1908_v6 = vadd.f32 %v7376_v35, %v7352_v20 }
 0xb58   :  { %v4077_v28 = vpop.eup %4076  ;;  %v2902_v26 = vmul.f32 1.442695, %v2881_v27  ;;  %v6543_v50 = vadd.f32 %v3054_v46, %v7369_v9  ;;  %4088 = vrcp.f32 %v2611_v23  ;;  %v2540_v56 = vadd.f32 %v6519_v54, %v7374_v42  ;;  %v7377_v27 = vld [vmem:[#allocation82_spill] sm:$0xff]  ;;  %v7378_v15 = vld [vmem:[#allocation83_spill] sm:$0xff]  ;;  %v2544_v9 = vpop.f32.mrf.mxu0 }
 0xb59   :  { %v4079_v62 = vpop.eup %4078  ;;  %v2928_v61 = vadd.f32 1.0, %v4077_v28  ;;  %v1934_v63 = vsub.f32 0.0, %v1908_v6 }
 0xb5a   :  { %v4081_v47 = vpop.eup %4080  ;;  %v2959_v59 = vmul.f32 %v4079_v62, %v7370_v33  ;;  %4090 = vpow2.f32 %v2902_v26  ;;  %v2225_v26 = vadd.f32 %v7379_v44, %v7352_v20 }
 0xb5b   :  { %v6549_v19 = vpop.eup %4082  ;;  %4092 = vrcp.f32 %v2928_v61  ;;  %v2851_v11 = vpop.f32.mrf.mxu3  ;;  %v2612_v12 = vadd.f32 1.0, %v4081_v47  ;;  %v2567_v61 = vsub.f32 0.0, %v2540_v56  ;;  %v7384_v56 = vld [vmem:[#allocation72_spill] sm:$0xff] }
 0xb5c   :  { %v4085_v53 = vpop.eup %4084  ;;  %4094 = vpow2.f32 %v2587_v36  ;;  %v2852_v30 = vadd.f32 %v2851_v11, %v7287_v22  ;;  %v3023_v4 = vadd.f32 %v2959_v59, %v2642_v16  ;;  %v1642_v36 = vmul.f32 1.442695, %v1617_v43 }
 0xb5d   :  { %v4087_v40 = vpop.eup %4086  ;;  %4096 = vrcp.f32 %v1035_v51  ;;  %v1348_v52 = vadd.f32 1.0, %v4085_v53  ;;  %v2251_v11 = vsub.f32 0.0, %v2225_v26  ;;  %v2591_v57 = vmul.f32 1.442695, %v2567_v61  ;;  %v7386_v26 = vld [vmem:[#allocation13_spill] sm:$0xff] }
 0xb5e   :  { %4098 = vpow2.f32 %v1020_v10  ;;  %v2882_v48 = vsub.f32 0.0, %v2852_v30  ;;  %v3055_v58 = vadd.f32 %v3023_v4, %v7373_v31  ;;  %v4089_v29 = vpop.eup %4088  ;;  %v1350_v41 = vadd.f32 1.0, %v4087_v40  ;;  %v7381_v40 = vld [vmem:[#allocation84_spill] sm:$0xff]  ;;  %v7382_v31 = vld [vmem:[#allocation34_spill] sm:$0xff] }
 0xb5f   :  { %4100 = vpow2.f32 %v1333_v45  ;;  %v2643_v46 = vmul.f32 %v4089_v29, %v7377_v27  ;;  %v7380_v45 = vld [vmem:[#allocation35_spill] sm:$0xff]  ;;  %v2542_v30 = vadd.f32 %v6545_v32, %v7352_v20  ;;  %v1959_v43 = vmul.f32 1.442695, %v1934_v63  ;;  %v7385_v32 = vld [vmem:[#allocation48_spill] sm:$0xff] }
 0xb60   :  { %v4091_v8 = vpop.eup %4090  ;;  %v2904_v1 = vmul.f32 1.442695, %v2882_v48  ;;  %v6558_v22 = vadd.f32 %v3055_v58, %v7375_v13  ;;  %4102 = vrcp.f32 %v2612_v12  ;;  %v1596_v58 = vadd.f32 %v7382_v31, %v7354_v2 }
 0xb61   :  { %v4093_v49 = vpop.eup %4092  ;;  %v2929_v23 = vadd.f32 1.0, %v4091_v8  ;;  %v7383_v8 = vld [vmem:[#allocation99_spill] sm:$0xff] }
 0xb62   :  { %v4095_v17 = vpop.eup %4094  ;;  %v2960_v39 = vmul.f32 %v4093_v49, %v7378_v15  ;;  %4104 = vpow2.f32 %v2904_v1  ;;  %v3101_v54 = vpack.c.bf16 %v6558_v22, %v6543_v50  ;;  %v1913_v49 = vadd.f32 %v7385_v32, %v7354_v2  ;;  %v3698_v50 = vld [vmem:[%s6776_s7 + $0x18] sm:$0xff] }
 0xb63   :  { %v6566_v28 = vpop.eup %4096  ;;  %4106 = vrcp.f32 %v2929_v23  ;;  %v2853_v62 = vpop.f32.mrf.mxu3  ;;  %v2613_v59 = vadd.f32 1.0, %v4095_v17  ;;  %v2568_v23 = vsub.f32 0.0, %v2542_v30  ;;  %v1619_v15 = vsub.f32 0.0, %v1596_v58  ;;  %v7389_v30 = vld [vmem:[#allocation10_spill] sm:$0xff]  ;;  %v7391_v58 = vld [vmem:[#allocation59_spill] sm:$0xff]  ;;  %v3702_v22 = vld [vmem:[%s6776_s7 + $0x38] sm:$0xff] }
 0xb64   :  { %v6570_v51 = vpop.eup %4098  ;;  %4108 = vpow2.f32 %v2589_v25  ;;  %v2854_v47 = vadd.f32 %v2853_v62, %v7291_v60  ;;  %v3024_v10 = vadd.f32 %v2960_v39, %v2643_v46 }
 0xb65   :  { %v4101_v33 = vpop.eup %4100  ;;  %4110 = vrcp.f32 %v1348_v52 }
 0xb66   :  { %4112 = vrcp.f32 %v1350_v41  ;;  %v2883_v16 = vsub.f32 0.0, %v2854_v47  ;;  %v3056_v21 = vadd.f32 %v3024_v10, %v7380_v45  ;;  %v4103_v18 = vpop.eup %4102  ;;  %v1352_v48 = vadd.f32 1.0, %v4101_v33  ;;  %v7388_v45 = vld [vmem:[#allocation31_spill] sm:$0xff] }
 0xb67   :  { %4114 = vpow2.f32 %v1642_v36  ;;  %v2644_v1 = vmul.f32 %v4103_v18, %v7384_v56  ;;  %v2276_v41 = vmul.f32 1.442695, %v2251_v11  ;;  %v2546_v36 = vpop.f32.mrf.mxu0  ;;  %v1936_v47 = vsub.f32 0.0, %v1913_v49 }
 0xb68   :  { %v4105_v53 = vpop.eup %4104  ;;  %v2906_v4 = vmul.f32 1.442695, %v2883_v16  ;;  %v6577_v60 = vadd.f32 %v3056_v21, %v7381_v40  ;;  %4116 = vrcp.f32 %v2613_v59  ;;  %v2593_v33 = vmul.f32 1.442695, %v2568_v23  ;;  %v7387_v59 = vld [vmem:[#allocation60_spill] sm:$0xff] }
 0xb69   :  { %v4107_v12 = vpop.eup %4106  ;;  %v2930_v29 = vadd.f32 1.0, %v4105_v53  ;;  %v2545_v63 = vadd.f32 %v2544_v9, %v7387_v59  ;;  %v1646_v11 = vmul.f32 1.442695, %v1619_v15  ;;  %v7390_v40 = vld [vmem:[#allocation28_spill] sm:$0xff]  ;;  %v1963_v9 = vmul.f32 1.442695, %v1936_v47 }
 0xb6a   :  { %v4109_v52 = vpop.eup %4108  ;;  %v2961_v25 = vmul.f32 %v4107_v12, %v7383_v8  ;;  %4118 = vpow2.f32 %v2906_v4 }
 0xb6b   :  { %v6583_v13 = vpop.eup %4110  ;;  %4120 = vrcp.f32 %v2930_v29  ;;  %v2856_v35 = vpop.f32.mrf.mxu3  ;;  %v2614_v39 = vadd.f32 1.0, %v4109_v52  ;;  %v2230_v29 = vadd.f32 %v7391_v58, %v7354_v2  ;;  %v2569_v8 = vsub.f32 0.0, %v2545_v63 }
 0xb6c   :  { %v6587_v6 = vpop.eup %4112  ;;  %4122 = vpow2.f32 %v2591_v57  ;;  %v2857_v17 = vadd.f32 %v2856_v35, %v7374_v42  ;;  %v3025_v27 = vadd.f32 %v2961_v25, %v2644_v1 }
 0xb6d   :  { %v4115_v46 = vpop.eup %4114  ;;  %4124 = vrcp.f32 %v1352_v48  ;;  %v2595_v15 = vmul.f32 1.442695, %v2569_v8  ;;  %v7398_v8 = vld [vmem:[#allocation19_spill] sm:$0xff] }
 0xb6e   :  { %4126 = vpow2.f32 %v1959_v43  ;;  %v2884_v44 = vsub.f32 0.0, %v2857_v17  ;;  %v3057_v62 = vadd.f32 %v3025_v27, %v7386_v26  ;;  %v4117_v61 = vpop.eup %4116  ;;  %v1665_v18 = vadd.f32 1.0, %v4115_v46  ;;  %v7393_v26 = vld [vmem:[#allocation33_spill] sm:$0xff] }
 0xb6f   :  { %4128 = vpow2.f32 %v2276_v41  ;;  %v2645_v4 = vmul.f32 %v4117_v61, %v7389_v30  ;;  %v7392_v41 = vld [vmem:[#allocation69_spill] sm:$0xff]  ;;  %v2253_v17 = vsub.f32 0.0, %v2230_v29  ;;  %v2549_v27 = vpop.f32.mrf.mxu0  ;;  %v7394_v61 = vld [vmem:[#allocation30_spill] sm:$0xff]  ;;  %v7397_v30 = vld [vmem:[#allocation40_spill] sm:$0xff] }
 0xb70   :  { %v4119_v10 = vpop.eup %4118  ;;  %v2908_v16 = vmul.f32 1.442695, %v2884_v44  ;;  %v6593_v42 = vadd.f32 %v3057_v62, %v7388_v45  ;;  %4130 = vrcp.f32 %v2614_v39  ;;  %v2547_v39 = vadd.f32 %v2546_v36, %v7354_v2  ;;  %v7395_v45 = vld [vmem:[#allocation100_spill] sm:$0xff] }
 0xb71   :  { %v4121_v21 = vpop.eup %4120  ;;  %v2931_v53 = vadd.f32 1.0, %v4119_v10  ;;  %v1601_v47 = vadd.f32 %v7394_v61, %v7356_v14  ;;  %v2280_v36 = vmul.f32 1.442695, %v2253_v17  ;;  %v7403_v61 = vld [vmem:[#allocation5_spill] sm:$0xff] }
 0xb72   :  { %v4123_v57 = vpop.eup %4122  ;;  %v2962_v12 = vmul.f32 %v4121_v21, %v7390_v40  ;;  %4132 = vpow2.f32 %v2908_v16  ;;  %v3102_v48 = vpack.c.bf16 %v6593_v42, %v6577_v60  ;;  %v3697_v60 = vld [vmem:[%s6776_s7 + $0x10] sm:$0xff] }
 0xb73   :  { %v6599_v31 = vpop.eup %4124  ;;  %4134 = vrcp.f32 %v2931_v53  ;;  %v2858_v52 = vpop.f32.mrf.mxu3  ;;  %v2615_v32 = vadd.f32 1.0, %v4123_v57 }
 0xb74   :  { %v4127_v43 = vpop.eup %4126  ;;  %4136 = vpow2.f32 %v2593_v33  ;;  %v2859_v25 = vadd.f32 %v2858_v52, %v7352_v20  ;;  %v3026_v56 = vadd.f32 %v2962_v12, %v2645_v4  ;;  %v1063_v4 = vmul.f32 %v6536_v7, %v7397_v30  ;;  %v7400_v7 = vld [vmem:[#allocation67_spill] sm:$0xff] }
 0xb75   :  { %v4129_v1 = vpop.eup %4128  ;;  %4138 = vrcp.f32 %v1665_v18  ;;  %v1982_v10 = vadd.f32 1.0, %v4127_v43  ;;  %v7396_v18 = vld [vmem:[#allocation39_spill] sm:$0xff]  ;;  %v2570_v12 = vsub.f32 0.0, %v2547_v39  ;;  %v1621_v52 = vsub.f32 0.0, %v1601_v47 }
 0xb76   :  { %4140 = vpow2.f32 %v1646_v11  ;;  %v2885_v49 = vsub.f32 0.0, %v2859_v25  ;;  %v3058_v35 = vadd.f32 %v3026_v56, %v7392_v41  ;;  %v4131_v23 = vpop.eup %4130  ;;  %v2299_v16 = vadd.f32 1.0, %v4129_v1  ;;  %v7399_v1 = vld [vmem:[#allocation71_spill] sm:$0xff] }
 0xb77   :  { %4142 = vpow2.f32 %v1963_v9  ;;  %v2646_v11 = vmul.f32 %v4131_v23, %v7396_v18  ;;  %v746_v25 = vmul.f32 %v6497_v38, %v7398_v8  ;;  %v6621_v41 = vadd.f32 %v7400_v7, %v7360_v37  ;;  %v7409_v7 = vld [vmem:[#allocation8_spill] sm:$0xff] }
 0xb78   :  { %v4133_v46 = vpop.eup %4132  ;;  %v2910_v44 = vmul.f32 1.442695, %v2885_v49  ;;  %v6607_v62 = vadd.f32 %v3058_v35, %v7393_v26  ;;  %4144 = vrcp.f32 %v2615_v32  ;;  %v2597_v17 = vmul.f32 1.442695, %v2570_v12 }
 0xb79   :  { %v4135_v20 = vpop.eup %4134  ;;  %v2932_v33 = vadd.f32 1.0, %v4133_v46  ;;  %v7401_v46 = vld [vmem:[#allocation52_spill] sm:$0xff]  ;;  %v1918_v47 = vadd.f32 %v7403_v61, %v7356_v14 }
 0xb7a   :  { %v4137_v63 = vpop.eup %4136  ;;  %v2963_v21 = vmul.f32 %v4135_v20, %v7395_v45  ;;  %4146 = vpow2.f32 %v2910_v44  ;;  %v7402_v44 = vld [vmem:[#allocation22_spill] sm:$0xff]  ;;  %v1650_v20 = vmul.f32 1.442695, %v1621_v52 }
 0xb7b   :  { %v4139_v53 = vpop.eup %4138  ;;  %4148 = vrcp.f32 %v2932_v33  ;;  %v2861_v57 = vpop.f32.mrf.mxu3  ;;  %v2616_v43 = vadd.f32 1.0, %v4137_v63 }
 0xb7c   :  { %v4141_v40 = vpop.eup %4140  ;;  %4150 = vpow2.f32 %v2595_v15  ;;  %v2862_v9 = vadd.f32 %v2861_v57, %v7387_v59  ;;  %v3027_v58 = vadd.f32 %v2963_v21, %v2646_v11  ;;  %v6623_v59 = vadd.f32 %v1063_v4, %v746_v25  ;;  %v7405_v21 = vld [vmem:[#allocation32_spill] sm:$0xff] }
 0xb7d   :  { %v4143_v29 = vpop.eup %4142  ;;  %4152 = vrcp.f32 %v1982_v10  ;;  %v1667_v35 = vadd.f32 1.0, %v4141_v40  ;;  %v2550_v15 = vadd.f32 %v2549_v27, %v7401_v46  ;;  %v2551_v10 = vpop.f32.mrf.mxu0  ;;  %v7406_v57 = vld [vmem:[#allocation76_spill] sm:$0xff]  ;;  %v7407_v40 = vld [vmem:[#allocation90_spill] sm:$0xff]  ;;  %v1938_v25 = vsub.f32 0.0, %v1918_v47  ;;  %v7411_v47 = vld [vmem:[#allocation37_spill] sm:$0xff] }
 0xb7e   :  { %4154 = vrcp.f32 %v2299_v16  ;;  %v2886_v56 = vsub.f32 0.0, %v2862_v9  ;;  %v3059_v32 = vadd.f32 %v3027_v58, %v7399_v1  ;;  %v4145_v49 = vpop.eup %4144  ;;  %v7404_v16 = vld [vmem:[#allocation64_spill] sm:$0xff]  ;;  %v2235_v30 = vadd.f32 %v7406_v57, %v7356_v14  ;;  %v7408_v1 = vld [vmem:[#allocation73_spill] sm:$0xff] }
 0xb7f   :  { %4156 = vpow2.f32 %v2280_v36  ;;  %v2647_v45 = vmul.f32 %v4145_v49, %v7404_v16  ;;  %v1984_v36 = vadd.f32 1.0, %v4143_v29  ;;  %v1697_v12 = vmul.f32 %v4139_v53, %v7407_v40  ;;  %v7414_v57 = vld [vmem:[#allocation101_spill] sm:$0xff] }
 0xb80   :  { %v4147_v23 = vpop.eup %4146  ;;  %v2912_v39 = vmul.f32 1.442695, %v2886_v56  ;;  %v6627_v38 = vadd.f32 %v3059_v32, %v7402_v44  ;;  %4158 = vrcp.f32 %v2616_v43  ;;  %v2571_v58 = vsub.f32 0.0, %v2550_v15 }
 0xb81   :  { %v4149_v26 = vpop.eup %4148  ;;  %v2933_v33 = vadd.f32 1.0, %v4147_v23  ;;  %v1380_v29 = vmul.f32 %v6583_v13, %v7408_v1  ;;  %v1306_v32 = vsub.f32 0.0, %v6621_v41  ;;  %v1967_v41 = vmul.f32 1.442695, %v1938_v25 }
 0xb82   :  { %v4151_v63 = vpop.eup %4150  ;;  %v2964_v18 = vmul.f32 %v4149_v26, %v7405_v21  ;;  %4160 = vpow2.f32 %v2912_v39  ;;  %v3103_v27 = vpack.c.bf16 %v6627_v38, %v6607_v62  ;;  %v2255_v39 = vsub.f32 0.0, %v2235_v30  ;;  %v3696_v62 = vld [vmem:[%s6776_s7 + $0x8] sm:$0xff] }
 0xb83   :  { %v4153_v11 = vpop.eup %4152  ;;  %4162 = vrcp.f32 %v2933_v33  ;;  %v2863_v4 = vpop.f32.mrf.mxu3  ;;  %v2617_v56 = vadd.f32 1.0, %v4151_v63  ;;  %v2599_v26 = vmul.f32 1.442695, %v2571_v58  ;;  %v7412_v63 = vld [vmem:[#allocation17_spill] sm:$0xff] }
 0xb84   :  { %v4155_v9 = vpop.eup %4154  ;;  %4164 = vpow2.f32 %v2597_v17  ;;  %v2864_v52 = vadd.f32 %v2863_v4, %v7354_v2  ;;  %v3028_v43 = vadd.f32 %v2964_v18, %v2647_v45  ;;  %v7410_v17 = vld [vmem:[#allocation102_spill] sm:$0xff]  ;;  %v2997_v2 = vadd.f32 %v1697_v12, %v1380_v29  ;;  %v7416_v29 = vld [vmem:[#allocation27_spill] sm:$0xff] }
 0xb85   :  { %v4157_v8 = vpop.eup %4156  ;;  %4166 = vrcp.f32 %v1667_v35  ;;  %v2331_v15 = vmul.f32 %v4155_v9, %v7410_v17  ;;  %v2552_v35 = vadd.f32 %v2551_v10, %v7356_v14  ;;  %v2014_v16 = vmul.f32 %v4153_v11, %v7412_v63  ;;  %v7413_v18 = vld [vmem:[#allocation66_spill] sm:$0xff]  ;;  %v7415_v10 = vld [vmem:[#allocation91_spill] sm:$0xff]  ;;  %v2554_v9 = vpop.f32.mrf.mxu0 }
 0xb86   :  { %4168 = vpow2.f32 %v1650_v20  ;;  %v2887_v49 = vsub.f32 0.0, %v2864_v52  ;;  %v3060_v23 = vadd.f32 %v3028_v43, %v7409_v7  ;;  %v4159_v53 = vpop.eup %4158  ;;  %v2301_v21 = vadd.f32 1.0, %v4157_v8  ;;  %v7419_v63 = vld [vmem:[#allocation11_spill] sm:$0xff] }
 0xb87   :  { %4170 = vrcp.f32 %v1984_v36  ;;  %v2648_v36 = vmul.f32 %v4159_v53, %v7413_v18  ;;  %v1606_v40 = vadd.f32 %v7415_v10, %v7360_v37  ;;  %v2284_v12 = vmul.f32 1.442695, %v2255_v39 }
 0xb88   :  { %v4161_v44 = vpop.eup %4160  ;;  %v2914_v61 = vmul.f32 1.442695, %v2887_v49  ;;  %v6646_v33 = vadd.f32 %v3060_v23, %v7411_v47  ;;  %4172 = vrcp.f32 %v2617_v56  ;;  %v3013_v52 = vadd.f32 %v2331_v15, %v2014_v16  ;;  %v7420_v16 = vld [vmem:[#allocation93_spill] sm:$0xff] }
 0xb89   :  { %v4163_v13 = vpop.eup %4162  ;;  %v2934_v20 = vadd.f32 1.0, %v4161_v44  ;;  %v2572_v25 = vsub.f32 0.0, %v2552_v35  ;;  %v748_v49 = vmul.f32 %v6511_v24, %v7416_v29  ;;  %v3045_v23 = vadd.f32 %v2997_v2, %v6623_v59  ;;  %v7417_v44 = vld [vmem:[#allocation42_spill] sm:$0xff]  ;;  %v7424_v29 = vld [vmem:[#allocation75_spill] sm:$0xff] }
 0xb8a   :  { %v4165_v45 = vpop.eup %4164  ;;  %v2965_v30 = vmul.f32 %v4163_v13, %v7414_v57  ;;  %4174 = vpow2.f32 %v2914_v61  ;;  %v1337_v15 = vmul.f32 1.442695, %v1306_v32  ;;  %v1623_v39 = vsub.f32 0.0, %v1606_v40  ;;  %v7418_v61 = vld [vmem:[#allocation51_spill] sm:$0xff] }
 0xb8b   :  { %v4167_v4 = vpop.eup %4166  ;;  %4176 = vrcp.f32 %v2934_v20  ;;  %v2866_v58 = vpop.f32.mrf.mxu3  ;;  %v2618_v1 = vadd.f32 1.0, %v4165_v45  ;;  %v2601_v35 = vmul.f32 1.442695, %v2572_v25  ;;  %v2555_v47 = vadd.f32 %v2554_v9, %v7418_v61 }
 0xb8c   :  { %v4169_v43 = vpop.eup %4168  ;;  %4178 = vpow2.f32 %v2599_v26  ;;  %v2867_v11 = vadd.f32 %v2866_v58, %v7401_v46  ;;  %v3029_v8 = vadd.f32 %v2965_v30, %v2648_v36  ;;  %v1065_v46 = vmul.f32 %v6549_v19, %v7417_v44  ;;  %v7422_v30 = vld [vmem:[#allocation45_spill] sm:$0xff] }
 0xb8d   :  { %v6654_v56 = vpop.eup %4170  ;;  %4180 = vpow2.f32 %v1967_v41  ;;  %v1669_v20 = vadd.f32 1.0, %v4169_v43  ;;  %v1923_v59 = vadd.f32 %v7419_v63, %v7360_v37  ;;  %v1654_v57 = vmul.f32 1.442695, %v1623_v39  ;;  %v7425_v39 = vld [vmem:[#allocation95_spill] sm:$0xff] }
 0xb8e   :  { %4182 = vrcp.f32 %v2301_v21  ;;  %v2888_v7 = vsub.f32 0.0, %v2867_v11  ;;  %v3061_v53 = vadd.f32 %v3029_v8, %v3013_v52  ;;  %v4173_v17 = vpop.eup %4172  ;;  %v7421_v21 = vld [vmem:[#allocation86_spill] sm:$0xff]  ;;  %v2240_v10 = vadd.f32 %v7422_v30, %v7360_v37 }
 0xb8f   :  { %4184 = vpow2.f32 %v2284_v12  ;;  %v2649_v45 = vmul.f32 %v4173_v17, %v7420_v16  ;;  %v7423_v12 = vld [vmem:[#allocation92_spill] sm:$0xff]  ;;  %v2573_v52 = vsub.f32 0.0, %v2555_v47 }
 0xb90   :  { %v4175_v26 = vpop.eup %4174  ;;  %v2916_v13 = vmul.f32 1.442695, %v2888_v7  ;;  %v6662_v41 = vadd.f32 %v3061_v53, %v3045_v23  ;;  %4186 = vrcp.f32 %v2618_v1  ;;  %v1699_v9 = vmul.f32 %v4167_v4, %v7423_v12  ;;  %v2556_v1 = vpop.f32.mrf.mxu0 }
 0xb91   :  { %v4177_v24 = vpop.eup %4176  ;;  %v2935_v2 = vadd.f32 1.0, %v4175_v26  ;;  %v1382_v7 = vmul.f32 %v6587_v6, %v7424_v29  ;;  %v2983_v23 = vadd.f32 %v1065_v46, %v748_v49  ;;  %v1940_v53 = vsub.f32 0.0, %v1923_v59  ;;  %v7426_v26 = vld [vmem:[#allocation104_spill] sm:$0xff] }
 0xb92   :  { %v4179_v32 = vpop.eup %4178  ;;  %v2966_v18 = vmul.f32 %v4177_v24, %v7421_v21  ;;  %4188 = vpow2.f32 %v2916_v13  ;;  %v3104_v19 = vpack.c.bf16 %v6662_v41, %v6646_v33  ;;  %v2257_v47 = vsub.f32 0.0, %v2240_v10  ;;  %v7429_v21 = vld [vmem:[#allocation43_spill] sm:$0xff] }
 0xb93   :  { %v4181_v36 = vpop.eup %4180  ;;  %4190 = vrcp.f32 %v2935_v2  ;;  %v2868_v40 = vpop.f32.mrf.mxu3  ;;  %v2619_v8 = vadd.f32 1.0, %v4179_v32  ;;  %v2603_v24 = vmul.f32 1.442695, %v2573_v52  ;;  %v7427_v2 = vld [vmem:[#allocation89_spill] sm:$0xff] }
 0xb94   :  { %v4183_v58 = vpop.eup %4182  ;;  %4192 = vpow2.f32 %v2601_v35  ;;  %v2869_v43 = vadd.f32 %v2868_v40, %v7356_v14  ;;  %v3030_v25 = vadd.f32 %v2966_v18, %v2649_v45  ;;  %v2999_v14 = vadd.f32 %v1699_v9, %v1382_v7 }
 0xb95   :  { %v4185_v11 = vpop.eup %4184  ;;  %4194 = vpow2.f32 %v1337_v15  ;;  %v2333_v35 = vmul.f32 %v4183_v58, %v7426_v26  ;;  %v2557_v15 = vadd.f32 %v2556_v1, %v7360_v37  ;;  %v1986_v49 = vadd.f32 1.0, %v4181_v36 }
 0xb96   :  { %4196 = vrcp.f32 %v1669_v20  ;;  %v2889_v17 = vsub.f32 0.0, %v2869_v43  ;;  %v3062_v44 = vadd.f32 %v3030_v25, %v7425_v39  ;;  %v4187_v4 = vpop.eup %4186  ;;  %v7428_v20 = vld [vmem:[#allocation87_spill] sm:$0xff]  ;;  %v1971_v45 = vmul.f32 1.442695, %v1940_v53 }
 0xb97   :  { %4198 = vpow2.f32 %v1654_v57  ;;  %v2016_v59 = vmul.f32 %v6654_v56, %v7428_v20  ;;  %v2650_v18 = vmul.f32 %v4187_v4, %v7429_v21  ;;  %v7430_v57 = vld [vmem:[#allocation103_spill] sm:$0xff]  ;;  %v2303_v40 = vadd.f32 1.0, %v4185_v11 }
 0xb98   :  { %v4189_v13 = vpop.eup %4188  ;;  %v2918_v63 = vmul.f32 1.442695, %v2889_v17  ;;  %v6680_v32 = vadd.f32 %v3062_v44, %v7427_v2  ;;  %4200 = vrcp.f32 %v2619_v8  ;;  %v2288_v12 = vmul.f32 1.442695, %v2257_v47 }
 0xb99   :  { %v4191_v6 = vpop.eup %4190  ;;  %v2936_v46 = vadd.f32 1.0, %v4189_v13  ;;  %v3015_v58 = vadd.f32 %v2333_v35, %v2016_v59  ;;  %v2574_v36 = vsub.f32 0.0, %v2557_v15  ;;  %v3047_v29 = vadd.f32 %v2999_v14, %v2983_v23  ;;  %v7431_v35 = vld [vmem:[#allocation57_spill] sm:$0xff]  ;;  %v7432_v13 = vld [vmem:[#allocation88_spill] sm:$0xff]  ;;  %v7433_v59 = vld [vmem:[#allocation94_spill] sm:$0xff] }
 0xb9a   :  { %v4193_v16 = vpop.eup %4192  ;;  %v2967_v30 = vmul.f32 %v4191_v6, %v7430_v57  ;;  %4202 = vpow2.f32 %v2918_v63  ;;  %v720_v15 = vadd.f32 1.0, %v6532_v55  ;;  %v1037_v55 = vadd.f32 1.0, %v6570_v51 }
 0xb9b   :  { %v4195_v10 = vpop.eup %4194  ;;  %4204 = vrcp.f32 %v2936_v46  ;;  %v2871_v9 = vpop.f32.mrf.mxu3  ;;  %v2620_v8 = vadd.f32 1.0, %v4193_v16  ;;  %v2605_v17 = vmul.f32 1.442695, %v2574_v36 }
 0xb9c   :  { %v4197_v52 = vpop.eup %4196  ;;  %4206 = vpow2.f32 %v2603_v24  ;;  %v2872_v43 = vadd.f32 %v2871_v9, %v7418_v61  ;;  %v3031_v25 = vadd.f32 %v2967_v30, %v2650_v18  ;;  %v7434_v18 = vld [vmem:[#allocation18_spill] sm:$0xff]  ;;  %v7435_v30 = vld [vmem:[#allocation20_spill] sm:$0xff] }
 0xb9d   :  { %v4199_v56 = vpop.eup %4198  ;;  %4208 = vrcp.f32 %v1986_v49  ;;  %v1701_v16 = vmul.f32 %v4197_v52, %v7433_v59  ;;  %v750_v57 = vmul.f32 %v6516_v0, %v7434_v18  ;;  %v7436_v9 = vld [vmem:[#allocation44_spill] sm:$0xff]  ;;  %v7438_v52 = vld [vmem:[#allocation106_spill] sm:$0xff] }
 0xb9e   :  { %4210 = vpow2.f32 %v1971_v45  ;;  %v2890_v1 = vsub.f32 0.0, %v2872_v43  ;;  %v3063_v7 = vadd.f32 %v3031_v25, %v3015_v58  ;;  %v4201_v53 = vpop.eup %4200  ;;  %v1067_v58 = vmul.f32 %v6566_v28, %v7436_v9  ;;  %v7441_v28 = vld [vmem:[#allocation105_spill] sm:$0xff] }
 0xb9f   :  { %4212 = vrcp.f32 %v2303_v40  ;;  %v2651_v47 = vmul.f32 %v4201_v53, %v7431_v35  ;;  %v1354_v25 = vadd.f32 1.0, %v4195_v10  ;;  %v1671_v53 = vadd.f32 1.0, %v4199_v56 }
 0xba0   :  { %v4203_v11 = vpop.eup %4202  ;;  %4214 = vpow2.f32 %v2288_v12  ;;  %v2920_v39 = vmul.f32 1.442695, %v2890_v1  ;;  %v6687_v44 = vadd.f32 %v3063_v7, %v3047_v29  ;;  %v7439_v29 = vld [vmem:[#allocation77_spill] sm:$0xff]  ;;  %v2985_v35 = vadd.f32 %v1067_v58, %v750_v57  ;;  %v7445_v58 = vld [vmem:[#allocation96_spill] sm:$0xff] }
 0xba1   :  { %v4205_v4 = vpop.eup %4204  ;;  %4216 = vrcp.f32 %v2620_v8  ;;  %v2937_v26 = vadd.f32 1.0, %v4203_v11 }
 0xba2   :  { %v4207_v61 = vpop.eup %4206  ;;  %v2968_v24 = vmul.f32 %v4205_v4, %v7432_v13  ;;  %4218 = vpow2.f32 %v2920_v39  ;;  %v3105_v23 = vpack.c.bf16 %v6687_v44, %v6680_v32  ;;  %v7440_v39 = vld [vmem:[#allocation58_spill] sm:$0xff]  ;;  %v3695_v32 = vld [vmem:[%s6776_s7] sm:$0xff]  ;;  %v3137_v44 = vpop.permute.xlu1 %3136 }
 0xba3   :  { %v4209_v14 = vpop.eup %4208  ;;  %4220 = vrcp.f32 %v2937_v26  ;;  %v2873_v63 = vpop.f32.mrf.mxu3  ;;  %v2621_v20 = vadd.f32 1.0, %v4207_v61 }
 0xba4   :  { %v4211_v2 = vpop.eup %4210  ;;  %4222 = vpow2.f32 %v2605_v17  ;;  %v2874_v6 = vadd.f32 %v2873_v63, %v7360_v37  ;;  %v3032_v49 = vadd.f32 %v2968_v24, %v2651_v47  ;;  %v7437_v37 = vld [vmem:[#allocation78_spill] sm:$0xff] }
 0xba5   :  { %v4213_v46 = vpop.eup %4212  ;;  %4224 = vrcp.f32 %v720_v15  ;;  %v1384_v36 = vmul.f32 %v6599_v31, %v7437_v37  ;;  %v7442_v31 = vld [vmem:[#allocation36_spill] sm:$0xff]  ;;  %v1988_v47 = vadd.f32 1.0, %v4211_v2  ;;  %v7444_v2 = vld [vmem:[#allocation74_spill] sm:$0xff] }
 0xba6   :  { %v4215_v45 = vpop.eup %4214  ;;  %v2891_v21 = vsub.f32 0.0, %v2874_v6  ;;  %v3064_v40 = vadd.f32 %v3032_v49, %v7435_v30  ;;  %v2335_v8 = vmul.f32 %v4213_v46, %v7438_v52  ;;  %4226 = vrcp.f32 %v2621_v20  ;;  %v7447_v52 = vld [vmem:[#allocation46_spill] sm:$0xff] }
 0xba7   :  { %v4217_v12 = vpop.eup %4216  ;;  %v3001_v17 = vadd.f32 %v1701_v16, %v1384_v36  ;;  %v2018_v61 = vmul.f32 %v4209_v14, %v7442_v31  ;;  %v2305_v10 = vadd.f32 1.0, %v4215_v45  ;;  %v7443_v45 = vld [vmem:[#allocation79_spill] sm:$0xff]  ;;  %v7446_v36 = vld [vmem:[#allocation21_spill] sm:$0xff] }
 0xba8   :  { %v4219_v43 = vpop.eup %4218  ;;  %v2922_v1 = vmul.f32 1.442695, %v2891_v21  ;;  %v6706_v7 = vadd.f32 %v3064_v40, %v7439_v29  ;;  %v2652_v4 = vmul.f32 %v4217_v12, %v7440_v39 }
 0xba9   :  { %v4221_v0 = vpop.eup %4220  ;;  %v2938_v11 = vadd.f32 1.0, %v4219_v43  ;;  %v3017_v13 = vadd.f32 %v2335_v8, %v2018_v61  ;;  %v3049_v63 = vadd.f32 %v3001_v17, %v2985_v35  ;;  %v7454_v61 = vld [vmem:[#allocation107_spill] sm:$0xff] }
 0xbaa   :  { %v4223_v51 = vpop.eup %4222  ;;  %v2969_v26 = vmul.f32 %v4221_v0, %v7441_v28  ;;  %4228 = vpow2.f32 %v2922_v1  ;;  %v7448_v1 = vld [vmem:[#allocation81_spill] sm:$0xff]  ;;  %v7449_v0 = vld [vmem:[#allocation108_spill] sm:$0xff] }
 0xbab   :  { %4230 = vrcp.f32 %v2938_v11  ;;  %v4225_v15 = vpop.eup %4224  ;;  %v2622_v56 = vadd.f32 1.0, %v4223_v51  ;;  %v7450_v11 = vld [vmem:[#allocation80_spill] sm:$0xff] }
 0xbac   :  { %4232 = vrcp.f32 %v1037_v55  ;;  %v3033_v24 = vadd.f32 %v2969_v26, %v2652_v4  ;;  %v4227_v49 = vpop.eup %4226  ;;  %v7451_v51 = vld [vmem:[#allocation24_spill] sm:$0xff]  ;;  %v7452_v4 = vld [vmem:[#allocation41_spill] sm:$0xff] }
 0xbad   :  { %4234 = vrcp.f32 %v1671_v53  ;;  %v2653_v21 = vmul.f32 %v4227_v49, %v7443_v45  ;;  %v752_v39 = vmul.f32 %v4225_v15, %v7451_v51  ;;  %v7453_v26 = vld [vmem:[#allocation97_spill] sm:$0xff] }
 0xbae   :  { %4236 = vrcp.f32 %v1354_v25  ;;  %v3065_v6 = vadd.f32 %v3033_v24, %v3017_v13 }
 0xbaf   :  { %4238 = vrcp.f32 %v2305_v10 }
 0xbb0   :  { %v4229_v46 = vpop.eup %4228  ;;  %4240 = vrcp.f32 %v1988_v47  ;;  %v3081_v20 = vadd.f32 %v3065_v6, %v3049_v63 }
 0xbb1   :  { %v4231_v59 = vpop.eup %4230  ;;  %4242 = vrcp.f32 %v2622_v56  ;;  %v2939_v14 = vadd.f32 1.0, %v4229_v46 }
 0xbb2   :  { %v4233_v16 = vpop.eup %4232  ;;  %v2970_v18 = vmul.f32 %v4231_v59, %v7444_v2  ;;  %v3106_v57 = vpack.c.bf16 %v3081_v20, %v6706_v7 }
 0xbb3   :  { %v4235_v30 = vpop.eup %4234  ;;  %4244 = vrcp.f32 %v2939_v14  ;;  %v1069_v8 = vmul.f32 %v4233_v16, %v7447_v52 }
 0xbb4   :  { %v4237_v40 = vpop.eup %4236  ;;  %v3034_v12 = vadd.f32 %v2970_v18, %v2653_v21  ;;  %v1703_v37 = vmul.f32 %v4235_v30, %v7445_v58 }
 0xbb5   :  { %v4239_v55 = vpop.eup %4238  ;;  %v1386_v29 = vmul.f32 %v4237_v40, %v7448_v1  ;;  %v2987_v24 = vadd.f32 %v1069_v8, %v752_v39 }
 0xbb6   :  { %v4241_v9 = vpop.eup %4240  ;;  %v3066_v43 = vadd.f32 %v3034_v12, %v7446_v36  ;;  %v2337_v53 = vmul.f32 %v4239_v55, %v7449_v0 }
 0xbb7   :  { %v4243_v25 = vpop.eup %4242  ;;  %v2020_v28 = vmul.f32 %v4241_v9, %v7452_v4  ;;  %v3003_v35 = vadd.f32 %v1703_v37, %v1386_v29 }
 0xbb8   :  { %v3082_v17 = vadd.f32 %v3066_v43, %v7450_v11  ;;  %v2654_v31 = vmul.f32 %v4243_v25, %v7453_v26 }
 0xbb9   :  { %v4245_v7 = vpop.eup %4244  ;;  %v3019_v47 = vadd.f32 %v2337_v53, %v2020_v28  ;;  %v3051_v56 = vadd.f32 %v3003_v35, %v2987_v24 }
 0xbba   :  { %v2971_v10 = vmul.f32 %v4245_v7, %v7454_v61 }
 0xbbc   :  { %v3035_v13 = vadd.f32 %v2971_v10, %v2654_v31 }
 0xbbe   :  { %v3067_v63 = vadd.f32 %v3035_v13, %v3019_v47 }
 0xbc0   :  { %v3083_v6 = vadd.f32 %v3067_v63, %v3051_v56 }
 0xbc2   :  { %v3107_v49 = vpack.c.bf16 %v3083_v6, %v3082_v17 }
 0xbc4   :  { %3252 = vmatpush.bf16.msra.mxu0 %v3107_v49 }
 0xbc8   :  { %3253 = vmatpush.bf16.msra.mxu0 %v3106_v57  ;;  %v3152_v57 = vpop.permute.xlu1 %3151 }
 0xbcc   :  { %3254 = vmatpush.bf16.msra.mxu0 %v3105_v23 }
 0xbd0   :  { %3255 = vmatpush.bf16.msra.mxu0 %v3104_v19  ;;  %v3167_v8 = vpop.permute.xlu1 %3166 }
 0xbd4   :  { %3256 = vmatpush.bf16.msra.mxu0 %v3103_v27  ;;  %v3132_v27 = vpop.permute.xlu0 %3131 }
 0xbd8   :  { %3257 = vmatpush.bf16.msra.mxu0 %v3102_v48  ;;  %v3182_v26 = vpop.permute.xlu1 %3181 }
 0xbdc   :  { %3258 = vmatpush.bf16.msra.mxu0 %v3101_v54  ;;  %v3127_v54 = vpop.permute.xlu2 %3126  ;;  %v3147_v45 = vpop.permute.xlu0 %3146 }
 0xbe0   :  { %3259 = vmatpush.bf16.msra.mxu0 %v3100_v34  ;;  %v3701_v34 = vld [vmem:[%s6776_s7 + $0x30] sm:$0xff]  ;;  %s4351_s7 = smov [#allocation2]  }
 0xbe1   :  { %s3337_s18 = sshll.u32 %s4351_s7, 4  ;;  %s3338_s18 = int_to_ptr.vmem [resolvable:$true] %s3337_s18 }
 0xbe3   :  { %3260 = vmatmul.bf16.vlgmr.msra.gmra.mxu0 %v3695_v32  ;;  %v3197_v32 = vpop.permute.xlu1 %3196 }
 0xbe4   :  { %v3142_v20 = vpop.permute.xlu2 %3141  ;;  %v3162_v36 = vpop.permute.xlu0 %3161 }
 0xbec   :  { %v3157_v55 = vpop.permute.xlu2 %3156  ;;  %v3177_v51 = vpop.permute.xlu0 %3176 }
 0xbf3   :  { %3265 = vmatmul.bf16.gmra.mxu0 %v3696_v62 }
 0xbf4   :  { %v3172_v53 = vpop.permute.xlu2 %3171  ;;  %v3192_v56 = vpop.permute.xlu0 %3191 }
 0xbfc   :  { %v3187_v35 = vpop.permute.xlu2 %3186 }
 0xc03   :  { %3270 = vmatmul.bf16.gmra.mxu0 %v3697_v60 }
 0xc13   :  { %3275 = vmatmul.bf16.gmra.mxu0 %v3698_v50 }
 0xc23   :  { %3280 = vmatmul.bf16.gmra.mxu0 %v3699_v5  ;;  %v3202_v5 = vpop.permute.xlu2 %3201 }
 0xc33   :  { %3285 = vmatmul.bf16.gmra.mxu0 %v3700_v3 }
 0xc43   :  { %3290 = vmatmul.bf16.gmra.mxu0 %v3701_v34 }
 0xc53   :  { %3295 = vmatmul.bf16.gmra.mxu0 %v3702_v22 }
 0xc60   :  { %v3261_v42 = vpop.f32.mrf.mxu0 }
 0xc61   :  { %v3262_v48 = vadd.f32 %v3261_v42, %v3127_v54 }
 0xc63   :  { %v3301_v38 = vmax.f32 %v3262_v48, 0.0 }
 0xc65   :  { %3317 = vst [vmem:[#allocation2] sm:$0xff] %v3301_v38 }
 0xc68   :  { %v3263_v33 = vpop.f32.mrf.mxu0 }
 0xc69   :  { %v3264_v41 = vadd.f32 %v3263_v33, %v3132_v27 }
 0xc6b   :  { %v3302_v19 = vmax.f32 %v3264_v41, 0.0 }
 0xc6d   :  { %3318 = vst [vmem:[#allocation2 + $0x8] sm:$0xff] %v3302_v19 }
 0xc70   :  { %v3266_v23 = vpop.f32.mrf.mxu0 }
 0xc71   :  { %v3267_v15 = vadd.f32 %v3266_v23, %v3137_v44 }
 0xc73   :  { %v3303_v46 = vmax.f32 %v3267_v15, 0.0 }
 0xc75   :  { %3319 = vst [vmem:[#allocation2 + $0x10] sm:$0xff] %v3303_v46 }
 0xc78   :  { %v3268_v59 = vpop.f32.mrf.mxu0 }
 0xc79   :  { %v3269_v14 = vadd.f32 %v3268_v59, %v3142_v20 }
 0xc7b   :  { %v3304_v16 = vmax.f32 %v3269_v14, 0.0 }
 0xc7d   :  { %3320 = vst [vmem:[#allocation2 + $0x18] sm:$0xff] %v3304_v16 }
 0xc80   :  { %v3271_v21 = vpop.f32.mrf.mxu0 }
 0xc81   :  { %v3272_v2 = vadd.f32 %v3271_v21, %v3147_v45 }
 0xc83   :  { %v3305_v18 = vmax.f32 %v3272_v2, 0.0 }
 0xc85   :  { %3321 = vst [vmem:[#allocation2 + $0x20] sm:$0xff] %v3305_v18 }
 0xc88   :  { %v3273_v30 = vpop.f32.mrf.mxu0 }
 0xc89   :  { %v3274_v40 = vadd.f32 %v3273_v30, %v3152_v57 }
 0xc8b   :  { %v3306_v12 = vmax.f32 %v3274_v40, 0.0 }
 0xc8d   :  { %3322 = vst [vmem:[#allocation2 + $0x28] sm:$0xff] %v3306_v12 }
 0xc90   :  { %v3276_v9 = vpop.f32.mrf.mxu0 }
 0xc91   :  { %v3277_v58 = vadd.f32 %v3276_v9, %v3157_v55 }
 0xc93   :  { %v3307_v37 = vmax.f32 %v3277_v58, 0.0 }
 0xc95   :  { %3323 = vst [vmem:[#allocation2 + $0x30] sm:$0xff] %v3307_v37 }
 0xc98   :  { %v3278_v43 = vpop.f32.mrf.mxu0 }
 0xc99   :  { %v3279_v25 = vadd.f32 %v3278_v43, %v3162_v36 }
 0xc9b   :  { %v3308_v52 = vmax.f32 %v3279_v25, 0.0 }
 0xc9d   :  { %3324 = vst [vmem:[#allocation2 + $0x38] sm:$0xff] %v3308_v52 }
 0xca0   :  { %v3281_v1 = vpop.f32.mrf.mxu0 }
 0xca1   :  { %v3282_v29 = vadd.f32 %v3281_v1, %v3167_v8 }
 0xca3   :  { %v3309_v0 = vmax.f32 %v3282_v29, 0.0 }
 0xca5   :  { %3325 = vst [vmem:[#allocation2 + $0x40] sm:$0xff] %v3309_v0 }
 0xca8   :  { %v3283_v11 = vpop.f32.mrf.mxu0 }
 0xca9   :  { %v3284_v17 = vadd.f32 %v3283_v11, %v3172_v53 }
 0xcab   :  { %v3310_v7 = vmax.f32 %v3284_v17, 0.0 }
 0xcad   :  { %3326 = vst [vmem:[#allocation2 + $0x48] sm:$0xff] %v3310_v7 }
 0xcb0   :  { %v3286_v39 = vpop.f32.mrf.mxu0 }
 0xcb1   :  { %v3287_v4 = vadd.f32 %v3286_v39, %v3177_v51 }
 0xcb3   :  { %v3311_v28 = vmax.f32 %v3287_v4, 0.0 }
 0xcb5   :  { %3327 = vst [vmem:[#allocation2 + $0x50] sm:$0xff] %v3311_v28 }
 0xcb8   :  { %v3288_v31 = vpop.f32.mrf.mxu0 }
 0xcb9   :  { %v3289_v61 = vadd.f32 %v3288_v31, %v3182_v26 }
 0xcbb   :  { %v3312_v10 = vmax.f32 %v3289_v61, 0.0 }
 0xcbd   :  { %3328 = vst [vmem:[#allocation2 + $0x58] sm:$0xff] %v3312_v10 }
 0xcc0   :  { %v3291_v47 = vpop.f32.mrf.mxu0 }
 0xcc1   :  { %v3292_v13 = vadd.f32 %v3291_v47, %v3187_v35 }
 0xcc3   :  { %v3313_v24 = vmax.f32 %v3292_v13, 0.0 }
 0xcc5   :  { %3329 = vst [vmem:[#allocation2 + $0x60] sm:$0xff] %v3313_v24 }
 0xcc8   :  { %v3293_v63 = vpop.f32.mrf.mxu0 }
 0xcc9   :  { %v3294_v6 = vadd.f32 %v3293_v63, %v3192_v56 }
 0xccb   :  { %v3314_v49 = vmax.f32 %v3294_v6, 0.0 }
 0xccd   :  { %3330 = vst [vmem:[#allocation2 + $0x68] sm:$0xff] %v3314_v49 }
 0xcd0   :  { %v3296_v62 = vpop.f32.mrf.mxu0 }
 0xcd1   :  { %v3297_v60 = vadd.f32 %v3296_v62, %v3197_v32 }
 0xcd3   :  { %v3315_v50 = vmax.f32 %v3297_v60, 0.0 }
 0xcd5   :  { %3331 = vst [vmem:[#allocation2 + $0x70] sm:$0xff] %v3315_v50 }
 0xcd8   :  { %v3298_v3 = vpop.f32.mrf.mxu0 }
 0xcd9   :  { %v3299_v34 = vadd.f32 %v3298_v3, %v3202_v5 }
 0xcdb   :  { %v3316_v22 = vmax.f32 %v3299_v34, 0.0 }
 0xcdd   :  { %3332 = vst [vmem:[#allocation2 + $0x78] sm:$0xff] %v3316_v22 }
 0xcde   :  { %3345 = dma.vmem_to_hbm [thread:$0]  %s3338_s18, 2048, %s3340_s20, [#allocation3], %s4352_s21, %s4352_s21, %s4353_s22  }
 0xcdf   :  { %4348 = dma.done.wait [#allocation3], 2048  }
 0xce0   :  { %4349 = vsyncadd [#allocation3], 4294965248 }
 0xce1   :  { %3350 = vsyncpa [#allocation3], 1 }

</bundles_post_ra>
